<compile_context>
chip_gen: v5e
topology: v5e:2x2
jax: 0.10.0
libtpu: 0.0.40
codegen_flags: <defaults>
</compile_context>

<pallas_src>
import functools

import jax
import jax.numpy as jnp
from jax.experimental import pallas as pl
from jax.experimental.pallas import tpu as pltpu


# ------------------------------ kernel helpers -------------------------------


def _layernorm(x, gamma, beta, eps=1e-5):
    mu = jnp.mean(x, axis=-1, keepdims=True)
    var = jnp.mean((x - mu) ** 2, axis=-1, keepdims=True)
    return (x - mu) * jax.lax.rsqrt(var + eps) * gamma + beta


def _softmax_lastdim(x):
    # f32 softmax; denominator via approx reciprocal (EUP slot, VALU stays free)
    x = x - jnp.max(x, axis=-1, keepdims=True)
    e = jnp.exp(x)
    return e * pl.reciprocal(jnp.sum(e, axis=-1, keepdims=True), approx=True)


# --------------------------------- kernel ------------------------------------


def vit_fused_kernel(
    # inputs
    patches_ref, wemb_ref, posb_ref,
    wqkv_ref, wo_ref, bo_ref, g1_ref, b1_ref,
    w1_ref, bb1_ref, w2_ref, bb2_ref, g2_ref, b2_ref,
    wcls_ref, bcls_ref,
    # outputs
    logits_ref,
    # scratch
    tok_ref,
    *, nhead, dim_head,
):
    layer = pl.program_id(1)
    n_layer = pl.num_programs(1)

    n_tok, d_model = posb_ref.shape
    m_rows = tok_ref.shape[0]          # batch_tile * n_tok  (batch folded into M)
    bt = m_rows // n_tok
    inner = nhead * dim_head
    cdt = wqkv_ref.dtype               # MXU operand dtype (bfloat16)
    f32 = jnp.float32

    # ---- patch embedding + position embedding (first layer step only) -------
    @pl.when(layer == 0)
    def _():
        emb = jnp.dot(patches_ref[...], wemb_ref[...], preferred_element_type=f32)
        emb = emb.reshape(bt, n_tok, d_model) + posb_ref[...]   # conv bias + pos folded
        # nn.Dropout after the embedding: identity in eval mode.
        tok_ref[...] = emb.reshape(m_rows, d_model)

    x = tok_ref[...]                   # resident f32 tokens, [bt*n_tok, D]
    xc = x.astype(cdt)

    # ---- multi-head self-attention ------------------------------------------
    # ONE fused 3*inner-wide projection matmul (lane-dense MXU use); heads are
    # peeled off the result as static 64-wide lane slices and batched over
    # (head, batch_tile) for the score / att@V dot_generals (softmax emitted
    # once).  The out-projection is a single [M, inner] @ [inner, D] matmul.
    # The 1/sqrt(dim_head) scale is folded into the q columns of wqkv.
    qkv = jnp.dot(xc, wqkv_ref[0], preferred_element_type=f32)   # [M, 3*inner]

    def split_heads(base):
        # columns [base : base+inner] hold all heads of one of q/k/v in (h, d)
        # order -> build [nhead*bt, n_tok, dh] (head-major group axis); only
        # leading-dim reshapes are used, the minor (dh) dim is untouched.
        parts = [qkv[:, base + h * dim_head: base + (h + 1) * dim_head]
                 .reshape(1, m_rows, dim_head) for h in range(nhead)]
        stacked = parts[0] if nhead == 1 else jnp.concatenate(parts, axis=0)
        return stacked.reshape(nhead * bt, n_tok, dim_head).astype(cdt)

    q3 = split_heads(0 * inner)
    k3 = split_heads(1 * inner)
    v3 = split_heads(2 * inner)

    dots = jnp.einsum("gid,gjd->gij", q3, k3, preferred_element_type=f32)
    att = _softmax_lastdim(dots)                                  # f32
    ctx = jnp.einsum("gij,gjd->gid", att.astype(cdt), v3,
                     preferred_element_type=f32)                  # [H*bt, n, dh]

    # reassemble [M, inner] in (h, d) column order (wo rows packed to match)
    ctx_h = ctx.reshape(nhead, m_rows, dim_head)
    if nhead == 1:
        ctx2 = ctx_h[0]
    else:
        ctx2 = jnp.concatenate([ctx_h[h] for h in range(nhead)], axis=-1)
    attn = (jnp.dot(ctx2.astype(cdt), wo_ref[0], preferred_element_type=f32)
            + bo_ref[0])

    # norm_first = False in this module:  x = LN1(attn(x)) + x
    y = _layernorm(attn, g1_ref[0], b1_ref[0]) + x

    # ---- feed-forward: Linear -> ReLU -> Linear -> ReLU, LN2 + residual ------
    # Processed in M-row chunks staged through tok_ref so vreg live ranges stay
    # bounded when batch_tile grows; single-chunk path is fully inlined.
    chunk = m_rows
    if m_rows > 256:
        for c in (256, 128, 64):
            if m_rows % c == 0:
                chunk = c
                break
    n_chunks = m_rows // chunk

    def ff(yc):
        h1 = (jnp.dot(yc.astype(cdt), w1_ref[0], preferred_element_type=f32)
              + bb1_ref[0])
        h1 = jnp.maximum(h1, 0.0)
        h2 = (jnp.dot(h1.astype(cdt), w2_ref[0], preferred_element_type=f32)
              + bb2_ref[0])
        h2 = jnp.maximum(h2, 0.0)
        return _layernorm(h2, g2_ref[0], b2_ref[0]) + yc

    if n_chunks == 1:
        tok_ref[...] = ff(y)
    else:
        tok_ref[...] = y

        def body(c, carry):
            r0 = pl.multiple_of(c * chunk, chunk)
            yc = tok_ref[pl.ds(r0, chunk), :]
            tok_ref[pl.ds(r0, chunk), :] = ff(yc)
            return carry

        jax.lax.fori_loop(0, n_chunks, body, 0)

    # ---- classifier head (after the last layer only) -------------------------
    # Only lane-dense logits leave the kernel; softmax / argmax run in the
    # wrapper (tiny epilogue), keeping the serial tail of the last step short.
    @pl.when(layer == n_layer - 1)
    def _():
        t = tok_ref[...]
        xm = jnp.mean(t.reshape(bt, n_tok, d_model), axis=1)      # [bt, D]
        logits_ref[...] = (jnp.dot(xm.astype(cdt), wcls_ref[...],
                                   preferred_element_type=f32) + bcls_ref[...])


# -------------------------------- wrapper -------------------------------------


def extract_patches(x, ph, pw):
    """[B, C, H, W] (NCHW, as Conv2d sees it) -> [B, N, C*ph*pw]."""
    B, C, H, W = x.shape
    hp, wp = H // ph, W // pw
    x = x.reshape(B, C, hp, ph, wp, pw)
    x = x.transpose(0, 2, 4, 1, 3, 5)
    return x.reshape(B, hp * wp, C * ph * pw)


def _pick_batch_tile(B, N):
    """Pick rows-per-tile: fill the MXU M dim / amortize per-layer weight DMA
    (bt*N up to ~512), keeping any proper tile sublane-aligned (bt % 8 == 0) so
    the logits BlockSpec stays legal.  Override with cfg["batch_tile"] (e.g.
    B//2 on v7x so both TensorCores get a parallel grid slice)."""
    if B * N <= 512:
        return B
    best = B
    for bt in range(8, B, 8):
        if B % bt == 0 and bt * N <= 512:
            best = bt
    return best


def vit_forward(packed, x, cfg):
    ph, pw = cfg["patch"]
    nhead, dh = cfg["nhead"], cfg["dim_head"]
    cdt = packed["wqkv"].dtype

    patches = extract_patches(x, ph, pw)                  # [B, N, K]
    B, N, K = patches.shape
    patches = patches.reshape(B * N, K).astype(cdt)       # bf16 -> half the DMA

    D = packed["posb"].shape[1]
    L = packed["wqkv"].shape[0]
    ncls = packed["wcls"].shape[1]

    bt = cfg.get("batch_tile") or _pick_batch_tile(B, N)
    assert B % bt == 0
    nbt = B // bt

    kernel = functools.partial(vit_fused_kernel, nhead=nhead, dim_head=dh)

    def const2(a, b):                                     # layer-independent block
        return pl.BlockSpec((a, b), lambda bi, l: (0, 0))

    def per_layer(arr):                                   # stacked [L, ...] weights
        shape = arr.shape
        n_rest = len(shape) - 1
        return pl.BlockSpec((1,) + tuple(shape[1:]),
                            lambda bi, l, _n=n_rest: (l,) + (0,) * _n)

    # TODO(synk): for large real-ViT widths, patches/wemb (layer 0 only) and
    # wcls/bcls (last layer only) should move to memory_space=pl.ANY + manual
    # DMA under pl.when to avoid resident VMEM cost; negligible at this size.
    in_specs = [
        pl.BlockSpec((bt * N, K), lambda bi, l: (bi, 0)),  # patches (per batch tile)
        const2(K, D),                                      # wemb
        const2(N, D),                                      # pos + conv bias
        per_layer(packed["wqkv"]),                         # [L, D, 3*inner] (q scaled)
        per_layer(packed["wo"]),                           # [L, inner, D]
        per_layer(packed["bo"]),
        per_layer(packed["g1"]),
        per_layer(packed["b1"]),
        per_layer(packed["w1"]),
        per_layer(packed["bb1"]),
        per_layer(packed["w2"]),
        per_layer(packed["bb2"]),
        per_layer(packed["g2"]),
        per_layer(packed["b2"]),
        const2(D, ncls),                                   # classifier weight
        const2(1, ncls),                                   # classifier bias
    ]
    out_specs = pl.BlockSpec((bt, ncls), lambda bi, l: (bi, 0))

    logits = pl.pallas_call(
        kernel,
        out_shape=jax.ShapeDtypeStruct((B, ncls), jnp.float32),
        grid=(nbt, L),                                     # batch parallel, layer arbitrary (last)
        in_specs=in_specs,
        out_specs=out_specs,
        scratch_shapes=[pltpu.VMEM((bt * N, D), jnp.float32)],   # resident tokens
        compiler_params=pltpu.CompilerParams(
            dimension_semantics=("parallel", "arbitrary"),
            # <= ~48 MiB is a legal budget on every generation (v7x: 64 MiB
            # physical); v5e/v6e (128 MiB) may raise this for larger configs.
            vmem_limit_bytes=48 * 1024 * 1024,
        ),
    )(patches, packed["wemb"], packed["posb"],
      packed["wqkv"], packed["wo"], packed["bo"],
      packed["g1"], packed["b1"], packed["w1"], packed["bb1"],
      packed["w2"], packed["bb2"], packed["g2"], packed["b2"],
      packed["wcls"], packed["bcls"])

    prob = jax.nn.softmax(logits, axis=-1)
    pred = jnp.argmax(logits, axis=-1, keepdims=True).astype(jnp.int32)
    return {"logits": logits, "prob": prob, "pred": pred}


# --------------------------- parameters / packing -----------------------------


def init_params(key, cfg):
    """Float32 parameters matching the PyTorch module's parameterization."""
    C, H, W = cfg["input_size"]
    ph, pw = cfg["patch"]
    N = (H // ph) * (W // pw)
    K = C * ph * pw          # flattened patch size (Conv2d in-features)
    D = K                    # this ViT uses patch_dim as the model width
    inner = cfg["nhead"] * cfg["dim_head"]
    dff = cfg["dim_ff"]
    ncls = cfg["n_cls"]
    L = cfg["n_layer"]

    keys = iter(jax.random.split(key, 5 + 7 * L))

    def nrm(shape, s=0.05):
        return (s * jax.random.normal(next(keys), shape)).astype(jnp.float32)

    params = {
        "w_patch": nrm((K, D)),            # Conv2d(kernel=stride=patch) as matmul, [in, out]
        "b_patch": nrm((D,), 0.02),
        "pos": nrm((N, D)),                # position_embedding[0]
        "w_cls": nrm((D, ncls)),
        "b_cls": nrm((ncls,), 0.02),
        "layers": [],
    }
    for _ in range(L):
        params["layers"].append({
            "wqkv": nrm((D, 3 * inner)),   # MultiHeadAttention.qkv (bias=False), cols (qkv, head, dh)
            "wo": nrm((inner, D)),         # MultiHeadAttention.out, rows (head, dh)
            "bo": nrm((D,), 0.02),
            "g1": jnp.ones((D,), jnp.float32),
            "b1": jnp.zeros((D,), jnp.float32),
            "w1": nrm((D, dff)),
            "bb1": nrm((dff,), 0.02),
            "w2": nrm((dff, D)),
            "bb2": nrm((D,), 0.02),
            "g2": jnp.ones((D,), jnp.float32),
            "b2": jnp.zeros((D,), jnp.float32),
        })
    return params


def pack_params(params, cfg, compute_dtype=jnp.bfloat16):
    """One-time packing for the fused kernel: stack per-layer weights on a
    leading [n_layer, ...] axis, keep qkv FUSED as [L, D, 3*inner] (one
    lane-dense projection matmul per layer), fold the attention 1/sqrt(dim_head)
    scale into the q columns, cast MXU matmul operands to bf16 (biases / LN
    params / position stay f32).  (Weights could be int8 on v5e/v6e or fp8 on
    v7x if weight streaming is the bottleneck.)"""
    nhead, dh = cfg["nhead"], cfg["dim_head"]
    inner = nhead * dh
    scale = dh ** -0.5
    layers = params["layers"]

    def stack(name):
        return jnp.stack([lp[name] for lp in layers], axis=0)

    wqkv = stack("wqkv")                                   # [L, D, 3*inner]
    col_scale = jnp.concatenate([jnp.full((inner,), scale, jnp.float32),
                                 jnp.ones((2 * inner,), jnp.float32)])
    wqkv = wqkv * col_scale[None, None, :]                 # fold attention scale into q

    c = lambda a: a.astype(compute_dtype)
    f = lambda a: a.astype(jnp.float32)

    return {
        "wemb": c(params["w_patch"]),
        "posb": f(params["pos"] + params["b_patch"][None, :]),   # conv bias folded
        "wqkv": c(wqkv),
        "wo": c(stack("wo")),
        "bo": f(stack("bo"))[:, None, :],
        "g1": f(stack("g1"))[:, None, :],
        "b1": f(stack("b1"))[:, None, :],
        "w1": c(stack("w1")),
        "bb1": f(stack("bb1"))[:, None, :],
        "w2": c(stack("w2")),
        "bb2": f(stack("bb2"))[:, None, :],
        "g2": f(stack("g2"))[:, None, :],
        "b2": f(stack("b2"))[:, None, :],
        "wcls": c(params["w_cls"]),
        "bcls": f(params["b_cls"])[None, :],
    }


# --------------------------- pure-JAX reference --------------------------------


def vit_reference(packed, x, cfg):
    """Plain-JAX mirror of the PyTorch forward (same bf16-operand / f32-accum
    numerics as the kernel) used for validation."""
    ph, pw = cfg["patch"]
    nhead, dh = cfg["nhead"], cfg["dim_head"]
    inner = nhead * dh
    cdt = packed["wqkv"].dtype

    def mm(a, w):
        return jnp.dot(a.astype(cdt), w, preferred_element_type=jnp.float32)

    def ln(z, g, b, eps=1e-5):
        mu = jnp.mean(z, -1, keepdims=True)
        var = jnp.mean((z - mu) ** 2, -1, keepdims=True)
        return (z - mu) / jnp.sqrt(var + eps) * g + b

    patches = extract_patches(x, ph, pw)
    B, N, K = patches.shape
    D = packed["posb"].shape[1]

    t = mm(patches.reshape(B * N, K), packed["wemb"]).reshape(B, N, D)
    t = (t + packed["posb"][None]).reshape(B * N, D)

    L = packed["wqkv"].shape[0]
    for l in range(L):
        qkv = mm(t, packed["wqkv"][l])                     # [B*N, 3*inner], q pre-scaled

        def heads(a):                                      # [B*N, inner] -> [B, H, N, dh]
            return a.reshape(B, N, nhead, dh).transpose(0, 2, 1, 3)

        q = heads(qkv[:, 0 * inner:1 * inner])
        k = heads(qkv[:, 1 * inner:2 * inner])
        v = heads(qkv[:, 2 * inner:3 * inner])
        dots = jnp.einsum("bhid,bhjd->bhij", q.astype(cdt), k.astype(cdt),
                          preferred_element_type=jnp.float32)
        att = jax.nn.softmax(dots, axis=-1)
        ctx = jnp.einsum("bhij,bhjd->bhid", att.astype(cdt), v.astype(cdt),
                         preferred_element_type=jnp.float32)
        ctx = ctx.transpose(0, 2, 1, 3).reshape(B * N, inner)
        attn = mm(ctx, packed["wo"][l]) + packed["bo"][l]
        y = ln(attn, packed["g1"][l], packed["b1"][l]) + t
        h1 = jnp.maximum(mm(y, packed["w1"][l]) + packed["bb1"][l], 0.0)
        h2 = jnp.maximum(mm(h1, packed["w2"][l]) + packed["bb2"][l], 0.0)
        t = ln(h2, packed["g2"][l], packed["b2"][l]) + y

    xm = jnp.mean(t.reshape(B, N, D), axis=1)
    logits = mm(xm, packed["wcls"]) + packed["bcls"]
    prob = jax.nn.softmax(logits, axis=-1)
    pred = jnp.argmax(logits, axis=-1, keepdims=True).astype(jnp.int32)
    return {"logits": logits, "prob": prob, "pred": pred}


# ----------------------------------- main --------------------------------------


if __name__ == "__main__":
    cfg = dict(
        input_size=(4, 32, 32),   # (C, H, W)
        patch=(8, 8),             # -> n_patch = 16, patch_dim = 4*8*8 = 256
        nhead=2,
        dim_head=64,              # inner = 128
        dim_ff=256,
        n_layer=2,
        n_cls=128,
    )
    key = jax.random.PRNGKey(0)
    kp, kx = jax.random.split(key)
    raw_params = init_params(kp, cfg)
    packed = pack_params(raw_params, cfg)

    B = 2
    C, H, W = cfg["input_size"]
    x = jax.random.normal(kx, (B, C, H, W), jnp.float32)

    fwd = jax.jit(functools.partial(vit_forward, cfg=cfg))
    out = fwd(packed, x)
    jax.block_until_ready(out)

    ref = vit_reference(packed, x, cfg)

    assert out["logits"].shape == (B, cfg["n_cls"])
    assert out["prob"].shape == (B, cfg["n_cls"])
    assert out["pred"].shape == (B, 1)
    assert out["pred"].dtype == jnp.int32
    assert bool(jnp.all(jnp.isfinite(out["logits"])))
    assert bool(jnp.all(jnp.isfinite(out["prob"])))

    logit_diff = float(jnp.max(jnp.abs(out["logits"] - ref["logits"])))
    prob_diff = float(jnp.max(jnp.abs(out["prob"] - ref["prob"])))
    assert logit_diff < 1e-1, f"logits mismatch vs reference: {logit_diff}"
    assert prob_diff < 2e-2, f"prob mismatch vs reference: {prob_diff}"

    print("KERNEL_OK")
</pallas_src>

<mosaic_0001>
module attributes {stable_mosaic.version = 11 : i64} {
  func.func @vit_fused_kernel(%arg0: i32, %arg1: i32, %arg2: memref<32x256xbf16, #tpu.memory_space<vmem>>, %arg3: memref<256x256xbf16, #tpu.memory_space<vmem>>, %arg4: memref<16x256xf32, #tpu.memory_space<vmem>>, %arg5: memref<1x256x384xbf16, #tpu.memory_space<vmem>>, %arg6: memref<1x128x256xbf16, #tpu.memory_space<vmem>>, %arg7: memref<1x1x256xf32, #tpu.memory_space<vmem>>, %arg8: memref<1x1x256xf32, #tpu.memory_space<vmem>>, %arg9: memref<1x1x256xf32, #tpu.memory_space<vmem>>, %arg10: memref<1x256x256xbf16, #tpu.memory_space<vmem>>, %arg11: memref<1x1x256xf32, #tpu.memory_space<vmem>>, %arg12: memref<1x256x256xbf16, #tpu.memory_space<vmem>>, %arg13: memref<1x1x256xf32, #tpu.memory_space<vmem>>, %arg14: memref<1x1x256xf32, #tpu.memory_space<vmem>>, %arg15: memref<1x1x256xf32, #tpu.memory_space<vmem>>, %arg16: memref<256x128xbf16, #tpu.memory_space<vmem>>, %arg17: memref<1x128xf32, #tpu.memory_space<vmem>>, %arg18: memref<2x128xf32, #tpu.memory_space<vmem>>, %arg19: memref<32x256xf32, #tpu.memory_space<vmem>>) attributes {dimension_semantics = [#tpu.dimension_semantics<parallel>, #tpu.dimension_semantics<arbitrary>], iteration_bounds = array<i64: 1, 2>, scalar_prefetch = 0 : i64, scratch_operands = 1 : i64, tpu.core_type = #tpu.core_type<tc>, window_params = [{transform_indices = @transform_0, window_bounds = array<i64: 32, 256>}, {pipeline_mode = #tpu.pipeline_mode<synchronous>, transform_indices = @transform_1, window_bounds = array<i64: 256, 256>}, {pipeline_mode = #tpu.pipeline_mode<synchronous>, transform_indices = @transform_2, window_bounds = array<i64: 16, 256>}, {transform_indices = @transform_3, window_bounds = array<i64: 1, 256, 384>}, {transform_indices = @transform_4, window_bounds = array<i64: 1, 128, 256>}, {transform_indices = @transform_5, window_bounds = array<i64: 1, 1, 256>}, {transform_indices = @transform_6, window_bounds = array<i64: 1, 1, 256>}, {transform_indices = @transform_7, window_bounds = array<i64: 1, 1, 256>}, {transform_indices = @transform_8, window_bounds = array<i64: 1, 256, 256>}, {transform_indices = @transform_9, window_bounds = array<i64: 1, 1, 256>}, {transform_indices = @transform_10, window_bounds = array<i64: 1, 256, 256>}, {transform_indices = @transform_11, window_bounds = array<i64: 1, 1, 256>}, {transform_indices = @transform_12, window_bounds = array<i64: 1, 1, 256>}, {transform_indices = @transform_13, window_bounds = array<i64: 1, 1, 256>}, {pipeline_mode = #tpu.pipeline_mode<synchronous>, transform_indices = @transform_14, window_bounds = array<i64: 256, 128>}, {pipeline_mode = #tpu.pipeline_mode<synchronous>, transform_indices = @transform_15, window_bounds = array<i64: 1, 128>}, {transform_indices = @transform_16, window_bounds = array<i64: 2, 128>}]} {
    %c0_i32 = arith.constant 0 : i32
    %0 = arith.cmpi eq, %arg1, %c0_i32 : i32
    %1 = arith.extui %0 : i1 to i32
    %c0_i32_0 = arith.constant 0 : i32
    %2 = arith.cmpi ne, %1, %c0_i32_0 : i32
    scf.if %2 {
      %c0_57 = arith.constant 0 : index
      %c0_58 = arith.constant 0 : index
      %134 = vector.load %arg2[%c0_57, %c0_58] : memref<32x256xbf16, #tpu.memory_space<vmem>>, vector<32x256xbf16>
      %c0_59 = arith.constant 0 : index
      %c0_60 = arith.constant 0 : index
      %135 = vector.load %arg3[%c0_59, %c0_60] : memref<256x256xbf16, #tpu.memory_space<vmem>>, vector<256x256xbf16>
      %cst_61 = arith.constant dense<0.000000e+00> : vector<32x256xf32>
      %136 = tpu.matmul %134, %135, %cst_61 {dimension_numbers = #tpu.dot_dimension_numbers<[1], [0], [0], [1], [0, 0, 1, 1], [], []>} : vector<32x256xbf16>, vector<256x256xbf16>, vector<32x256xf32> -> vector<32x256xf32>
      %137 = vector.shape_cast %136 : vector<32x256xf32> to vector<2x16x256xf32>
      %c0_62 = arith.constant 0 : index
      %c0_63 = arith.constant 0 : index
      %138 = vector.load %arg4[%c0_62, %c0_63] : memref<16x256xf32, #tpu.memory_space<vmem>>, vector<16x256xf32>
      %139 = vector.shape_cast %138 : vector<16x256xf32> to vector<1x16x256xf32>
      %140 = vector.broadcast %139 : vector<1x16x256xf32> to vector<2x16x256xf32>
      %141 = arith.addf %137, %140 : vector<2x16x256xf32>
      %142 = vector.shape_cast %141 : vector<2x16x256xf32> to vector<32x256xf32>
      %c0_64 = arith.constant 0 : index
      %c0_65 = arith.constant 0 : index
      %143 = vector.load %arg19[%c0_64, %c0_65] : memref<32x256xf32, #tpu.memory_space<vmem>>, vector<32x256xf32>
      tpu.vector_store %arg19[%c0_64, %c0_65], %142 {strides = array<i32>} : memref<32x256xf32, #tpu.memory_space<vmem>>, vector<32x256xf32>,
    } else {
    }
    %c0 = arith.constant 0 : index
    %c0_1 = arith.constant 0 : index
    %3 = vector.load %arg19[%c0, %c0_1] : memref<32x256xf32, #tpu.memory_space<vmem>>, vector<32x256xf32>
    %4 = arith.truncf %3 : vector<32x256xf32> to vector<32x256xbf16>
    %c0_2 = arith.constant 0 : index
    %c0_3 = arith.constant 0 : index
    %c0_4 = arith.constant 0 : index
    %5 = vector.load %arg5[%c0_2, %c0_3, %c0_4] : memref<1x256x384xbf16, #tpu.memory_space<vmem>>, vector<1x256x384xbf16>
    %6 = vector.shape_cast %5 : vector<1x256x384xbf16> to vector<256x384xbf16>
    %cst = arith.constant dense<0.000000e+00> : vector<32x384xf32>
    %7 = tpu.matmul %4, %6, %cst {dimension_numbers = #tpu.dot_dimension_numbers<[1], [0], [0], [1], [0, 0, 1, 1], [], []>} : vector<32x256xbf16>, vector<256x384xbf16>, vector<32x384xf32> -> vector<32x384xf32>
    %8 = vector.extract_strided_slice %7 {offsets = [0, 0], sizes = [32, 64], strides = [1, 1]} : vector<32x384xf32> to vector<32x64xf32>
    %9 = vector.shape_cast %8 : vector<32x64xf32> to vector<1x32x64xf32>
    %10 = vector.extract_strided_slice %7 {offsets = [0, 64], sizes = [32, 64], strides = [1, 1]} : vector<32x384xf32> to vector<32x64xf32>
    %11 = vector.shape_cast %10 : vector<32x64xf32> to vector<1x32x64xf32>
    %12 = tpu.concatenate %9, %11 in 0 : vector<1x32x64xf32>, vector<1x32x64xf32> -> vector<2x32x64xf32>
    %13 = vector.shape_cast %12 : vector<2x32x64xf32> to vector<4x16x64xf32>
    %14 = arith.truncf %13 : vector<4x16x64xf32> to vector<4x16x64xbf16>
    %15 = vector.extract_strided_slice %7 {offsets = [0, 128], sizes = [32, 64], strides = [1, 1]} : vector<32x384xf32> to vector<32x64xf32>
    %16 = vector.shape_cast %15 : vector<32x64xf32> to vector<1x32x64xf32>
    %17 = vector.extract_strided_slice %7 {offsets = [0, 192], sizes = [32, 64], strides = [1, 1]} : vector<32x384xf32> to vector<32x64xf32>
    %18 = vector.shape_cast %17 : vector<32x64xf32> to vector<1x32x64xf32>
    %19 = tpu.concatenate %16, %18 in 0 : vector<1x32x64xf32>, vector<1x32x64xf32> -> vector<2x32x64xf32>
    %20 = vector.shape_cast %19 : vector<2x32x64xf32> to vector<4x16x64xf32>
    %21 = arith.truncf %20 : vector<4x16x64xf32> to vector<4x16x64xbf16>
    %22 = vector.extract_strided_slice %7 {offsets = [0, 256], sizes = [32, 64], strides = [1, 1]} : vector<32x384xf32> to vector<32x64xf32>
    %23 = vector.shape_cast %22 : vector<32x64xf32> to vector<1x32x64xf32>
    %24 = vector.extract_strided_slice %7 {offsets = [0, 320], sizes = [32, 64], strides = [1, 1]} : vector<32x384xf32> to vector<32x64xf32>
    %25 = vector.shape_cast %24 : vector<32x64xf32> to vector<1x32x64xf32>
    %26 = tpu.concatenate %23, %25 in 0 : vector<1x32x64xf32>, vector<1x32x64xf32> -> vector<2x32x64xf32>
    %27 = vector.shape_cast %26 : vector<2x32x64xf32> to vector<4x16x64xf32>
    %28 = arith.truncf %27 : vector<4x16x64xf32> to vector<4x16x64xbf16>
    "tpu.trace_start"() <{level = 10 : i32, message = "gid,gjd->gij"}> : () -> ()
    %cst_5 = arith.constant dense<0.000000e+00> : vector<4x16x16xf32>
    %29 = tpu.matmul %14, %21, %cst_5 {dimension_numbers = #tpu.dot_dimension_numbers<[2], [2], [1], [1], [0, 0, 0, 1, 1, 1], [0], [0]>} : vector<4x16x64xbf16>, vector<4x16x64xbf16>, vector<4x16x16xf32> -> vector<4x16x16xf32>
    "tpu.trace_stop"() : () -> ()
    %cst_6 = arith.constant dense<0xFF800000> : vector<4x16xf32>
    %30 = vector.multi_reduction <maximumf>, %29, %cst_6 [2] : vector<4x16x16xf32> to vector<4x16xf32>
    %31 = vector.shape_cast %30 : vector<4x16xf32> to vector<4x16x1xf32>
    %32 = vector.broadcast %31 : vector<4x16x1xf32> to vector<4x16x16xf32>
    %33 = arith.subf %29, %32 : vector<4x16x16xf32>
    %34 = math.exp %33 : vector<4x16x16xf32>
    %cst_7 = arith.constant dense<0.000000e+00> : vector<4x16xf32>
    %35 = vector.multi_reduction <add>, %34, %cst_7 [2] : vector<4x16x16xf32> to vector<4x16xf32>
    %36 = vector.shape_cast %35 : vector<4x16xf32> to vector<4x16x1xf32>
    %37 = tpu.reciprocal %36 {approx = true} : vector<4x16x1xf32> -> vector<4x16x1xf32>
    %38 = vector.broadcast %37 : vector<4x16x1xf32> to vector<4x16x16xf32>
    %39 = arith.mulf %34, %38 : vector<4x16x16xf32>
    %40 = arith.truncf %39 : vector<4x16x16xf32> to vector<4x16x16xbf16>
    "tpu.trace_start"() <{level = 10 : i32, message = "gij,gjd->gid"}> : () -> ()
    %cst_8 = arith.constant dense<0.000000e+00> : vector<4x16x64xf32>
    %41 = tpu.matmul %40, %28, %cst_8 {dimension_numbers = #tpu.dot_dimension_numbers<[2], [1], [1], [2], [0, 0, 0, 1, 1, 2], [0], [0]>} : vector<4x16x16xbf16>, vector<4x16x64xbf16>, vector<4x16x64xf32> -> vector<4x16x64xf32>
    "tpu.trace_stop"() : () -> ()
    %42 = vector.shape_cast %41 : vector<4x16x64xf32> to vector<2x32x64xf32>
    %43 = vector.extract_strided_slice %42 {offsets = [0, 0, 0], sizes = [1, 32, 64], strides = [1, 1, 1]} : vector<2x32x64xf32> to vector<1x32x64xf32>
    %44 = vector.shape_cast %43 : vector<1x32x64xf32> to vector<32x64xf32>
    %45 = vector.extract_strided_slice %42 {offsets = [1, 0, 0], sizes = [1, 32, 64], strides = [1, 1, 1]} : vector<2x32x64xf32> to vector<1x32x64xf32>
    %46 = vector.shape_cast %45 : vector<1x32x64xf32> to vector<32x64xf32>
    %47 = tpu.concatenate %44, %46 in 1 : vector<32x64xf32>, vector<32x64xf32> -> vector<32x128xf32>
    %48 = arith.truncf %47 : vector<32x128xf32> to vector<32x128xbf16>
    %c0_9 = arith.constant 0 : index
    %c0_10 = arith.constant 0 : index
    %c0_11 = arith.constant 0 : index
    %49 = vector.load %arg6[%c0_9, %c0_10, %c0_11] : memref<1x128x256xbf16, #tpu.memory_space<vmem>>, vector<1x128x256xbf16>
    %50 = vector.shape_cast %49 : vector<1x128x256xbf16> to vector<128x256xbf16>
    %cst_12 = arith.constant dense<0.000000e+00> : vector<32x256xf32>
    %51 = tpu.matmul %48, %50, %cst_12 {dimension_numbers = #tpu.dot_dimension_numbers<[1], [0], [0], [1], [0, 0, 1, 1], [], []>} : vector<32x128xbf16>, vector<128x256xbf16>, vector<32x256xf32> -> vector<32x256xf32>
    %c0_13 = arith.constant 0 : index
    %c0_14 = arith.constant 0 : index
    %c0_15 = arith.constant 0 : index
    %52 = vector.load %arg7[%c0_13, %c0_14, %c0_15] : memref<1x1x256xf32, #tpu.memory_space<vmem>>, vector<1x1x256xf32>
    %53 = vector.shape_cast %52 : vector<1x1x256xf32> to vector<1x256xf32>
    %54 = vector.broadcast %53 : vector<1x256xf32> to vector<32x256xf32>
    %55 = arith.addf %51, %54 : vector<32x256xf32>
    %c0_16 = arith.constant 0 : index
    %c0_17 = arith.constant 0 : index
    %c0_18 = arith.constant 0 : index
    %56 = vector.load %arg8[%c0_16, %c0_17, %c0_18] : memref<1x1x256xf32, #tpu.memory_space<vmem>>, vector<1x1x256xf32>
    %57 = vector.shape_cast %56 : vector<1x1x256xf32> to vector<1x256xf32>
    %c0_19 = arith.constant 0 : index
    %c0_20 = arith.constant 0 : index
    %c0_21 = arith.constant 0 : index
    %58 = vector.load %arg9[%c0_19, %c0_20, %c0_21] : memref<1x1x256xf32, #tpu.memory_space<vmem>>, vector<1x1x256xf32>
    %59 = vector.shape_cast %58 : vector<1x1x256xf32> to vector<1x256xf32>
    %cst_22 = arith.constant dense<0.000000e+00> : vector<32xf32>
    %60 = vector.multi_reduction <add>, %55, %cst_22 [1] : vector<32x256xf32> to vector<32xf32>
    %61 = vector.shape_cast %60 : vector<32xf32> to vector<32x1xf32>
    %cst_23 = arith.constant 2.560000e+02 : f32
    %62 = vector.broadcast %cst_23 : f32 to vector<32x1xf32>
    %63 = arith.divf %61, %62 : vector<32x1xf32>
    %64 = vector.broadcast %63 : vector<32x1xf32> to vector<32x256xf32>
    %65 = arith.subf %55, %64 : vector<32x256xf32>
    %66 = arith.mulf %65, %65 : vector<32x256xf32>
    %cst_24 = arith.constant dense<0.000000e+00> : vector<32xf32>
    %67 = vector.multi_reduction <add>, %66, %cst_24 [1] : vector<32x256xf32> to vector<32xf32>
    %68 = vector.shape_cast %67 : vector<32xf32> to vector<32x1xf32>
    %cst_25 = arith.constant 2.560000e+02 : f32
    %69 = vector.broadcast %cst_25 : f32 to vector<32x1xf32>
    %70 = arith.divf %68, %69 : vector<32x1xf32>
    %71 = vector.broadcast %63 : vector<32x1xf32> to vector<32x256xf32>
    %72 = arith.subf %55, %71 : vector<32x256xf32>
    %cst_26 = arith.constant 9.99999974E-6 : f32
    %73 = vector.broadcast %cst_26 : f32 to vector<32x1xf32>
    %74 = arith.addf %70, %73 : vector<32x1xf32>
    %75 = math.rsqrt %74 : vector<32x1xf32>
    %76 = vector.broadcast %75 : vector<32x1xf32> to vector<32x256xf32>
    %77 = arith.mulf %72, %76 : vector<32x256xf32>
    %78 = vector.broadcast %57 : vector<1x256xf32> to vector<32x256xf32>
    %79 = arith.mulf %77, %78 : vector<32x256xf32>
    %80 = vector.broadcast %59 : vector<1x256xf32> to vector<32x256xf32>
    %81 = arith.addf %79, %80 : vector<32x256xf32>
    %82 = arith.addf %81, %3 : vector<32x256xf32>
    %83 = arith.truncf %82 : vector<32x256xf32> to vector<32x256xbf16>
    %c0_27 = arith.constant 0 : index
    %c0_28 = arith.constant 0 : index
    %c0_29 = arith.constant 0 : index
    %84 = vector.load %arg10[%c0_27, %c0_28, %c0_29] : memref<1x256x256xbf16, #tpu.memory_space<vmem>>, vector<1x256x256xbf16>
    %85 = vector.shape_cast %84 : vector<1x256x256xbf16> to vector<256x256xbf16>
    %cst_30 = arith.constant dense<0.000000e+00> : vector<32x256xf32>
    %86 = tpu.matmul %83, %85, %cst_30 {dimension_numbers = #tpu.dot_dimension_numbers<[1], [0], [0], [1], [0, 0, 1, 1], [], []>} : vector<32x256xbf16>, vector<256x256xbf16>, vector<32x256xf32> -> vector<32x256xf32>
    %c0_31 = arith.constant 0 : index
    %c0_32 = arith.constant 0 : index
    %c0_33 = arith.constant 0 : index
    %87 = vector.load %arg11[%c0_31, %c0_32, %c0_33] : memref<1x1x256xf32, #tpu.memory_space<vmem>>, vector<1x1x256xf32>
    %88 = vector.shape_cast %87 : vector<1x1x256xf32> to vector<1x256xf32>
    %89 = vector.broadcast %88 : vector<1x256xf32> to vector<32x256xf32>
    %90 = arith.addf %86, %89 : vector<32x256xf32>
    %cst_34 = arith.constant 0.000000e+00 : f32
    %91 = vector.broadcast %cst_34 : f32 to vector<32x256xf32>
    %92 = arith.maximumf %90, %91 : vector<32x256xf32>
    %93 = arith.truncf %92 : vector<32x256xf32> to vector<32x256xbf16>
    %c0_35 = arith.constant 0 : index
    %c0_36 = arith.constant 0 : index
    %c0_37 = arith.constant 0 : index
    %94 = vector.load %arg12[%c0_35, %c0_36, %c0_37] : memref<1x256x256xbf16, #tpu.memory_space<vmem>>, vector<1x256x256xbf16>
    %95 = vector.shape_cast %94 : vector<1x256x256xbf16> to vector<256x256xbf16>
    %cst_38 = arith.constant dense<0.000000e+00> : vector<32x256xf32>
    %96 = tpu.matmul %93, %95, %cst_38 {dimension_numbers = #tpu.dot_dimension_numbers<[1], [0], [0], [1], [0, 0, 1, 1], [], []>} : vector<32x256xbf16>, vector<256x256xbf16>, vector<32x256xf32> -> vector<32x256xf32>
    %c0_39 = arith.constant 0 : index
    %c0_40 = arith.constant 0 : index
    %c0_41 = arith.constant 0 : index
    %97 = vector.load %arg13[%c0_39, %c0_40, %c0_41] : memref<1x1x256xf32, #tpu.memory_space<vmem>>, vector<1x1x256xf32>
    %98 = vector.shape_cast %97 : vector<1x1x256xf32> to vector<1x256xf32>
    %99 = vector.broadcast %98 : vector<1x256xf32> to vector<32x256xf32>
    %100 = arith.addf %96, %99 : vector<32x256xf32>
    %cst_42 = arith.constant 0.000000e+00 : f32
    %101 = vector.broadcast %cst_42 : f32 to vector<32x256xf32>
    %102 = arith.maximumf %100, %101 : vector<32x256xf32>
    %c0_43 = arith.constant 0 : index
    %c0_44 = arith.constant 0 : index
    %c0_45 = arith.constant 0 : index
    %103 = vector.load %arg14[%c0_43, %c0_44, %c0_45] : memref<1x1x256xf32, #tpu.memory_space<vmem>>, vector<1x1x256xf32>
    %104 = vector.shape_cast %103 : vector<1x1x256xf32> to vector<1x256xf32>
    %c0_46 = arith.constant 0 : index
    %c0_47 = arith.constant 0 : index
    %c0_48 = arith.constant 0 : index
    %105 = vector.load %arg15[%c0_46, %c0_47, %c0_48] : memref<1x1x256xf32, #tpu.memory_space<vmem>>, vector<1x1x256xf32>
    %106 = vector.shape_cast %105 : vector<1x1x256xf32> to vector<1x256xf32>
    %cst_49 = arith.constant dense<0.000000e+00> : vector<32xf32>
    %107 = vector.multi_reduction <add>, %102, %cst_49 [1] : vector<32x256xf32> to vector<32xf32>
    %108 = vector.shape_cast %107 : vector<32xf32> to vector<32x1xf32>
    %cst_50 = arith.constant 2.560000e+02 : f32
    %109 = vector.broadcast %cst_50 : f32 to vector<32x1xf32>
    %110 = arith.divf %108, %109 : vector<32x1xf32>
    %111 = vector.broadcast %110 : vector<32x1xf32> to vector<32x256xf32>
    %112 = arith.subf %102, %111 : vector<32x256xf32>
    %113 = arith.mulf %112, %112 : vector<32x256xf32>
    %cst_51 = arith.constant dense<0.000000e+00> : vector<32xf32>
    %114 = vector.multi_reduction <add>, %113, %cst_51 [1] : vector<32x256xf32> to vector<32xf32>
    %115 = vector.shape_cast %114 : vector<32xf32> to vector<32x1xf32>
    %cst_52 = arith.constant 2.560000e+02 : f32
    %116 = vector.broadcast %cst_52 : f32 to vector<32x1xf32>
    %117 = arith.divf %115, %116 : vector<32x1xf32>
    %118 = vector.broadcast %110 : vector<32x1xf32> to vector<32x256xf32>
    %119 = arith.subf %102, %118 : vector<32x256xf32>
    %cst_53 = arith.constant 9.99999974E-6 : f32
    %120 = vector.broadcast %cst_53 : f32 to vector<32x1xf32>
    %121 = arith.addf %117, %120 : vector<32x1xf32>
    %122 = math.rsqrt %121 : vector<32x1xf32>
    %123 = vector.broadcast %122 : vector<32x1xf32> to vector<32x256xf32>
    %124 = arith.mulf %119, %123 : vector<32x256xf32>
    %125 = vector.broadcast %104 : vector<1x256xf32> to vector<32x256xf32>
    %126 = arith.mulf %124, %125 : vector<32x256xf32>
    %127 = vector.broadcast %106 : vector<1x256xf32> to vector<32x256xf32>
    %128 = arith.addf %126, %127 : vector<32x256xf32>
    %129 = arith.addf %128, %82 : vector<32x256xf32>
    %c0_54 = arith.constant 0 : index
    %c0_55 = arith.constant 0 : index
    %130 = vector.load %arg19[%c0_54, %c0_55] : memref<32x256xf32, #tpu.memory_space<vmem>>, vector<32x256xf32>
    tpu.vector_store %arg19[%c0_54, %c0_55], %129 {strides = array<i32>} : memref<32x256xf32, #tpu.memory_space<vmem>>, vector<32x256xf32>,
    %c1_i32 = arith.constant 1 : i32
    %131 = arith.cmpi eq, %arg1, %c1_i32 : i32
    %132 = arith.extui %131 : i1 to i32
    %c0_i32_56 = arith.constant 0 : i32
    %133 = arith.cmpi ne, %132, %c0_i32_56 : i32
    scf.if %133 {
      %c0_57 = arith.constant 0 : index
      %c0_58 = arith.constant 0 : index
      %134 = vector.load %arg19[%c0_57, %c0_58] : memref<32x256xf32, #tpu.memory_space<vmem>>, vector<32x256xf32>
      %135 = vector.shape_cast %134 : vector<32x256xf32> to vector<2x16x256xf32>
      %cst_59 = arith.constant dense<0.000000e+00> : vector<2x256xf32>
      %136 = vector.multi_reduction <add>, %135, %cst_59 [1] : vector<2x16x256xf32> to vector<2x256xf32>
      %cst_60 = arith.constant 1.600000e+01 : f32
      %137 = vector.broadcast %cst_60 : f32 to vector<2x256xf32>
      %138 = arith.divf %136, %137 : vector<2x256xf32>
      %139 = arith.truncf %138 : vector<2x256xf32> to vector<2x256xbf16>
      %c0_61 = arith.constant 0 : index
      %c0_62 = arith.constant 0 : index
      %140 = vector.load %arg16[%c0_61, %c0_62] : memref<256x128xbf16, #tpu.memory_space<vmem>>, vector<256x128xbf16>
      %cst_63 = arith.constant dense<0.000000e+00> : vector<2x128xf32>
      %141 = tpu.matmul %139, %140, %cst_63 {dimension_numbers = #tpu.dot_dimension_numbers<[1], [0], [0], [1], [0, 0, 1, 1], [], []>} : vector<2x256xbf16>, vector<256x128xbf16>, vector<2x128xf32> -> vector<2x128xf32>
      %c0_64 = arith.constant 0 : index
      %c0_65 = arith.constant 0 : index
      %142 = vector.load %arg17[%c0_64, %c0_65] : memref<1x128xf32, #tpu.memory_space<vmem>>, vector<1x128xf32>
      %143 = vector.broadcast %142 : vector<1x128xf32> to vector<2x128xf32>
      %144 = arith.addf %141, %143 : vector<2x128xf32>
      %c0_66 = arith.constant 0 : index
      %c0_67 = arith.constant 0 : index
      %145 = vector.load %arg18[%c0_66, %c0_67] : memref<2x128xf32, #tpu.memory_space<vmem>>, vector<2x128xf32>
      tpu.vector_store %arg18[%c0_66, %c0_67], %144 {strides = array<i32>} : memref<2x128xf32, #tpu.memory_space<vmem>>, vector<2x128xf32>,
    } else {
    }
    return
  }
  func.func @transform_0(%arg0: i32, %arg1: i32) -> (i32, i32) {
    %c0_i32 = arith.constant 0 : i32
    %c0_i32_0 = arith.constant 0 : i32
    return %arg0, %c0_i32 : i32, i32
  }
  func.func @transform_1(%arg0: i32, %arg1: i32) -> (i32, i32) {
    %c0_i32 = arith.constant 0 : i32
    %c0_i32_0 = arith.constant 0 : i32
    %c0_i32_1 = arith.constant 0 : i32
    return %c0_i32, %c0_i32_0 : i32, i32
  }
  func.func @transform_2(%arg0: i32, %arg1: i32) -> (i32, i32) {
    %c0_i32 = arith.constant 0 : i32
    %c0_i32_0 = arith.constant 0 : i32
    %c0_i32_1 = arith.constant 0 : i32
    return %c0_i32, %c0_i32_0 : i32, i32
  }
  func.func @transform_3(%arg0: i32, %arg1: i32) -> (i32, i32, i32) {
    %c0_i32 = arith.constant 0 : i32
    %c0_i32_0 = arith.constant 0 : i32
    %c0_i32_1 = arith.constant 0 : i32
    return %arg1, %c0_i32, %c0_i32_0 : i32, i32, i32
  }
  func.func @transform_4(%arg0: i32, %arg1: i32) -> (i32, i32, i32) {
    %c0_i32 = arith.constant 0 : i32
    %c0_i32_0 = arith.constant 0 : i32
    %c0_i32_1 = arith.constant 0 : i32
    return %arg1, %c0_i32, %c0_i32_0 : i32, i32, i32
  }
  func.func @transform_5(%arg0: i32, %arg1: i32) -> (i32, i32, i32) {
    %c0_i32 = arith.constant 0 : i32
    %c0_i32_0 = arith.constant 0 : i32
    %c0_i32_1 = arith.constant 0 : i32
    return %arg1, %c0_i32, %c0_i32_0 : i32, i32, i32
  }
  func.func @transform_6(%arg0: i32, %arg1: i32) -> (i32, i32, i32) {
    %c0_i32 = arith.constant 0 : i32
    %c0_i32_0 = arith.constant 0 : i32
    %c0_i32_1 = arith.constant 0 : i32
    return %arg1, %c0_i32, %c0_i32_0 : i32, i32, i32
  }
  func.func @transform_7(%arg0: i32, %arg1: i32) -> (i32, i32, i32) {
    %c0_i32 = arith.constant 0 : i32
    %c0_i32_0 = arith.constant 0 : i32
    %c0_i32_1 = arith.constant 0 : i32
    return %arg1, %c0_i32, %c0_i32_0 : i32, i32, i32
  }
  func.func @transform_8(%arg0: i32, %arg1: i32) -> (i32, i32, i32) {
    %c0_i32 = arith.constant 0 : i32
    %c0_i32_0 = arith.constant 0 : i32
    %c0_i32_1 = arith.constant 0 : i32
    return %arg1, %c0_i32, %c0_i32_0 : i32, i32, i32
  }
  func.func @transform_9(%arg0: i32, %arg1: i32) -> (i32, i32, i32) {
    %c0_i32 = arith.constant 0 : i32
    %c0_i32_0 = arith.constant 0 : i32
    %c0_i32_1 = arith.constant 0 : i32
    return %arg1, %c0_i32, %c0_i32_0 : i32, i32, i32
  }
  func.func @transform_10(%arg0: i32, %arg1: i32) -> (i32, i32, i32) {
    %c0_i32 = arith.constant 0 : i32
    %c0_i32_0 = arith.constant 0 : i32
    %c0_i32_1 = arith.constant 0 : i32
    return %arg1, %c0_i32, %c0_i32_0 : i32, i32, i32
  }
  func.func @transform_11(%arg0: i32, %arg1: i32) -> (i32, i32, i32) {
    %c0_i32 = arith.constant 0 : i32
    %c0_i32_0 = arith.constant 0 : i32
    %c0_i32_1 = arith.constant 0 : i32
    return %arg1, %c0_i32, %c0_i32_0 : i32, i32, i32
  }
  func.func @transform_12(%arg0: i32, %arg1: i32) -> (i32, i32, i32) {
    %c0_i32 = arith.constant 0 : i32
    %c0_i32_0 = arith.constant 0 : i32
    %c0_i32_1 = arith.constant 0 : i32
    return %arg1, %c0_i32, %c0_i32_0 : i32, i32, i32
  }
  func.func @transform_13(%arg0: i32, %arg1: i32) -> (i32, i32, i32) {
    %c0_i32 = arith.constant 0 : i32
    %c0_i32_0 = arith.constant 0 : i32
    %c0_i32_1 = arith.constant 0 : i32
    return %arg1, %c0_i32, %c0_i32_0 : i32, i32, i32
  }
  func.func @transform_14(%arg0: i32, %arg1: i32) -> (i32, i32) {
    %c0_i32 = arith.constant 0 : i32
    %c0_i32_0 = arith.constant 0 : i32
    %c0_i32_1 = arith.constant 0 : i32
    return %c0_i32, %c0_i32_0 : i32, i32
  }
  func.func @transform_15(%arg0: i32, %arg1: i32) -> (i32, i32) {
    %c0_i32 = arith.constant 0 : i32
    %c0_i32_0 = arith.constant 0 : i32
    %c0_i32_1 = arith.constant 0 : i32
    return %c0_i32, %c0_i32_0 : i32, i32
  }
  func.func @transform_16(%arg0: i32, %arg1: i32) -> (i32, i32) {
    %c0_i32 = arith.constant 0 : i32
    %c0_i32_0 = arith.constant 0 : i32
    return %arg0, %c0_i32 : i32, i32
  }
}

</mosaic_0001>

<bundles_post_ra>
// kernel: vit_forward.1
= control target key start
LH: loop header
LB: loop body
LE: loop exit
PB: predicated region body
PF: predicated region fallthrough
CT: control target
= control target key end

     0   :  { %s4537_s21 = smov 0   ;;  %s4539_s22 = smov 0   ;;  %s5471_s0 = inlined_call_operand.vmem [shape: bf16[32,256], index: 0, kind: input, shape index: {}]   ;;  %s5472_s1 = inlined_call_operand.vmem [shape: bf16[256,256], index: 1, kind: input, shape index: {}]   ;;  %s5473_s2 = inlined_call_operand.vmem [shape: f32[16,256], index: 2, kind: input, shape index: {}]   ;;  %s5474_s3 = inlined_call_operand.vmem [shape: bf16[2,256,384], index: 3, kind: input, shape index: {}]   ;;  %s5475_s4 = inlined_call_operand.vmem [shape: bf16[2,128,256], index: 4, kind: input, shape index: {}]   ;;  %s5476_s5 = inlined_call_operand.vmem [shape: f32[2,1,256], index: 5, kind: input, shape index: {}]   ;;  %s5477_s6 = inlined_call_operand.vmem [shape: f32[2,1,256], index: 6, kind: input, shape index: {}]   ;;  %s5478_s7 = inlined_call_operand.vmem [shape: f32[2,1,256], index: 7, kind: input, shape index: {}]   ;;  %s5479_s8 = inlined_call_operand.vmem [shape: bf16[2,256,256], index: 8, kind: input, shape index: {}]   ;;  %s5480_s9 = inlined_call_operand.vmem [shape: f32[2,1,256], index: 9, kind: input, shape index: {}]   ;;  %s5481_s10 = inlined_call_operand.vmem [shape: bf16[2,256,256], index: 10, kind: input, shape index: {}]   ;;  %s5482_s11 = inlined_call_operand.vmem [shape: f32[2,1,256], index: 11, kind: input, shape index: {}]   ;;  %s5483_s12 = inlined_call_operand.vmem [shape: f32[2,1,256], index: 12, kind: input, shape index: {}]   ;;  %s5484_s13 = inlined_call_operand.vmem [shape: f32[2,1,256], index: 13, kind: input, shape index: {}]   ;;  %s5485_s14 = inlined_call_operand.vmem [shape: bf16[256,128], index: 14, kind: input, shape index: {}]   ;;  %s5486_s15 = inlined_call_operand.vmem [shape: f32[1,128], index: 15, kind: input, shape index: {}]   ;;  %s5487_s16 = inlined_call_operand.vmem [shape: f32[2,128], index: 16, kind: output, shape index: {}]  }
   0x1   :  { %5493 = sst [smem:[#allocation7_spill]] %s5471_s0  ;;  %s4541_s23 = smov 0  }
   0x2   :  { %5494 = sst [smem:[#allocation8_spill]] %s5474_s3 }
   0x3   :  { %5495 = sst [smem:[#allocation9_spill]] %s5475_s4 }
   0x4   :  { %5496 = sst [smem:[#allocation10_spill]] %s5485_s14 }
   0x5   :  { %5497 = sst [smem:[#allocation11_spill]] %s5486_s15 }
   0x6   :  { %5498 = sst [smem:[#allocation12_spill]] %s5487_s16 }
   0x7 LB: > { %5499 = sst [smem:[#allocation3_spill]] %s4443_s22  ;;  %s35_s24 = sadd.s32 1, %s4443_s22  ;;  %s4447_s23 = sphi %s4541_s23, %s26_s23   ;;  %s4443_s22 = sphi %s4539_s22, %s5515_s22   ;;  %s4439_s21 = sphi %s4537_s21, %s5514_s21  }
   0x8   : > { %5500 = sst [smem:[#allocation4_spill]] %s4447_s23  ;;  %p3349_p0 = scmp.ge.s32.totalorder %s4447_s23, 1 }
   0x9   : > { %p36_p1 = scmp.ge.s32.totalorder %s35_s24, 2  ;;  %p579_p2 = scmp.lt.s32.totalorder %s4447_s23, 3 }
   0xb   : > { %s5517_s24 = smov (%p36_p1, %s35_s24), 0  ;;  %p580_p3 = pnand %p3349_p0, %p579_p2 }
   0xc   : > { %5501 = sst [smem:[#allocation5_spill]] %s5517_s24 }
   0xd   : > { %583 = sbr.rel (%p580_p3) target bundleno = 2364 (0x93c), region = 84 }
  0x12   : > { %p684_p4 = scmp.lt.s32.totalorder %s4439_s21, 1  ;;  %s5502_s4 = sld [smem:[#allocation9_spill]] }
  0x13   : > { %s5504_s3 = sld [smem:[#allocation8_spill]]  ;;  %p3364_p5 = scmp.ne.s32.totalorder %s4439_s21, 0 }
  0x14   : > { %s685_s25 = scalar_select %p684_p4, %s4439_s21, 1 }
  0x15   : > { %s5505_s15 = sld [smem:[#allocation7_spill]] (!%p3364_p5) }
  0x16   : > { %s4296_s26 = smul.u32 384, %s685_s25  ;;  %s4097_s27 = sshll.u32 %s685_s25, 7 }
  0x17   : > { %s4564_s0 = sshll.u32 %s685_s25, 1  ;;  %s4098_s18 = sshll.u32 %s685_s25, 8 }
  0x18   : > { %s4562_s30 = scalar_lea.vmem %s5502_s4, %s4097_s27  ;;  %s701_s4 = scalar_lea.vmem %s5477_s6, %s4564_s0 }
  0x19   : > { %5503 = sst [smem:[#allocation6_spill]] %s4562_s30  ;;  %s4569_s19 = scalar_lea.vmem %s5504_s3, %s4296_s26 }
  0x1a   : > { %s4590_s3 = scalar_lea.vmem %s5479_s8, %s4098_s18  ;;  %s4595_s28 = scalar_lea.vmem %s5481_s10, %s4098_s18 }
  0x1b   : > { %s723_s22 = scalar_lea.vmem %s5482_s11, %s4564_s0  ;;  %s727_s17 = scalar_lea.vmem %s5483_s12, %s4564_s0 }
  0x1c   : > { %s731_s14 = scalar_lea.vmem %s5484_s13, %s4564_s0  ;;  %740 = sbr.rel (%p3364_p5) target bundleno = 230 (0xe6), region = 88 }
  0x21   : > { %v3439_v0 = vld [vmem:[%s5472_s1 + $0x70] sm:$0xf]  ;;  %v4119_v1 = vld [vmem:[%s5472_s1 + $0x74] sm:$0xf0]  ;;  %v4118_v5 = vld [vmem:[%s5472_s1 + $0x74] sm:$0xf] }
  0x22   : > { %v3503_v2 = vld [vmem:[%s5472_s1 + $0xf0] sm:$0xf]  ;;  %v3440_v3 = vor.u32 %v4119_v1, %v3439_v0  ;;  %v4135_v4 = vld [vmem:[%s5472_s1 + $0xf4] sm:$0xf0]  ;;  %v3441_v6 = vld [vmem:[%s5472_s1 + $0x78] sm:$0xf0] }
  0x23   : > { %v3504_v7 = vor.u32 %v4135_v4, %v3503_v2  ;;  %v3444_v8 = vor.u32 %v4118_v5, %v3441_v6  ;;  %v4134_v9 = vld [vmem:[%s5472_s1 + $0xf4] sm:$0xf]  ;;  %v3505_v10 = vld [vmem:[%s5472_s1 + $0xf8] sm:$0xf0]  ;;  %v3431_v11 = vld [vmem:[%s5472_s1 + $0x60] sm:$0xf] }
  0x24   : > { %957 = vmatpush.bf16.msra.mxu0 %v3440_v3  ;;  %v3508_v12 = vor.u32 %v4134_v9, %v3505_v10  ;;  %v4117_v13 = vld [vmem:[%s5472_s1 + $0x64] sm:$0xf0]  ;;  %v3495_v14 = vld [vmem:[%s5472_s1 + $0xe0] sm:$0xf]  ;;  %v4116_v18 = vld [vmem:[%s5472_s1 + $0x64] sm:$0xf] }
  0x25   : > { %v4133_v15 = vld [vmem:[%s5472_s1 + $0xe4] sm:$0xf0]  ;;  %976 = vmatpush.bf16.msra.mxu1 %v3504_v7  ;;  %995 = vmatpush.bf16.msra.mxu2 %v3444_v8  ;;  %v3432_v16 = vor.u32 %v4117_v13, %v3431_v11  ;;  %v3433_v19 = vld [vmem:[%s5472_s1 + $0x68] sm:$0xf0]  ;;  %v4132_v20 = vld [vmem:[%s5472_s1 + $0xe4] sm:$0xf] }
  0x26   : > { %v3496_v17 = vor.u32 %v4133_v15, %v3495_v14  ;;  %1014 = vmatpush.bf16.msra.mxu3 %v3508_v12  ;;  %v3436_v21 = vor.u32 %v4116_v18, %v3433_v19  ;;  %v3497_v22 = vld [vmem:[%s5472_s1 + $0xe8] sm:$0xf0]  ;;  %v3423_v23 = vld [vmem:[%s5472_s1 + $0x50] sm:$0xf]  ;;  %v4115_v24 = vld [vmem:[%s5472_s1 + $0x54] sm:$0xf0] }
  0x27   : > { %v3500_v25 = vor.u32 %v4132_v20, %v3497_v22  ;;  %v3487_v26 = vld [vmem:[%s5472_s1 + $0xd0] sm:$0xf]  ;;  %v4131_v27 = vld [vmem:[%s5472_s1 + $0xd4] sm:$0xf0]  ;;  %v4114_v28 = vld [vmem:[%s5472_s1 + $0x54] sm:$0xf]  ;;  %v3424_v29 = vor.u32 %v4115_v24, %v3423_v23 }
  0x28   : > { %958 = vmatpush.bf16.msra.mxu0 %v3432_v16  ;;  %v3425_v30 = vld [vmem:[%s5472_s1 + $0x58] sm:$0xf0]  ;;  %v4130_v31 = vld [vmem:[%s5472_s1 + $0xd4] sm:$0xf]  ;;  %v3488_v33 = vor.u32 %v4131_v27, %v3487_v26  ;;  %v3415_v35 = vld [vmem:[%s5472_s1 + $0x40] sm:$0xf] }
  0x29   : > { %v3489_v32 = vld [vmem:[%s5472_s1 + $0xd8] sm:$0xf0]  ;;  %977 = vmatpush.bf16.msra.mxu1 %v3496_v17  ;;  %996 = vmatpush.bf16.msra.mxu2 %v3436_v21  ;;  %v3428_v34 = vor.u32 %v4114_v28, %v3425_v30  ;;  %v4113_v36 = vld [vmem:[%s5472_s1 + $0x44] sm:$0xf0]  ;;  %v3479_v37 = vld [vmem:[%s5472_s1 + $0xc0] sm:$0xf] }
  0x2a   : > { %1015 = vmatpush.bf16.msra.mxu3 %v3500_v25  ;;  %v3492_v38 = vor.u32 %v4130_v31, %v3489_v32  ;;  %v4129_v39 = vld [vmem:[%s5472_s1 + $0xc4] sm:$0xf0]  ;;  %v4112_v40 = vld [vmem:[%s5472_s1 + $0x44] sm:$0xf]  ;;  %v3417_v41 = vld [vmem:[%s5472_s1 + $0x48] sm:$0xf0]  ;;  %v3416_v44 = vor.u32 %v4113_v36, %v3415_v35 }
  0x2b   : > { %v4128_v42 = vld [vmem:[%s5472_s1 + $0xc4] sm:$0xf]  ;;  %v3481_v43 = vld [vmem:[%s5472_s1 + $0xc8] sm:$0xf0]  ;;  %v3480_v45 = vor.u32 %v4129_v39, %v3479_v37  ;;  %v3420_v46 = vor.u32 %v4112_v40, %v3417_v41  ;;  %v3407_v47 = vld [vmem:[%s5472_s1 + $0x30] sm:$0xf] }
  0x2c   : > { %959 = vmatpush.bf16.msra.mxu0 %v3424_v29  ;;  %v4111_v48 = vld [vmem:[%s5472_s1 + $0x34] sm:$0xf0]  ;;  %v3471_v49 = vld [vmem:[%s5472_s1 + $0xb0] sm:$0xf]  ;;  %v3484_v50 = vor.u32 %v4128_v42, %v3481_v43  ;;  %v4110_v52 = vld [vmem:[%s5472_s1 + $0x34] sm:$0xf] }
  0x2d   : > { %978 = vmatpush.bf16.msra.mxu1 %v3488_v33  ;;  %997 = vmatpush.bf16.msra.mxu2 %v3428_v34  ;;  %v4127_v51 = vld [vmem:[%s5472_s1 + $0xb4] sm:$0xf0]  ;;  %v3409_v53 = vld [vmem:[%s5472_s1 + $0x38] sm:$0xf0]  ;;  %v4126_v54 = vld [vmem:[%s5472_s1 + $0xb4] sm:$0xf]  ;;  %v3408_v56 = vor.u32 %v4111_v48, %v3407_v47 }
  0x2e   : > { %1016 = vmatpush.bf16.msra.mxu3 %v3492_v38  ;;  %v3473_v55 = vld [vmem:[%s5472_s1 + $0xb8] sm:$0xf0]  ;;  %v3472_v57 = vor.u32 %v4127_v51, %v3471_v49  ;;  %v3412_v58 = vor.u32 %v4110_v52, %v3409_v53  ;;  %v3399_v59 = vld [vmem:[%s5472_s1 + $0x20] sm:$0xf]  ;;  %v4109_v60 = vld [vmem:[%s5472_s1 + $0x24] sm:$0xf0] }
  0x2f   : > { %v3463_v61 = vld [vmem:[%s5472_s1 + $0xa0] sm:$0xf]  ;;  %v3476_v62 = vor.u32 %v4126_v54, %v3473_v55  ;;  %v4125_v63 = vld [vmem:[%s5472_s1 + $0xa4] sm:$0xf0]  ;;  %v4108_v0 = vld [vmem:[%s5472_s1 + $0x24] sm:$0xf]  ;;  %v3400_v4 = vor.u32 %v4109_v60, %v3399_v59 }
  0x30   : > { %960 = vmatpush.bf16.msra.mxu0 %v3416_v44  ;;  %v3401_v1 = vld [vmem:[%s5472_s1 + $0x28] sm:$0xf0]  ;;  %v4124_v2 = vld [vmem:[%s5472_s1 + $0xa4] sm:$0xf]  ;;  %v3464_v5 = vor.u32 %v4125_v63, %v3463_v61  ;;  %v3391_v7 = vld [vmem:[%s5472_s1 + $0x10] sm:$0xf] }
  0x31   : > { %979 = vmatpush.bf16.msra.mxu1 %v3480_v45  ;;  %998 = vmatpush.bf16.msra.mxu2 %v3420_v46  ;;  %v3465_v3 = vld [vmem:[%s5472_s1 + $0xa8] sm:$0xf0]  ;;  %v3404_v6 = vor.u32 %v4108_v0, %v3401_v1  ;;  %v4107_v8 = vld [vmem:[%s5472_s1 + $0x14] sm:$0xf0]  ;;  %v3455_v9 = vld [vmem:[%s5472_s1 + $0x90] sm:$0xf] }
  0x32   : > { %1017 = vmatpush.bf16.msra.mxu3 %v3484_v50  ;;  %v3468_v10 = vor.u32 %v4124_v2, %v3465_v3  ;;  %v4123_v11 = vld [vmem:[%s5472_s1 + $0x94] sm:$0xf0]  ;;  %v4106_v12 = vld [vmem:[%s5472_s1 + $0x14] sm:$0xf]  ;;  %v3393_v13 = vld [vmem:[%s5472_s1 + $0x18] sm:$0xf0]  ;;  %v3392_v16 = vor.u32 %v4107_v8, %v3391_v7 }
  0x33   : > { %v4122_v14 = vld [vmem:[%s5472_s1 + $0x94] sm:$0xf]  ;;  %v3457_v15 = vld [vmem:[%s5472_s1 + $0x98] sm:$0xf0]  ;;  %v3456_v17 = vor.u32 %v4123_v11, %v3455_v9  ;;  %v3396_v18 = vor.u32 %v4106_v12, %v3393_v13  ;;  %v3383_v19 = vld [vmem:[%s5472_s1] sm:$0xf] }
  0x34   : > { %961 = vmatpush.bf16.msra.mxu0 %v3408_v56  ;;  %v4105_v20 = vld [vmem:[%s5472_s1 + $0x4] sm:$0xf0]  ;;  %v3447_v21 = vld [vmem:[%s5472_s1 + $0x80] sm:$0xf]  ;;  %v3460_v22 = vor.u32 %v4122_v14, %v3457_v15  ;;  %v4104_v24 = vld [vmem:[%s5472_s1 + $0x4] sm:$0xf] }
  0x35   : > { %980 = vmatpush.bf16.msra.mxu1 %v3472_v57  ;;  %999 = vmatpush.bf16.msra.mxu2 %v3412_v58  ;;  %v4121_v23 = vld [vmem:[%s5472_s1 + $0x84] sm:$0xf0]  ;;  %v3385_v25 = vld [vmem:[%s5472_s1 + $0x8] sm:$0xf0]  ;;  %v4120_v26 = vld [vmem:[%s5472_s1 + $0x84] sm:$0xf]  ;;  %v3384_v28 = vor.u32 %v4105_v20, %v3383_v19 }
  0x36   : > { %1018 = vmatpush.bf16.msra.mxu3 %v3476_v62  ;;  %v3449_v27 = vld [vmem:[%s5472_s1 + $0x88] sm:$0xf0]  ;;  %v3367_v29 = vld [vmem:[%s5505_s15] sm:$0xf]  ;;  %v4101_v30 = vld [vmem:[%s5505_s15 + $0x4] sm:$0xf0]  ;;  %v3448_v31 = vor.u32 %v4121_v23, %v3447_v21  ;;  %v3388_v32 = vor.u32 %v4104_v24, %v3385_v25 }
  0x37   : > { %v4100_v33 = vld [vmem:[%s5505_s15 + $0x4] sm:$0xf]  ;;  %v3369_v34 = vld [vmem:[%s5505_s15 + $0x8] sm:$0xf0]  ;;  %v3452_v35 = vor.u32 %v4120_v26, %v3449_v27  ;;  %v3368_v36 = vor.u32 %v4101_v30, %v3367_v29  ;;  %v3375_v38 = vld [vmem:[%s5505_s15 + $0x10] sm:$0xf] }
  0x38   : > { %962 = vmatpush.bf16.msra.mxu0 %v3400_v4  ;;  %v3372_v37 = vor.u32 %v4100_v33, %v3369_v34  ;;  %v4103_v39 = vld [vmem:[%s5505_s15 + $0x14] sm:$0xf0]  ;;  %v4102_v40 = vld [vmem:[%s5505_s15 + $0x14] sm:$0xf]  ;;  %v3377_v41 = vld [vmem:[%s5505_s15 + $0x18] sm:$0xf0] }
  0x39   : > { %981 = vmatpush.bf16.msra.mxu1 %v3464_v5  ;;  %1000 = vmatpush.bf16.msra.mxu2 %v3404_v6  ;;  %v3376_v42 = vor.u32 %v4103_v39, %v3375_v38  ;;  %v3380_v43 = vor.u32 %v4102_v40, %v3377_v41  ;;  %v1033_v46 = vld [vmem:[%s5473_s2] sm:$0xff]  ;;  %v1034_v51 = vld [vmem:[%s5473_s2 + $0x8] sm:$0xff]  ;;  %v1035_v55 = vld [vmem:[%s5473_s2 + $0x10] sm:$0xff] }
  0x3a   : > { %1019 = vmatpush.bf16.msra.mxu3 %v3468_v10  ;;  %v1036_v61 = vld [vmem:[%s5473_s2 + $0x18] sm:$0xff] }
  0x3c   : > { %963 = vmatpush.bf16.msra.mxu0 %v3392_v16 }
  0x3d   : > { %982 = vmatpush.bf16.msra.mxu1 %v3456_v17  ;;  %1001 = vmatpush.bf16.msra.mxu2 %v3396_v18 }
  0x3e   : > { %1020 = vmatpush.bf16.msra.mxu3 %v3460_v22 }
  0x40   : > { %964 = vmatpush.bf16.msra.mxu0 %v3384_v28 }
  0x41   : > { %983 = vmatpush.bf16.msra.mxu1 %v3448_v31  ;;  %1002 = vmatpush.bf16.msra.mxu2 %v3388_v32 }
  0x42   : > { %1021 = vmatpush.bf16.msra.mxu3 %v3452_v35 }
  0x43   : > { %965 = vmatmul.bf16.vlgmr.msra.gmra.mxu0 %v3368_v36 }
  0x44   : > { %984 = vmatmul.bf16.vlgmr.msra.gmra.mxu1 %v3372_v37  ;;  %1003 = vmatmul.bf16.vlgmr.msra.gmra.mxu2 %v3368_v36 }
  0x45   : > { %1022 = vmatmul.bf16.vlgmr.msra.gmra.mxu3 %v3372_v37 }
  0x53   : > { %970 = vmatmul.bf16.gmra.mxu0 %v3376_v42 }
  0x54   : > { %989 = vmatmul.bf16.gmra.mxu1 %v3380_v43  ;;  %1008 = vmatmul.bf16.gmra.mxu2 %v3376_v42 }
  0x55   : > { %1027 = vmatmul.bf16.gmra.mxu3 %v3380_v43 }
  0xc0   : > { %v966_v44 = vpop.f32.mrf.mxu0 }
  0xc1   : > { %v985_v45 = vpop.f32.mrf.mxu1 }
  0xc2   : > { %v986_v47 = vadd.f32 %v985_v45, %v966_v44 }
  0xc4   : > { %v1037_v48 = vadd.f32 %v1033_v46, %v986_v47 }
  0xc6   : > { %1045 = vst [vmem:[#allocation2 + $0x30] sm:$0xff] %v1037_v48 }
  0xc7   : > { %v1004_v49 = vpop.f32.mrf.mxu2 }
  0xc8   : > { %v1023_v50 = vpop.f32.mrf.mxu3  ;;  %v968_v52 = vpop.f32.mrf.mxu0 }
  0xc9   : > { %v1024_v53 = vadd.f32 %v1023_v50, %v1004_v49  ;;  %v987_v54 = vpop.f32.mrf.mxu1 }
  0xca   : > { %v988_v56 = vadd.f32 %v987_v54, %v968_v52 }
  0xcb   : > { %v1038_v57 = vadd.f32 %v1034_v51, %v1024_v53 }
  0xcc   : > { %v1039_v58 = vadd.f32 %v1035_v55, %v988_v56 }
  0xcd   : > { %1046 = vst [vmem:[#allocation2] sm:$0xff] %v1038_v57 }
  0xce   : > { %1047 = vst [vmem:[#allocation2 + $0x18] sm:$0xff] %v1039_v58 }
  0xcf   : > { %v1006_v59 = vpop.f32.mrf.mxu2 }
  0xd0   : > { %v1025_v60 = vpop.f32.mrf.mxu3  ;;  %v971_v62 = vpop.f32.mrf.mxu0 }
  0xd1   : > { %v1026_v63 = vadd.f32 %v1025_v60, %v1006_v59  ;;  %v990_v0 = vpop.f32.mrf.mxu1 }
  0xd2   : > { %v991_v1 = vadd.f32 %v990_v0, %v971_v62 }
  0xd3   : > { %v1040_v2 = vadd.f32 %v1036_v61, %v1026_v63 }
  0xd4   : > { %v1041_v3 = vadd.f32 %v1033_v46, %v991_v1 }
  0xd5   : > { %1048 = vst [vmem:[#allocation2 + $0x10] sm:$0xff] %v1040_v2 }
  0xd6   : > { %1049 = vst [vmem:[#allocation2 + $0x8] sm:$0xff] %v1041_v3 }
  0xd7   : > { %v1009_v4 = vpop.f32.mrf.mxu2 }
  0xd8   : > { %v1028_v5 = vpop.f32.mrf.mxu3  ;;  %v973_v6 = vpop.f32.mrf.mxu0 }
  0xd9   : > { %v1029_v7 = vadd.f32 %v1028_v5, %v1009_v4  ;;  %v992_v8 = vpop.f32.mrf.mxu1 }
  0xda   : > { %v993_v9 = vadd.f32 %v992_v8, %v973_v6 }
  0xdb   : > { %v1042_v10 = vadd.f32 %v1034_v51, %v1029_v7 }
  0xdc   : > { %v1043_v11 = vadd.f32 %v1035_v55, %v993_v9 }
  0xdd   : > { %1050 = vst [vmem:[#allocation2 + $0x20] sm:$0xff] %v1042_v10 }
  0xde   : > { %1051 = vst [vmem:[#allocation2 + $0x28] sm:$0xff] %v1043_v11 }
  0xdf   : > { %v1011_v12 = vpop.f32.mrf.mxu2 }
  0xe0   : > { %v1030_v13 = vpop.f32.mrf.mxu3 }
  0xe1   : > { %v1031_v14 = vadd.f32 %v1030_v13, %v1011_v12 }
  0xe3   : > { %v1044_v15 = vadd.f32 %v1036_v61, %v1031_v14 }
  0xe5   : > { %1052 = vst [vmem:[#allocation2 + $0x38] sm:$0xff] %v1044_v15 }
  0xe6 PF: > { %v4157_v16 = vld [vmem:[%s4569_s19 + $0xac] sm:$0xf]  ;;  %v3597_v17 = vld [vmem:[%s4569_s19 + $0xb4] sm:$0xf0]  ;;  %v4154_v21 = vld [vmem:[%s4569_s19 + $0x94] sm:$0xf]  ;;  %s5507_s20 = scalar_lea.vmem %s5476_s5, %s4564_s0  ;;  %s5508_s23 = scalar_lea.vmem %s5478_s7, %s4564_s0 }
  0xe7   : > { %v4181_v18 = vld [vmem:[%s4569_s19 + $0x16c] sm:$0xf]  ;;  %v3600_v19 = vor.u32 %v4157_v16, %v3597_v17  ;;  %v3693_v20 = vld [vmem:[%s4569_s19 + $0x174] sm:$0xf0]  ;;  %v3585_v22 = vld [vmem:[%s4569_s19 + $0x9c] sm:$0xf0]  ;;  %s5509_s30 = scalar_lea.vmem %s5480_s9, %s4564_s0 }
  0xe8   : > { %v3696_v23 = vor.u32 %v4181_v18, %v3693_v20  ;;  %v4178_v24 = vld [vmem:[%s4569_s19 + $0x154] sm:$0xf]  ;;  %v3681_v25 = vld [vmem:[%s4569_s19 + $0x15c] sm:$0xf0]  ;;  %v3588_v26 = vor.u32 %v4154_v21, %v3585_v22  ;;  %v4151_v28 = vld [vmem:[%s4569_s19 + $0x7c] sm:$0xf] }
  0xe9   : > { %1423 = vmatpush.bf16.msra.mxu2 %v3600_v19  ;;  %v3684_v27 = vor.u32 %v4178_v24, %v3681_v25  ;;  %v3573_v29 = vld [vmem:[%s4569_s19 + $0x84] sm:$0xf0]  ;;  %v4175_v30 = vld [vmem:[%s4569_s19 + $0x13c] sm:$0xf]  ;;  %v4158_v33 = vld [vmem:[%s4569_s19 + $0xb0] sm:$0xf0] }
  0xea   : > { %1442 = vmatpush.bf16.msra.mxu3 %v3696_v23  ;;  %v3669_v31 = vld [vmem:[%s4569_s19 + $0x144] sm:$0xf0]  ;;  %v4182_v36 = vld [vmem:[%s4569_s19 + $0x170] sm:$0xf0]  ;;  %v3576_v37 = vor.u32 %v4151_v28, %v3573_v29  ;;  %v4148_v38 = vld [vmem:[%s4569_s19 + $0x64] sm:$0xf] }
  0xeb   : > { %v3595_v32 = vld [vmem:[%s4569_s19 + $0xa8] sm:$0xf]  ;;  %v3561_v39 = vld [vmem:[%s4569_s19 + $0x6c] sm:$0xf0]  ;;  %v3672_v41 = vor.u32 %v4175_v30, %v3669_v31  ;;  %v4155_v43 = vld [vmem:[%s4569_s19 + $0x98] sm:$0xf0] }
  0xec   : > { %v3596_v34 = vor.u32 %v4158_v33, %v3595_v32  ;;  %v3691_v35 = vld [vmem:[%s4569_s19 + $0x168] sm:$0xf]  ;;  %v3583_v42 = vld [vmem:[%s4569_s19 + $0x90] sm:$0xf]  ;;  %v4172_v45 = vld [vmem:[%s4569_s19 + $0x124] sm:$0xf]  ;;  %v3564_v51 = vor.u32 %v4148_v38, %v3561_v39 }
  0xed   : > { %1424 = vmatpush.bf16.msra.mxu2 %v3588_v26  ;;  %v3692_v40 = vor.u32 %v4182_v36, %v3691_v35  ;;  %v3679_v44 = vld [vmem:[%s4569_s19 + $0x150] sm:$0xf]  ;;  %v3584_v47 = vor.u32 %v4155_v43, %v3583_v42  ;;  %v4179_v48 = vld [vmem:[%s4569_s19 + $0x158] sm:$0xf0]  ;;  %v3571_v50 = vld [vmem:[%s4569_s19 + $0x78] sm:$0xf] }
  0xee   : > { %1443 = vmatpush.bf16.msra.mxu3 %v3684_v27  ;;  %1385 = vmatpush.bf16.msra.mxu0 %v3596_v34  ;;  %v3657_v46 = vld [vmem:[%s4569_s19 + $0x12c] sm:$0xf0]  ;;  %v3680_v49 = vor.u32 %v4179_v48, %v3679_v44  ;;  %v4152_v52 = vld [vmem:[%s4569_s19 + $0x80] sm:$0xf0]  ;;  %v3667_v53 = vld [vmem:[%s4569_s19 + $0x138] sm:$0xf] }
  0xef   : > { %1404 = vmatpush.bf16.msra.mxu1 %v3692_v40  ;;  %v4176_v54 = vld [vmem:[%s4569_s19 + $0x140] sm:$0xf0]  ;;  %v3660_v55 = vor.u32 %v4172_v45, %v3657_v46  ;;  %v4145_v56 = vld [vmem:[%s4569_s19 + $0x4c] sm:$0xf]  ;;  %v3549_v57 = vld [vmem:[%s4569_s19 + $0x54] sm:$0xf0]  ;;  %v3572_v59 = vor.u32 %v4152_v52, %v3571_v50 }
  0xf0   : > { %v4169_v58 = vld [vmem:[%s4569_s19 + $0x10c] sm:$0xf]  ;;  %v3645_v60 = vld [vmem:[%s4569_s19 + $0x114] sm:$0xf0]  ;;  %v3668_v61 = vor.u32 %v4176_v54, %v3667_v53  ;;  %v3559_v62 = vld [vmem:[%s4569_s19 + $0x60] sm:$0xf]  ;;  %v3552_v2 = vor.u32 %v4145_v56, %v3549_v57 }
  0xf1   : > { %1425 = vmatpush.bf16.msra.mxu2 %v3576_v37  ;;  %v4149_v63 = vld [vmem:[%s4569_s19 + $0x68] sm:$0xf0]  ;;  %v3655_v0 = vld [vmem:[%s4569_s19 + $0x120] sm:$0xf]  ;;  %v3648_v3 = vor.u32 %v4169_v58, %v3645_v60  ;;  %v4142_v4 = vld [vmem:[%s4569_s19 + $0x34] sm:$0xf] }
  0xf2   : > { %1444 = vmatpush.bf16.msra.mxu3 %v3672_v41  ;;  %1386 = vmatpush.bf16.msra.mxu0 %v3584_v47  ;;  %v4173_v1 = vld [vmem:[%s4569_s19 + $0x128] sm:$0xf0]  ;;  %v3537_v5 = vld [vmem:[%s4569_s19 + $0x3c] sm:$0xf0]  ;;  %v4166_v6 = vld [vmem:[%s4569_s19 + $0xf4] sm:$0xf]  ;;  %v3560_v7 = vor.u32 %v4149_v63, %v3559_v62 }
  0xf3   : > { %1405 = vmatpush.bf16.msra.mxu1 %v3680_v49  ;;  %v3633_v8 = vld [vmem:[%s4569_s19 + $0xfc] sm:$0xf0]  ;;  %v3656_v9 = vor.u32 %v4173_v1, %v3655_v0  ;;  %v3547_v10 = vld [vmem:[%s4569_s19 + $0x48] sm:$0xf]  ;;  %v4146_v11 = vld [vmem:[%s4569_s19 + $0x50] sm:$0xf0]  ;;  %v3540_v14 = vor.u32 %v4142_v4, %v3537_v5 }
  0xf4   : > { %v3643_v12 = vld [vmem:[%s4569_s19 + $0x108] sm:$0xf]  ;;  %v4170_v13 = vld [vmem:[%s4569_s19 + $0x110] sm:$0xf0]  ;;  %v3636_v15 = vor.u32 %v4166_v6, %v3633_v8  ;;  %v4139_v16 = vld [vmem:[%s4569_s19 + $0x1c] sm:$0xf]  ;;  %v3548_v19 = vor.u32 %v4146_v11, %v3547_v10 }
  0xf5   : > { %1426 = vmatpush.bf16.msra.mxu2 %v3564_v51  ;;  %v3525_v17 = vld [vmem:[%s4569_s19 + $0x24] sm:$0xf0]  ;;  %v4163_v18 = vld [vmem:[%s4569_s19 + $0xdc] sm:$0xf]  ;;  %v3644_v21 = vor.u32 %v4170_v13, %v3643_v12  ;;  %v3535_v22 = vld [vmem:[%s4569_s19 + $0x30] sm:$0xf] }
  0xf6   : > { %1445 = vmatpush.bf16.msra.mxu3 %v3660_v55  ;;  %1387 = vmatpush.bf16.msra.mxu0 %v3572_v59  ;;  %v3621_v20 = vld [vmem:[%s4569_s19 + $0xe4] sm:$0xf0]  ;;  %v4143_v23 = vld [vmem:[%s4569_s19 + $0x38] sm:$0xf0]  ;;  %v3631_v24 = vld [vmem:[%s4569_s19 + $0xf0] sm:$0xf]  ;;  %v3528_v26 = vor.u32 %v4139_v16, %v3525_v17 }
  0xf7   : > { %1406 = vmatpush.bf16.msra.mxu1 %v3668_v61  ;;  %v4167_v25 = vld [vmem:[%s4569_s19 + $0xf8] sm:$0xf0]  ;;  %v4136_v27 = vld [vmem:[%s4569_s19 + $0x4] sm:$0xf]  ;;  %v3624_v28 = vor.u32 %v4163_v18, %v3621_v20  ;;  %v3513_v29 = vld [vmem:[%s4569_s19 + $0xc] sm:$0xf0]  ;;  %v3536_v32 = vor.u32 %v4143_v23, %v3535_v22 }
  0xf8   : > { %v4160_v30 = vld [vmem:[%s4569_s19 + $0xc4] sm:$0xf]  ;;  %v3609_v31 = vld [vmem:[%s4569_s19 + $0xcc] sm:$0xf0]  ;;  %v3632_v34 = vor.u32 %v4167_v25, %v3631_v24  ;;  %v3523_v35 = vld [vmem:[%s4569_s19 + $0x18] sm:$0xf]  ;;  %v3516_v41 = vor.u32 %v4136_v27, %v3513_v29 }
  0xf9   : > { %1427 = vmatpush.bf16.msra.mxu2 %v3552_v2  ;;  %v1053_v33 = vld [vmem:[#allocation2 + $0x30] sm:$0xff]  ;;  %v4140_v36 = vld [vmem:[%s4569_s19 + $0x20] sm:$0xf0]  ;;  %v3619_v37 = vld [vmem:[%s4569_s19 + $0xd8] sm:$0xf]  ;;  %v3612_v45 = vor.u32 %v4160_v30, %v3609_v31  ;;  %vm1581_vm0 = vcmask 523264  }
  0xfa   : > { %1446 = vmatpush.bf16.msra.mxu3 %v3648_v3  ;;  %1388 = vmatpush.bf16.msra.mxu0 %v3560_v7  ;;  %v4164_v38 = vld [vmem:[%s4569_s19 + $0xe0] sm:$0xf0]  ;;  %v3603_v39 = vld [vmem:[%s4569_s19 + $0xb0] sm:$0xf]  ;;  %v4159_v40 = vld [vmem:[%s4569_s19 + $0xb8] sm:$0xf0]  ;;  %v3524_v48 = vor.u32 %v4140_v36, %v3523_v35 }
  0xfb   : > { %1407 = vmatpush.bf16.msra.mxu1 %v3656_v9  ;;  %v1055_v42 = vld [vmem:[#allocation2 + $0x18] sm:$0xff]  ;;  %v3699_v43 = vld [vmem:[%s4569_s19 + $0x170] sm:$0xf]  ;;  %v1054_v46 = vld [vmem:[#allocation2] sm:$0xff]  ;;  %v3620_v49 = vor.u32 %v4164_v38, %v3619_v37  ;;  %v3604_v53 = vor.u32 %v4159_v40, %v3603_v39  ;;  %vm1692_vm1 = vcmask 130048   ;;  %s5506_s26 = sld [smem:[#allocation6_spill]] }
  0xfc   : > { %v4183_v44 = vld [vmem:[%s4569_s19 + $0x178] sm:$0xf0]  ;;  %v1056_v47 = vld [vmem:[#allocation2 + $0x10] sm:$0xff]  ;;  %v3511_v50 = vld [vmem:[%s4569_s19] sm:$0xf]  ;;  %v4905_v54 = vpack.c.bf16 %v1055_v42, %v1053_v33  ;;  %p4029_p6 = scmp.ne.s32.totalorder %s4439_s21, 1 }
  0xfd   : > { %1428 = vmatpush.bf16.msra.mxu2 %v3540_v14  ;;  %v4137_v51 = vld [vmem:[%s4569_s19 + $0x8] sm:$0xf0]  ;;  %v3607_v52 = vld [vmem:[%s4569_s19 + $0xc0] sm:$0xf]  ;;  %v3591_v56 = vld [vmem:[%s4569_s19 + $0x98] sm:$0xf]  ;;  %v3700_v58 = vor.u32 %v4183_v44, %v3699_v43  ;;  %v4910_v59 = vpack.c.bf16 %v1056_v47, %v1054_v46 }
  0xfe   : > { %1447 = vmatpush.bf16.msra.mxu3 %v3636_v15  ;;  %1389 = vmatpush.bf16.msra.mxu0 %v3548_v19  ;;  %v4161_v55 = vld [vmem:[%s4569_s19 + $0xc8] sm:$0xf0]  ;;  %v4156_v57 = vld [vmem:[%s4569_s19 + $0xa0] sm:$0xf0]  ;;  %v3687_v60 = vld [vmem:[%s4569_s19 + $0x158] sm:$0xf]  ;;  %v3512_v62 = vor.u32 %v4137_v51, %v3511_v50 }
  0xff   : > { %1408 = vmatpush.bf16.msra.mxu1 %v3644_v21  ;;  %v4180_v61 = vld [vmem:[%s4569_s19 + $0x160] sm:$0xf0]  ;;  %v3608_v63 = vor.u32 %v4161_v55, %v3607_v52  ;;  %v3592_v0 = vor.u32 %v4156_v57, %v3591_v56  ;;  %v3579_v1 = vld [vmem:[%s4569_s19 + $0x80] sm:$0xf]  ;;  %v4153_v2 = vld [vmem:[%s4569_s19 + $0x88] sm:$0xf0] }
 0x100   : > { %v3688_v3 = vor.u32 %v4180_v61, %v3687_v60  ;;  %v3580_v4 = vor.u32 %v4153_v2, %v3579_v1  ;;  %v3567_v5 = vld [vmem:[%s4569_s19 + $0x68] sm:$0xf]  ;;  %v4150_v6 = vld [vmem:[%s4569_s19 + $0x70] sm:$0xf0]  ;;  %v3555_v8 = vld [vmem:[%s4569_s19 + $0x50] sm:$0xf] }
 0x101   : > { %1429 = vmatpush.bf16.msra.mxu2 %v3528_v26  ;;  %v3568_v7 = vor.u32 %v4150_v6, %v3567_v5  ;;  %v4147_v9 = vld [vmem:[%s4569_s19 + $0x58] sm:$0xf0]  ;;  %v1057_v10 = vld [vmem:[#allocation2 + $0x8] sm:$0xff]  ;;  %v1058_v12 = vld [vmem:[#allocation2 + $0x20] sm:$0xff]  ;;  %s5511_s18 = sld [smem:[#allocation11_spill]] (!%p4029_p6) }
 0x102   : > { %1448 = vmatpush.bf16.msra.mxu3 %v3624_v28  ;;  %1390 = vmatpush.bf16.msra.mxu0 %v3536_v32  ;;  %v1059_v11 = vld [vmem:[#allocation2 + $0x28] sm:$0xff]  ;;  %v1060_v13 = vld [vmem:[#allocation2 + $0x38] sm:$0xff]  ;;  %v3556_v14 = vor.u32 %v4147_v9, %v3555_v8  ;;  %v4144_v17 = vld [vmem:[%s4569_s19 + $0x40] sm:$0xf0]  ;;  %s5512_s0 = sld [smem:[#allocation12_spill]] (!%p4029_p6) }
 0x103   : > { %1409 = vmatpush.bf16.msra.mxu1 %v3632_v34  ;;  %v1063_v15 = vpack.c.bf16 %v1059_v11, %v1057_v10  ;;  %v3543_v16 = vld [vmem:[%s4569_s19 + $0x38] sm:$0xf]  ;;  %v1064_v18 = vpack.c.bf16 %v1060_v13, %v1058_v12  ;;  %v3531_v20 = vld [vmem:[%s4569_s19 + $0x20] sm:$0xf]  ;;  %v4141_v21 = vld [vmem:[%s4569_s19 + $0x28] sm:$0xf0] }
 0x104   : > { %v3544_v19 = vor.u32 %v4144_v17, %v3543_v16  ;;  %v3675_v22 = vld [vmem:[%s4569_s19 + $0x140] sm:$0xf]  ;;  %v3532_v23 = vor.u32 %v4141_v21, %v3531_v20  ;;  %v4177_v24 = vld [vmem:[%s4569_s19 + $0x148] sm:$0xf0]  ;;  %v3519_v26 = vld [vmem:[%s4569_s19 + $0x8] sm:$0xf] }
 0x105   : > { %1430 = vmatpush.bf16.msra.mxu2 %v3516_v41  ;;  %v3676_v25 = vor.u32 %v4177_v24, %v3675_v22  ;;  %v4138_v27 = vld [vmem:[%s4569_s19 + $0x10] sm:$0xf0]  ;;  %v3663_v28 = vld [vmem:[%s4569_s19 + $0x128] sm:$0xf]  ;;  %v3651_v32 = vld [vmem:[%s4569_s19 + $0x110] sm:$0xf] }
 0x106   : > { %1449 = vmatpush.bf16.msra.mxu3 %v3612_v45  ;;  %1391 = vmatpush.bf16.msra.mxu0 %v3524_v48  ;;  %v3520_v29 = vor.u32 %v4138_v27, %v3519_v26  ;;  %v4174_v30 = vld [vmem:[%s4569_s19 + $0x130] sm:$0xf0]  ;;  %v4171_v33 = vld [vmem:[%s4569_s19 + $0x118] sm:$0xf0]  ;;  %v3639_v35 = vld [vmem:[%s4569_s19 + $0xf8] sm:$0xf] }
 0x107   : > { %1410 = vmatpush.bf16.msra.mxu1 %v3620_v49  ;;  %v3664_v31 = vor.u32 %v4174_v30, %v3663_v28  ;;  %v3652_v34 = vor.u32 %v4171_v33, %v3651_v32  ;;  %v4168_v36 = vld [vmem:[%s4569_s19 + $0x100] sm:$0xf0]  ;;  %v3627_v38 = vld [vmem:[%s4569_s19 + $0xe0] sm:$0xf]  ;;  %v4165_v39 = vld [vmem:[%s4569_s19 + $0xe8] sm:$0xf0] }
 0x108   : > { %1431 = vmatmul.bf16.vlgmr.msra.gmra.mxu2 %v4905_v54  ;;  %v3640_v37 = vor.u32 %v4168_v36, %v3639_v35  ;;  %v3628_v40 = vor.u32 %v4165_v39, %v3627_v38  ;;  %v3615_v41 = vld [vmem:[%s4569_s19 + $0xc8] sm:$0xf]  ;;  %v4162_v42 = vld [vmem:[%s4569_s19 + $0xd0] sm:$0xf0]  ;;  %s4449_s19 = smov 64  }
 0x109   : > { %4280 = vmatpush.bf16.msrb.mxu2 %v3604_v53  ;;  %1450 = vmatmul.bf16.vlgmr.msra.gmra.mxu3 %v4910_v59  ;;  %v3616_v43 = vor.u32 %v4162_v42, %v3615_v41 }
 0x10a   : > { %4288 = vmatpush.bf16.msrb.mxu3 %v3700_v58  ;;  %1392 = vmatpush.bf16.msra.mxu0 %v3512_v62 }
 0x10b   : > { %1411 = vmatpush.bf16.msra.mxu1 %v3608_v63 }
 0x10d   : > { %4281 = vmatpush.bf16.msrb.mxu2 %v3592_v0  ;;  %1393 = vmatmul.bf16.vlgmr.msra.gmra.mxu0 %v4905_v54 }
 0x10e   : > { %4289 = vmatpush.bf16.msrb.mxu3 %v3688_v3  ;;  %1461 = vmatpush.bf16.msrb.mxu0 %v3604_v53 }
 0x10f   : > { %1480 = vmatpush.bf16.msrb.mxu1 %v3700_v58 }
 0x110   : > { %1412 = vmatmul.bf16.vlgmr.msra.gmra.mxu1 %v4910_v59 }
 0x111   : > { %4282 = vmatpush.bf16.msrb.mxu2 %v3580_v4 }
 0x112   : > { %1462 = vmatpush.bf16.msrb.mxu0 %v3592_v0  ;;  %4290 = vmatpush.bf16.msrb.mxu3 %v3676_v25 }
 0x113   : > { %1481 = vmatpush.bf16.msrb.mxu1 %v3688_v3 }
 0x115   : > { %4283 = vmatpush.bf16.msrb.mxu2 %v3568_v7 }
 0x116   : > { %1463 = vmatpush.bf16.msrb.mxu0 %v3580_v4  ;;  %4291 = vmatpush.bf16.msrb.mxu3 %v3664_v31 }
 0x117   : > { %1482 = vmatpush.bf16.msrb.mxu1 %v3676_v25 }
 0x118   : > { %1436 = vmatmul.bf16.gmra.mxu2 %v1063_v15 }
 0x119   : > { %4284 = vmatpush.bf16.msrb.mxu2 %v3556_v14  ;;  %1455 = vmatmul.bf16.gmra.mxu3 %v1064_v18 }
 0x11a   : > { %1464 = vmatpush.bf16.msrb.mxu0 %v3568_v7  ;;  %4292 = vmatpush.bf16.msrb.mxu3 %v3652_v34 }
 0x11b   : > { %1483 = vmatpush.bf16.msrb.mxu1 %v3664_v31 }
 0x11d   : > { %4285 = vmatpush.bf16.msrb.mxu2 %v3544_v19  ;;  %1398 = vmatmul.bf16.gmra.mxu0 %v1063_v15 }
 0x11e   : > { %1465 = vmatpush.bf16.msrb.mxu0 %v3556_v14  ;;  %4293 = vmatpush.bf16.msrb.mxu3 %v3640_v37 }
 0x11f   : > { %1484 = vmatpush.bf16.msrb.mxu1 %v3652_v34 }
 0x120   : > { %1417 = vmatmul.bf16.gmra.mxu1 %v1064_v18 }
 0x121   : > { %4286 = vmatpush.bf16.msrb.mxu2 %v3532_v23 }
 0x122   : > { %1466 = vmatpush.bf16.msrb.mxu0 %v3544_v19  ;;  %4294 = vmatpush.bf16.msrb.mxu3 %v3628_v40 }
 0x123   : > { %1485 = vmatpush.bf16.msrb.mxu1 %v3640_v37 }
 0x125   : > { %4287 = vmatpush.bf16.msrb.mxu2 %v3520_v29 }
 0x126   : > { %1467 = vmatpush.bf16.msrb.mxu0 %v3532_v23  ;;  %4295 = vmatpush.bf16.msrb.mxu3 %v3616_v43 }
 0x127   : > { %1486 = vmatpush.bf16.msrb.mxu1 %v3628_v40 }
 0x128   : > { %1474 = vmatmul.bf16.vlgmr.msrb.gmra.mxu2 %v1063_v15 }
 0x129   : > { %1493 = vmatmul.bf16.vlgmr.msrb.gmra.mxu3 %v1064_v18 }
 0x12a   : > { %1468 = vmatpush.bf16.msrb.mxu0 %v3520_v29 }
 0x12b   : > { %1487 = vmatpush.bf16.msrb.mxu1 %v3616_v43 }
 0x12d   : > { %1469 = vmatmul.bf16.vlgmr.msrb.gmra.mxu0 %v4905_v54 }
 0x130   : > { %1488 = vmatmul.bf16.vlgmr.msrb.gmra.mxu1 %v4910_v59 }
 0x18a   : > { %v1394_v44 = vpop.f32.mrf.mxu0 }
 0x18b   : > { %v1432_v45 = vpop.f32.mrf.mxu2 }
 0x18c   : > { %v1451_v47 = vpop.f32.mrf.mxu3 }
 0x18d   : > { %v1413_v46 = vpop.f32.mrf.mxu1  ;;  %v1452_v48 = vadd.f32 %v1451_v47, %v1432_v45 }
 0x18e   : > { %v1414_v55 = vadd.f32 %v1413_v46, %v1394_v44 }
 0x18f   : > { %v1539_v53 = vpack.c.bf16 %v1452_v48, %v1452_v48 }
 0x190   : > { %v1515_v62 = vpack.c.bf16 %v1414_v55, %v1414_v55 }
 0x191   : > { %v1578_v60 = vunpack.c.l.b16 %v1539_v53 }
 0x192   : > { %v1396_v49 = vpop.f32.mrf.mxu0  ;;  %v1573_v5 = vunpack.c.l.b16 %v1515_v62 }
 0x193   : > { %v1434_v50 = vpop.f32.mrf.mxu2 }
 0x194   : > { %v1453_v52 = vpop.f32.mrf.mxu3 }
 0x195   : > { %v1415_v51 = vpop.f32.mrf.mxu1  ;;  %v1454_v54 = vadd.f32 %v1453_v52, %v1434_v50 }
 0x196   : > { %v1416_v58 = vadd.f32 %v1415_v51, %v1396_v49 }
 0x197   : > { %v1540_v56 = vpack.c.bf16 %v1454_v54, %v1454_v54  ;;  %v4324_v57 = vpack.i.bf16 %v1454_v54, %v1452_v48 }
 0x198   : > { %v1516_v0 = vpack.c.bf16 %v1416_v58, %v1416_v58  ;;  %v4329_v6 = vpack.i.bf16 %v1416_v58, %v1414_v55 }
 0x199   : > { %v1579_v61 = vunpack.c.l.b16 %v1540_v56  ;;  %4325 = vrot.lane.b32.xlu0 %v4324_v57, %s4449_s19 }
 0x19a   : > { %v1399_v59 = vpop.f32.mrf.mxu0  ;;  %v1574_v7 = vunpack.c.l.b16 %v1516_v0 }
 0x19b   : > { %v1580_v63 = vpack.c.b16 %v1579_v61, %v1578_v60  ;;  %v1437_v1 = vpop.f32.mrf.mxu2 }
 0x19c   : > { %v1456_v3 = vpop.f32.mrf.mxu3  ;;  %v1575_v9 = vpack.c.b16 %v1574_v7, %v1573_v5 }
 0x19d   : > { %v1418_v2 = vpop.f32.mrf.mxu1  ;;  %v1586_v4 = vsel %vm1581_vm0, %v1580_v63, 0  ;;  %v1457_v8 = vadd.f32 %v1456_v3, %v1437_v1 }
 0x19e   : > { %1595 = vmatpush.bf16.xpose.msra.mxu2 %v1586_v4  ;;  %v1419_v16 = vadd.f32 %v1418_v2, %v1399_v59 }
 0x19f   : > { %v1541_v14 = vpack.c.bf16 %v1457_v8, %v1457_v8 }
 0x1a0   : > { %v1517_v22 = vpack.c.bf16 %v1419_v16, %v1419_v16 }
 0x1a1   : > { %4330 = vrot.lane.b32.xlu0 %v4329_v6, %s4449_s19  ;;  %v1609_v20 = vunpack.c.l.b16 %v1541_v14 }
 0x1a2   : > { %v1401_v11 = vpop.f32.mrf.mxu0  ;;  %v1604_v26 = vunpack.c.l.b16 %v1517_v22 }
 0x1a3   : > { %v1439_v10 = vpop.f32.mrf.mxu2 }
 0x1a4   : > { %v1458_v12 = vpop.f32.mrf.mxu3 }
 0x1a5   : > { %v1420_v13 = vpop.f32.mrf.mxu1  ;;  %v1459_v15 = vadd.f32 %v1458_v12, %v1439_v10  ;;  %3701 = vmatmul.msk.bf16.vlgmr.msra.gmra.mxu2 %vm1581_vm0, %v1575_v9 }
 0x1a6   : > { %v1421_v19 = vadd.f32 %v1420_v13, %v1401_v11 }
 0x1a7   : > { %v1542_v17 = vpack.c.bf16 %v1459_v15, %v1459_v15  ;;  %v4334_v18 = vpack.i.bf16 %v1459_v15, %v1457_v8 }
 0x1a8   : > { %v1518_v24 = vpack.c.bf16 %v1421_v19, %v1421_v19  ;;  %v4339_v27 = vpack.i.bf16 %v1421_v19, %v1419_v16 }
 0x1a9   : > { %v1610_v21 = vunpack.c.l.b16 %v1542_v17  ;;  %4335 = vrot.lane.b32.xlu1 %v4334_v18, %s4449_s19 }
 0x1aa   : > { %v1605_v28 = vunpack.c.l.b16 %v1518_v24  ;;  %v1470_v17 = vpop.f32.mrf.mxu0 }
 0x1ab   : > { %v1611_v23 = vpack.c.b16 %v1610_v21, %v1609_v20  ;;  %v1475_v30 = vpop.f32.mrf.mxu2 }
 0x1ac   : > { %v1606_v29 = vpack.c.b16 %v1605_v28, %v1604_v26  ;;  %v1494_v31 = vpop.f32.mrf.mxu3 }
 0x1ad   : > { %v1616_v25 = vsel %vm1581_vm0, %v1611_v23, 0  ;;  %v4952_v35 = vadd.f32 %v1494_v31, %v1475_v30  ;;  %v1489_v18 = vpop.f32.mrf.mxu1 }
 0x1ae   : > { %1625 = vmatpush.bf16.xpose.msra.mxu3 %v1616_v25  ;;  %v1490_v19 = vadd.f32 %v1489_v18, %v1470_v17 }
 0x1af   : > { %v1565_v41 = vpack.c.bf16 %v4952_v35, %v4952_v35 }
 0x1b0   : > { %v1563_v23 = vpack.c.bf16 %v1490_v19, %v1490_v19 }
 0x1b1   : > { %4340 = vrot.lane.b32.xlu1 %v4339_v27, %s4449_s19  ;;  %v1824_v50 = vunpack.c.l.b16 %v1565_v41 }
 0x1b2   : > { %v1472_v24 = vpop.f32.mrf.mxu0  ;;  %v1796_v27 = vunpack.c.l.b16 %v1563_v23 }
 0x1b3   : > { %v1477_v40 = vpop.f32.mrf.mxu2 }
 0x1b4   : > { %v1496_v42 = vpop.f32.mrf.mxu3 }
 0x1b5   : > { %3702 = vmatmul.msk.bf16.vlgmr.msra.gmra.mxu3 %vm1581_vm0, %v1606_v29  ;;  %v4956_v44 = vadd.f32 %v1496_v42, %v1477_v40  ;;  %v1491_v25 = vpop.f32.mrf.mxu1 }
 0x1b6   : > { %v1492_v26 = vadd.f32 %v1491_v25, %v1472_v24 }
 0x1b7   : > { %v4349_v49 = vpack.i.bf16 %v4956_v44, %v4952_v35  ;;  %v1566_v51 = vpack.c.bf16 %v4956_v44, %v4956_v44 }
 0x1b8   : > { %v1564_v28 = vpack.c.bf16 %v1492_v26, %v1492_v26  ;;  %v4344_v40 = vpack.i.bf16 %v1492_v26, %v1490_v19 }
 0x1b9   : > { %v1825_v54 = vunpack.c.l.b16 %v1566_v51 }
 0x1ba   : > { %v1797_v30 = vunpack.c.l.b16 %v1564_v28 }
 0x1bb   : > { %v1826_v57 = vpack.c.b16 %v1825_v54, %v1824_v50 }
 0x1bd   : > { %1838 = vmatpush.bf16.msra.mxu1 %v1826_v57 }
 0x20b   : > { %v4326_v32 = vpop.permute.xlu0 %4325 }
 0x20c   : > { %v4328_v33 = vunpack.i.h.bf16 %v4326_v32  ;;  %v4327_v34 = vunpack.i.l.bf16 %v4326_v32 }
 0x20e   : > { %v1544_v36 = vpack.c.bf16 %v4328_v33, %v4328_v33  ;;  %v1543_v37 = vpack.c.bf16 %v4327_v34, %v4327_v34  ;;  %v1798_v33 = vpack.c.b16 %v1797_v30, %v1796_v27 }
 0x210   : > { %v1640_v38 = vunpack.c.l.b16 %v1544_v36  ;;  %v1639_v39 = vunpack.c.l.b16 %v1543_v37  ;;  %1810 = vmatpush.bf16.msra.mxu0 %v1798_v33 }
 0x212   : > { %v1641_v43 = vpack.c.b16 %v1640_v38, %v1639_v39 }
 0x213   : > { %v4331_v45 = vpop.permute.xlu0 %4330 }
 0x214   : > { %v4333_v46 = vunpack.i.h.bf16 %v4331_v45  ;;  %v4332_v47 = vunpack.i.l.bf16 %v4331_v45  ;;  %v1646_v48 = vsel %vm1581_vm0, %v1641_v43, 0 }
 0x215   : > { %1655 = vmatpush.bf16.xpose.msrb.mxu2 %v1646_v48 }
 0x216   : > { %v1520_v52 = vpack.c.bf16 %v4333_v46, %v4333_v46  ;;  %v1519_v53 = vpack.c.bf16 %v4332_v47, %v4332_v47 }
 0x218   : > { %v1635_v55 = vunpack.c.l.b16 %v1520_v52  ;;  %v1634_v56 = vunpack.c.l.b16 %v1519_v53 }
 0x21a   : > { %v1636_v58 = vpack.c.b16 %v1635_v55, %v1634_v56 }
 0x21b   : > { %v4336_v60 = vpop.permute.xlu1 %4335 }
 0x21c   : > { %v4338_v61 = vunpack.i.h.bf16 %v4336_v60  ;;  %v4337_v59 = vunpack.i.l.bf16 %v4336_v60  ;;  %3703 = vmatmul.msk.bf16.vlgmr.msrb.gmra.mxu2 %vm1581_vm0, %v1636_v58 }
 0x21e   : > { %v1546_v62 = vpack.c.bf16 %v4338_v61, %v4338_v61  ;;  %v1545_v63 = vpack.c.bf16 %v4337_v59, %v4337_v59 }
 0x220   : > { %v1670_v0 = vunpack.c.l.b16 %v1546_v62  ;;  %v1669_v1 = vunpack.c.l.b16 %v1545_v63 }
 0x222   : > { %v1671_v2 = vpack.c.b16 %v1670_v0, %v1669_v1 }
 0x223   : > { %v4341_v3 = vpop.permute.xlu1 %4340 }
 0x224   : > { %v4343_v4 = vunpack.i.h.bf16 %v4341_v3  ;;  %v4342_v5 = vunpack.i.l.bf16 %v4341_v3  ;;  %v1676_v6 = vsel %vm1581_vm0, %v1671_v2, 0 }
 0x225   : > { %1685 = vmatpush.bf16.xpose.msrb.mxu3 %v1676_v6 }
 0x226   : > { %v1522_v7 = vpack.c.bf16 %v4343_v4, %v4343_v4  ;;  %v1521_v8 = vpack.c.bf16 %v4342_v5, %v4342_v5 }
 0x228   : > { %v1665_v9 = vunpack.c.l.b16 %v1522_v7  ;;  %v1664_v10 = vunpack.c.l.b16 %v1521_v8  ;;  %v1597_v12 = vpop.f32.mrf.mxu2 }
 0x229   : > { %v1693_v31 = vsel %vm1692_vm1, %v1597_v12, -inf }
 0x22a   : > { %v1666_v11 = vpack.c.b16 %v1665_v9, %v1664_v10 }
 0x22c   : > { %3704 = vmatmul.msk.bf16.vlgmr.msrb.gmra.mxu3 %vm1581_vm0, %v1666_v11 }
 0x230   : > { %v4966_v13 = vpop.f32.mrf.mxu2 }
 0x231   : > { %v1696_v36 = vsel %vm1692_vm1, %v4966_v13, -inf }
 0x238   : > { %v4968_v14 = vpop.f32.mrf.mxu3 }
 0x239   : > { %v1699_v37 = vsel %vm1692_vm1, %v4968_v14, -inf }
 0x240   : > { %v4971_v20 = vpop.f32.mrf.mxu3 }
 0x241   : > { %v1702_v39 = vsel %vm1692_vm1, %v4971_v20, -inf }
 0x29f   : > { %v1657_v15 = vpop.f32.mrf.mxu2 }
 0x2a0   : > { %v1705_v16 = vsel %vm1692_vm1, %v1657_v15, -inf }
 0x2a1   : > { %1706 = vmax.xlane.f32.xlu2 %v1705_v16 }
 0x2a7   : > { %v1659_v21 = vpop.f32.mrf.mxu2 }
 0x2a8   : > { %v1708_v22 = vsel %vm1692_vm1, %v1659_v21, -inf }
 0x2a9   : > { %1709 = vmax.xlane.f32.xlu2 %v1708_v22 }
 0x2af   : > { %v1687_v29 = vpop.f32.mrf.mxu3 }
 0x2b0   : > { %v1711_v32 = vsel %vm1692_vm1, %v1687_v29, -inf }
 0x2b1   : > { %1694 = vmax.xlane.f32.xlu2 %v1693_v31  ;;  %1712 = vmax.xlane.f32.xlu0 %v1711_v32 }
 0x2b7   : > { %v1689_v34 = vpop.f32.mrf.mxu3 }
 0x2b8   : > { %v1714_v38 = vsel %vm1692_vm1, %v1689_v34, -inf }
 0x2b9   : > { %1697 = vmax.xlane.f32.xlu2 %v1696_v36  ;;  %1700 = vmax.xlane.f32.xlu0 %v1699_v37 }
 0x2ba   : > { %1715 = vmax.xlane.f32.xlu1 %v1714_v38 }
 0x2c2   : > { %1703 = vmax.xlane.f32.xlu1 %v1702_v39 }
 0x2d1   : > { %4345 = vrot.lane.b32.xlu2 %v4344_v40, %s4449_s19 }
 0x314   : > { %v1707_v41 = vpop.xlane.xlu2 %1706 }
 0x315   : > { %v1721_v42 = vsub.f32 %v1657_v15, %v1707_v41 }
 0x317   : > { %v1733_v43 = vmul.f32 1.442695, %v1721_v42 }
 0x319   : > { %4364 = vpow2.f32 %v1733_v43 }
 0x31c   : > { %v1710_v45 = vpop.xlane.xlu2 %1709 }
 0x31d   : > { %v1722_v46 = vsub.f32 %v1659_v21, %v1710_v45 }
 0x31f   : > { %v4984_v47 = vpop.eup %4364  ;;  %v1735_v48 = vmul.f32 1.442695, %v1722_v46 }
 0x320   : > { %v1753_v50 = vsel %vm1692_vm1, %v4984_v47, 0.0 }
 0x321   : > { %4366 = vpow2.f32 %v1735_v48  ;;  %1754 = vadd.xlane.f32.xlu2 %v1753_v50 }
 0x324   : > { %v1695_v51 = vpop.xlane.xlu2 %1694  ;;  %v1713_v52 = vpop.xlane.xlu0 %1712 }
 0x325   : > { %v1723_v53 = vsub.f32 %v1687_v29, %v1713_v52  ;;  %v1717_v56 = vsub.f32 %v1597_v12, %v1695_v51 }
 0x327   : > { %v4367_v54 = vpop.eup %4366  ;;  %v1737_v55 = vmul.f32 1.442695, %v1723_v53  ;;  %v1725_v58 = vmul.f32 1.442695, %v1717_v56 }
 0x328   : > { %v1756_v57 = vsel %vm1692_vm1, %v4367_v54, 0.0 }
 0x329   : > { %1757 = vadd.xlane.f32.xlu2 %v1756_v57  ;;  %4368 = vpow2.f32 %v1737_v55 }
 0x32a   : > { %4370 = vpow2.f32 %v1725_v58 }
 0x32c   : > { %v1698_v60 = vpop.xlane.xlu2 %1697  ;;  %v1701_v23 = vpop.xlane.xlu0 %1700 }
 0x32d   : > { %v1716_v61 = vpop.xlane.xlu1 %1715  ;;  %v1718_v0 = vsub.f32 %v4966_v13, %v1698_v60  ;;  %v1719_v24 = vsub.f32 %v4968_v14, %v1701_v23  ;;  %v4199_v23 = vld [vmem:[%s5506_s26 + $0x74] sm:$0xf0] }
 0x32e   : > { %v1724_v59 = vsub.f32 %v1689_v34, %v1716_v61 }
 0x32f   : > { %v4989_v62 = vpop.eup %4368  ;;  %v1727_v3 = vmul.f32 1.442695, %v1718_v0  ;;  %v1729_v25 = vmul.f32 1.442695, %v1719_v24  ;;  %v4198_v24 = vld [vmem:[%s5506_s26 + $0x74] sm:$0xf] }
 0x330   : > { %v1739_v63 = vmul.f32 1.442695, %v1724_v59  ;;  %v1759_v1 = vsel %vm1692_vm1, %v4989_v62, 0.0  ;;  %v4994_v7 = vpop.eup %4370 }
 0x331   : > { %1760 = vadd.xlane.f32.xlu0 %v1759_v1  ;;  %v1741_v13 = vsel %vm1692_vm1, %v4994_v7, 0.0 }
 0x332   : > { %4372 = vpow2.f32 %v1739_v63 }
 0x333   : > { %4374 = vpow2.f32 %v1727_v3 }
 0x334   : > { %v4346_v2 = vpop.permute.xlu2 %4345 }
 0x335   : > { %v1704_v4 = vpop.xlane.xlu1 %1703  ;;  %v4348_v5 = vunpack.i.h.bf16 %v4346_v2  ;;  %v4347_v6 = vunpack.i.l.bf16 %v4346_v2 }
 0x336   : > { %v1720_v8 = vsub.f32 %v4971_v20, %v1704_v4 }
 0x337   : > { %v1568_v9 = vpack.c.bf16 %v4348_v5, %v4348_v5  ;;  %v1567_v10 = vpack.c.bf16 %v4347_v6, %v4347_v6 }
 0x338   : > { %v1731_v11 = vmul.f32 1.442695, %v1720_v8  ;;  %v4373_v12 = vpop.eup %4372 }
 0x339   : > { %v1853_v15 = vunpack.c.l.b16 %v1568_v9  ;;  %v1852_v16 = vunpack.c.l.b16 %v1567_v10  ;;  %1742 = vadd.xlane.f32.xlu0 %v1741_v13  ;;  %v1762_v17 = vsel %vm1692_vm1, %v4373_v12, 0.0  ;;  %v4375_v19 = vpop.eup %4374 }
 0x33a   : > { %4376 = vpow2.f32 %v1731_v11  ;;  %1763 = vadd.xlane.f32.xlu1 %v1762_v17  ;;  %v1744_v22 = vsel %vm1692_vm1, %v4375_v19, 0.0 }
 0x33b   : > { %v1854_v18 = vpack.c.b16 %v1853_v15, %v1852_v16  ;;  %4378 = vpow2.f32 %v1729_v25 }
 0x33d   : > { %1866 = vmatpush.bf16.msra.mxu2 %v1854_v18 }
 0x340   : > { %v5000_v21 = vpop.eup %4376 }
 0x341   : > { %4350 = vrot.lane.b32.xlu2 %v4349_v49, %s4449_s19  ;;  %v1750_v20 = vsel %vm1692_vm1, %v5000_v21, 0.0  ;;  %v4379_v26 = vpop.eup %4378 }
 0x342   : > { %1751 = vadd.xlane.f32.xlu0 %v1750_v20  ;;  %1745 = vadd.xlane.f32.xlu1 %v1744_v22  ;;  %v1747_v27 = vsel %vm1692_vm1, %v4379_v26, 0.0  ;;  %v3767_v22 = vld [vmem:[%s5506_s26 + $0x70] sm:$0xf] }
 0x343   : > { %v3768_v25 = vor.u32 %v4199_v23, %v3767_v22  ;;  %v1939_v22 = vld [vmem:[%s5507_s20] sm:$0x3] }
 0x344   : > { %v1941_v23 = vperm.slane %v1939_v22, 0 }
 0x345   : > { %2025 = vmatpush.bf16.msrb.mxu0 %v3768_v25 }
 0x36a   : > { %1748 = vadd.xlane.f32.xlu2 %v1747_v27  ;;  %v3759_v27 = vld [vmem:[%s5506_s26 + $0x60] sm:$0xf] }
 0x394   : > { %v1755_v28 = vpop.xlane.xlu2 %1754 }
 0x395   : > { %4380 = vrcp.f32 %v1755_v28  ;;  %v4197_v28 = vld [vmem:[%s5506_s26 + $0x64] sm:$0xf0] }
 0x39b   : > { %v4381_v44 = vpop.eup %4380 }
 0x39c   : > { %v1758_v35 = vpop.xlane.xlu2 %1757  ;;  %v1777_v49 = vmul.f32 %v4381_v44, %v4984_v47  ;;  %v4196_v44 = vld [vmem:[%s5506_s26 + $0x64] sm:$0xf] }
 0x39d   : > { %4382 = vrcp.f32 %v1758_v35 }
 0x39e   : > { %v1785_v30 = vpack.c.bf16 %v1777_v49, %v1777_v49  ;;  %v3761_v49 = vld [vmem:[%s5506_s26 + $0x68] sm:$0xf0] }
 0x3a0   : > { %v1847_v39 = vunpack.c.l.b16 %v1785_v30  ;;  %v3764_v30 = vor.u32 %v4196_v44, %v3761_v49 }
 0x3a3   : > { %v4383_v29 = vpop.eup %4382 }
 0x3a4   : > { %v1778_v31 = vmul.f32 %v4383_v29, %v4367_v54  ;;  %v4351_v32 = vpop.permute.xlu2 %4350  ;;  %v1761_v14 = vpop.xlane.xlu0 %1760  ;;  %v3760_v29 = vor.u32 %v4197_v28, %v3759_v27 }
 0x3a5   : > { %v4353_v33 = vunpack.i.h.bf16 %v4351_v32  ;;  %v4352_v34 = vunpack.i.l.bf16 %v4351_v32  ;;  %4384 = vrcp.f32 %v1761_v14  ;;  %v4195_v32 = vld [vmem:[%s5506_s26 + $0x54] sm:$0xf0] }
 0x3a6   : > { %v1786_v36 = vpack.c.bf16 %v1778_v31, %v1778_v31  ;;  %v3751_v31 = vld [vmem:[%s5506_s26 + $0x50] sm:$0xf]  ;;  %2026 = vmatpush.bf16.msrb.mxu0 %v3760_v29 }
 0x3a7   : > { %v1570_v37 = vpack.c.bf16 %v4353_v33, %v4353_v33  ;;  %v1569_v38 = vpack.c.bf16 %v4352_v34, %v4352_v34  ;;  %v4194_v33 = vld [vmem:[%s5506_s26 + $0x54] sm:$0xf]  ;;  %v3753_v34 = vld [vmem:[%s5506_s26 + $0x58] sm:$0xf0]  ;;  %v3752_v14 = vor.u32 %v4195_v32, %v3751_v31 }
 0x3a8   : > { %v1848_v40 = vunpack.c.l.b16 %v1786_v36  ;;  %v3756_v36 = vor.u32 %v4194_v33, %v3753_v34 }
 0x3a9   : > { %v1881_v41 = vunpack.c.l.b16 %v1570_v37  ;;  %v1880_v42 = vunpack.c.l.b16 %v1569_v38  ;;  %v3743_v37 = vld [vmem:[%s5506_s26 + $0x40] sm:$0xf]  ;;  %v4193_v38 = vld [vmem:[%s5506_s26 + $0x44] sm:$0xf0] }
 0x3aa   : > { %v1849_v43 = vpack.c.b16 %v1848_v40, %v1847_v39  ;;  %v4192_v39 = vld [vmem:[%s5506_s26 + $0x44] sm:$0xf]  ;;  %v3745_v40 = vld [vmem:[%s5506_s26 + $0x48] sm:$0xf0]  ;;  %2027 = vmatpush.bf16.msrb.mxu0 %v3752_v14 }
 0x3ab   : > { %v1882_v45 = vpack.c.b16 %v1881_v41, %v1880_v42  ;;  %v4385_v48 = vpop.eup %4384  ;;  %v3744_v41 = vor.u32 %v4193_v38, %v3743_v37  ;;  %v3748_v42 = vor.u32 %v4192_v39, %v3745_v40 }
 0x3ac   : > { %3707 = vmatmul.msk.bf16.vlgmr.msra.gmra.mxu2 %vm1692_vm1, %v1849_v43  ;;  %v1743_v46 = vpop.xlane.xlu0 %1742  ;;  %v1779_v50 = vmul.f32 %v4385_v48, %v4989_v62  ;;  %v3735_v43 = vld [vmem:[%s5506_s26 + $0x30] sm:$0xf] }
 0x3ad   : > { %1894 = vmatpush.bf16.msra.mxu3 %v1882_v45  ;;  %v1764_v47 = vpop.xlane.xlu1 %1763  ;;  %v4191_v45 = vld [vmem:[%s5506_s26 + $0x34] sm:$0xf0] }
 0x3ae   : > { %4386 = vrcp.f32 %v1764_v47  ;;  %v1787_v52 = vpack.c.bf16 %v1779_v50, %v1779_v50  ;;  %v3737_v47 = vld [vmem:[%s5506_s26 + $0x38] sm:$0xf0]  ;;  %2028 = vmatpush.bf16.msrb.mxu0 %v3744_v41  ;;  %v3736_v48 = vor.u32 %v4191_v45, %v3735_v43 }
 0x3af   : > { %4388 = vrcp.f32 %v1743_v46  ;;  %v4190_v46 = vld [vmem:[%s5506_s26 + $0x34] sm:$0xf] }
 0x3b0   : > { %v1875_v57 = vunpack.c.l.b16 %v1787_v52  ;;  %v3740_v50 = vor.u32 %v4190_v46, %v3737_v47  ;;  %v4189_v52 = vld [vmem:[%s5506_s26 + $0x24] sm:$0xf0] }
 0x3b2   : > { %2029 = vmatpush.bf16.msrb.mxu0 %v3736_v48 }
 0x3b4   : > { %v4387_v51 = vpop.eup %4386 }
 0x3b5   : > { %v1780_v53 = vmul.f32 %v4387_v51, %v4373_v12  ;;  %v1746_v54 = vpop.xlane.xlu1 %1745  ;;  %v4389_v55 = vpop.eup %4388  ;;  %v3727_v51 = vld [vmem:[%s5506_s26 + $0x20] sm:$0xf] }
 0x3b6   : > { %4390 = vrcp.f32 %v1746_v54  ;;  %v1773_v58 = vmul.f32 %v4389_v55, %v4994_v7  ;;  %v1752_v4 = vpop.xlane.xlu0 %1751  ;;  %v3729_v54 = vld [vmem:[%s5506_s26 + $0x28] sm:$0xf0]  ;;  %v3728_v55 = vor.u32 %v4189_v52, %v3727_v51 }
 0x3b7   : > { %v1788_v56 = vpack.c.bf16 %v1780_v53, %v1780_v53  ;;  %4392 = vrcp.f32 %v1752_v4  ;;  %v4188_v53 = vld [vmem:[%s5506_s26 + $0x24] sm:$0xf] }
 0x3b8   : > { %v1781_v63 = vpack.c.bf16 %v1773_v58, %v1773_v58  ;;  %v4187_v58 = vld [vmem:[%s5506_s26 + $0x14] sm:$0xf0]  ;;  %2030 = vmatpush.bf16.msrb.mxu0 %v3728_v55 }
 0x3b9   : > { %v1876_v60 = vunpack.c.l.b16 %v1788_v56  ;;  %v3732_v56 = vor.u32 %v4188_v53, %v3729_v54 }
 0x3ba   : > { %v1791_v2 = vunpack.c.l.b16 %v1781_v63 }
 0x3bb   : > { %v1877_v61 = vpack.c.b16 %v1876_v60, %v1875_v57  ;;  %v3719_v57 = vld [vmem:[%s5506_s26 + $0x10] sm:$0xf]  ;;  %v4186_v60 = vld [vmem:[%s5506_s26 + $0x14] sm:$0xf] }
 0x3bc   : > { %v4391_v59 = vpop.eup %4390 }
 0x3bd   : > { %v1774_v0 = vmul.f32 %v4391_v59, %v4375_v19  ;;  %3708 = vmatmul.msk.bf16.vlgmr.msra.gmra.mxu3 %vm1692_vm1, %v1877_v61  ;;  %v4393_v6 = vpop.eup %4392  ;;  %v3721_v61 = vld [vmem:[%s5506_s26 + $0x18] sm:$0xf0]  ;;  %v3720_v59 = vor.u32 %v4187_v58, %v3719_v57 }
 0x3be   : > { %v1776_v7 = vmul.f32 %v4393_v6, %v5000_v21  ;;  %v3724_v63 = vor.u32 %v4186_v60, %v3721_v61 }
 0x3bf   : > { %v1782_v1 = vpack.c.bf16 %v1774_v0, %v1774_v0  ;;  %2031 = vmatpush.bf16.msrb.mxu0 %v3720_v59  ;;  %v3711_v0 = vld [vmem:[%s5506_s26] sm:$0xf] }
 0x3c0   : > { %v1784_v9 = vpack.c.bf16 %v1776_v7, %v1776_v7 }
 0x3c1   : > { %v1792_v62 = vunpack.c.l.b16 %v1782_v1  ;;  %v4185_v1 = vld [vmem:[%s5506_s26 + $0x4] sm:$0xf0] }
 0x3c2   : > { %v1820_v12 = vunpack.c.l.b16 %v1784_v9 }
 0x3c3   : > { %v1793_v3 = vpack.c.b16 %v1792_v62, %v1791_v2  ;;  %v4184_v2 = vld [vmem:[%s5506_s26 + $0x4] sm:$0xf]  ;;  %v3712_v62 = vor.u32 %v4185_v1, %v3711_v0 }
 0x3c5   : > { %3705 = vmatmul.msk.bf16.vlgmr.msra.gmra.mxu0 %vm1692_vm1, %v1793_v3  ;;  %v3713_v3 = vld [vmem:[%s5506_s26 + $0x8] sm:$0xf0] }
 0x3c6   : > { %v3716_v4 = vor.u32 %v4184_v2, %v3713_v3  ;;  %2032 = vmatpush.bf16.msrb.mxu0 %v3712_v62 }
 0x3dd   : > { %v1749_v5 = vpop.xlane.xlu2 %1748 }
 0x3de   : > { %4394 = vrcp.f32 %v1749_v5 }
 0x3e4   : > { %v4395_v8 = vpop.eup %4394 }
 0x3e5   : > { %v1775_v10 = vmul.f32 %v4395_v8, %v4379_v26  ;;  %v3769_v26 = vld [vmem:[%s5506_s26 + $0x78] sm:$0xf0] }
 0x3e6   : > { %v3772_v35 = vor.u32 %v4198_v24, %v3769_v26  ;;  %v1942_v24 = vperm.slane %v1939_v22, 1  ;;  %v3833_v22 = vld [vmem:[%s4590_s3 + $0x78] sm:$0xf0] }
 0x3e7   : > { %v1783_v11 = vpack.c.bf16 %v1775_v10, %v1775_v10 }
 0x3e8   : > { %2044 = vmatpush.bf16.msrb.mxu1 %v3772_v35 }
 0x3e9   : > { %v1819_v13 = vunpack.c.l.b16 %v1783_v11 }
 0x3eb   : > { %v1821_v15 = vpack.c.b16 %v1820_v12, %v1819_v13 }
 0x3ec   : > { %2045 = vmatpush.bf16.msrb.mxu1 %v3764_v30 }
 0x3ed   : > { %3706 = vmatmul.msk.bf16.vlgmr.msra.gmra.mxu1 %vm1692_vm1, %v1821_v15 }
 0x3f0   : > { %2046 = vmatpush.bf16.msrb.mxu1 %v3756_v36 }
 0x3f4   : > { %2047 = vmatpush.bf16.msrb.mxu1 %v3748_v42  ;;  %v4450_v42 = vmov 256.0  }
 0x3f5   : > { %4396 = vrcp.f32 %v4450_v42  ;;  %v4210_v42 = vld [vmem:[%s4590_s3 + $0x54] sm:$0xf] }
 0x3f8   : > { %2048 = vmatpush.bf16.msrb.mxu1 %v3740_v50 }
 0x3fb   : > { %v4397_v43 = vpop.eup %4396 }
 0x3fc   : > { %2049 = vmatpush.bf16.msrb.mxu1 %v3732_v56  ;;  %v2078_v45 = vmul.f32 256.0, %v4397_v43  ;;  %vm2082_vm2 = vweird.f32 %v4397_v43 }
 0x3fe   : > { %v2079_v46 = vsub.f32 1.0, %v2078_v45 }
 0x400   : > { %2050 = vmatpush.bf16.msrb.mxu1 %v3724_v63  ;;  %v2080_v47 = vmul.f32 %v4397_v43, %v2079_v46 }
 0x402   : > { %v2081_v48 = vadd.f32 %v4397_v43, %v2080_v47  ;;  %v4226_v47 = vld [vmem:[%s4590_s3 + $0xd4] sm:$0xf] }
 0x404   : > { %2051 = vmatpush.bf16.msrb.mxu1 %v3716_v4  ;;  %v5062_v50 = vsel %vm2082_vm2, %v4397_v43, %v2081_v48  ;;  %v3817_v43 = vld [vmem:[%s4590_s3 + $0x58] sm:$0xf0] }
 0x405   : > { %v3820_v46 = vor.u32 %v4210_v42, %v3817_v43  ;;  %v3881_v48 = vld [vmem:[%s4590_s3 + $0xd8] sm:$0xf0]  ;;  %v4218_v42 = vld [vmem:[%s4590_s3 + $0x94] sm:$0xf] }
 0x406   : > { %v3849_v43 = vld [vmem:[%s4590_s3 + $0x98] sm:$0xf0] }
 0x42f   : > { %v1868_v16 = vpop.f32.mrf.mxu2 }
 0x437   : > { %v1870_v17 = vpop.f32.mrf.mxu2 }
 0x438   : > { %v4354_v18 = vpack.i.bf16 %v1870_v17, %v1868_v16 }
 0x43a   : > { %4355 = vrot.lane.b32.xlu1 %v4354_v18, %s4449_s19 }
 0x440   : > { %v1896_v19 = vpop.f32.mrf.mxu3 }
 0x442   : > { %v1812_v5 = vpop.f32.mrf.mxu0 }
 0x448   : > { %v1898_v21 = vpop.f32.mrf.mxu3 }
 0x449   : > { %v4359_v20 = vpack.i.bf16 %v1898_v21, %v1896_v19 }
 0x44a   : > { %v1814_v9 = vpop.f32.mrf.mxu0 }
 0x44b   : > { %4360 = vrot.lane.b32.xlu0 %v4359_v20, %s4449_s19 }
 0x46a   : > { %v1840_v13 = vpop.f32.mrf.mxu1 }
 0x472   : > { %v1842_v18 = vpop.f32.mrf.mxu1 }
 0x4ac   : > { %v4356_v6 = vpop.permute.xlu1 %4355 }
 0x4ad   : > { %v4358_v7 = vunpack.i.h.bf16 %v4356_v6  ;;  %v4357_v8 = vunpack.i.l.bf16 %v4356_v6 }
 0x4af   : > { %v1918_v10 = vsel %vm1581_vm0, %v1814_v9, %v4358_v7  ;;  %v1917_v11 = vsel %vm1581_vm0, %v1812_v5, %v4357_v8 }
 0x4b0   : > { %v1921_v12 = vpack.c.bf16 %v1918_v10, %v1917_v11 }
 0x4b2   : > { %2033 = vmatmul.bf16.vlgmr.msrb.gmra.mxu0 %v1921_v12  ;;  %2052 = vmatmul.bf16.vlgmr.msrb.gmra.mxu1 %v1921_v12 }
 0x4bd   : > { %v4361_v15 = vpop.permute.xlu0 %4360 }
 0x4be   : > { %v4363_v16 = vunpack.i.h.bf16 %v4361_v15  ;;  %v4362_v17 = vunpack.i.l.bf16 %v4361_v15 }
 0x4c0   : > { %v1919_v19 = vsel %vm1581_vm0, %v1840_v13, %v4362_v17  ;;  %v1920_v21 = vsel %vm1581_vm0, %v1842_v18, %v4363_v16  ;;  %v3831_v16 = vld [vmem:[%s4590_s3 + $0x70] sm:$0xf]  ;;  %v4215_v17 = vld [vmem:[%s4590_s3 + $0x74] sm:$0xf0] }
 0x4c1   : > { %v1922_v20 = vpack.c.bf16 %v1920_v21, %v1919_v19  ;;  %v3895_v18 = vld [vmem:[%s4590_s3 + $0xf0] sm:$0xf]  ;;  %v3832_v19 = vor.u32 %v4215_v17, %v3831_v16  ;;  %v4231_v21 = vld [vmem:[%s4590_s3 + $0xf4] sm:$0xf0] }
 0x4c3   : > { %2038 = vmatmul.bf16.gmra.mxu0 %v1922_v20  ;;  %2057 = vmatmul.bf16.gmra.mxu1 %v1922_v20  ;;  %v4214_v20 = vld [vmem:[%s4590_s3 + $0x74] sm:$0xf] }
 0x4c4   : > { %2408 = vmatpush.bf16.msrb.mxu2 %v3832_v19  ;;  %v3865_v19 = vld [vmem:[%s4590_s3 + $0xb8] sm:$0xf0] }
 0x52f   : > { %v2034_v25 = vpop.f32.mrf.mxu0  ;;  %v2053_v26 = vpop.f32.mrf.mxu1 }
 0x530   : > { %v2035_v27 = vadd.f32 %v2034_v25, %v1941_v23  ;;  %v2054_v28 = vadd.f32 %v2053_v26, %v1942_v24  ;;  %v4230_v25 = vld [vmem:[%s4590_s3 + $0xf4] sm:$0xf]  ;;  %v3897_v26 = vld [vmem:[%s4590_s3 + $0xf8] sm:$0xf0] }
 0x532   : > { %v2065_v35 = vadd.f32 %v2054_v28, %v2035_v27 }
 0x534   : > { %2066 = vadd.xlane.f32.xlu1 %v2065_v35  ;;  %v4213_v35 = vld [vmem:[%s4590_s3 + $0x64] sm:$0xf0] }
 0x537   : > { %v2036_v44 = vpop.f32.mrf.mxu0  ;;  %v2055_v49 = vpop.f32.mrf.mxu1 }
 0x538   : > { %v2037_v29 = vadd.f32 %v2036_v44, %v1941_v23  ;;  %v2056_v30 = vadd.f32 %v2055_v49, %v1942_v24  ;;  %v3887_v44 = vld [vmem:[%s4590_s3 + $0xe0] sm:$0xf] }
 0x53a   : > { %v2068_v31 = vadd.f32 %v2056_v30, %v2037_v29 }
 0x53c   : > { %2069 = vadd.xlane.f32.xlu0 %v2068_v31  ;;  %v3825_v31 = vld [vmem:[%s4590_s3 + $0x68] sm:$0xf0] }
 0x540   : > { %v2039_v32 = vpop.f32.mrf.mxu0  ;;  %v2058_v33 = vpop.f32.mrf.mxu1 }
 0x541   : > { %v2040_v34 = vadd.f32 %v2039_v32, %v1941_v23  ;;  %v2059_v14 = vadd.f32 %v2058_v33, %v1942_v24 }
 0x543   : > { %v2071_v36 = vadd.f32 %v2059_v14, %v2040_v34 }
 0x545   : > { %2072 = vadd.xlane.f32.xlu2 %v2071_v36 }
 0x548   : > { %v2041_v37 = vpop.f32.mrf.mxu0  ;;  %v2060_v38 = vpop.f32.mrf.mxu1 }
 0x549   : > { %v2042_v39 = vadd.f32 %v2041_v37, %v1941_v23  ;;  %v2061_v40 = vadd.f32 %v2060_v38, %v1942_v24  ;;  %v3896_v23 = vor.u32 %v4231_v21, %v3895_v18  ;;  %v3836_v24 = vor.u32 %v4214_v20, %v3833_v22  ;;  %v3815_v37 = vld [vmem:[%s4590_s3 + $0x50] sm:$0xf]  ;;  %v4211_v38 = vld [vmem:[%s4590_s3 + $0x54] sm:$0xf0]  ;;  %v4222_v18 = vld [vmem:[%s4590_s3 + $0xb4] sm:$0xf] }
 0x54a   : > { %v3868_v21 = vor.u32 %v4222_v18, %v3865_v19  ;;  %v3791_v20 = vld [vmem:[%s4590_s3 + $0x20] sm:$0xf]  ;;  %v4205_v22 = vld [vmem:[%s4590_s3 + $0x24] sm:$0xf0] }
 0x54b   : > { %v2074_v41 = vadd.f32 %v2061_v40, %v2042_v39  ;;  %2427 = vmatpush.bf16.msrb.mxu3 %v3896_v23  ;;  %2446 = vmatpush.bf16.msra.mxu0 %v3836_v24  ;;  %v3855_v23 = vld [vmem:[%s4590_s3 + $0xa0] sm:$0xf]  ;;  %v3792_v24 = vor.u32 %v4205_v22, %v3791_v20 }
 0x54d   : > { %2075 = vadd.xlane.f32.xlu2 %v2074_v41  ;;  %v4227_v41 = vld [vmem:[%s4590_s3 + $0xd4] sm:$0xf0] }
 0x5a7   : > { %v2067_v51 = vpop.xlane.xlu1 %2066 }
 0x5a8   : > { %v2084_v52 = vmul.f32 %v5062_v50, %v2067_v51  ;;  %v3884_v51 = vor.u32 %v4226_v47, %v3881_v48  ;;  %v4201_v47 = vld [vmem:[%s4590_s3 + $0x4] sm:$0xf0]  ;;  %v3839_v48 = vld [vmem:[%s4590_s3 + $0x80] sm:$0xf] }
 0x5aa   : > { %v5065_v53 = vsub.f32 %v2035_v27, %v2084_v52  ;;  %v5067_v54 = vsub.f32 %v2054_v28, %v2084_v52  ;;  %v3900_v27 = vor.u32 %v4230_v25, %v3897_v26  ;;  %v3823_v28 = vld [vmem:[%s4590_s3 + $0x60] sm:$0xf]  ;;  %v4221_v25 = vld [vmem:[%s4590_s3 + $0xa4] sm:$0xf0]  ;;  %v4204_v26 = vld [vmem:[%s4590_s3 + $0x24] sm:$0xf] }
 0x5ab   : > { %v3824_v49 = vor.u32 %v4213_v35, %v3823_v28  ;;  %v3807_v52 = vld [vmem:[%s4590_s3 + $0x40] sm:$0xf]  ;;  %v3856_v28 = vor.u32 %v4221_v25, %v3855_v23 }
 0x5ac   : > { %v2096_v55 = vmul.f32 %v5065_v53, %v5065_v53  ;;  %v2097_v56 = vmul.f32 %v5067_v54, %v5067_v54  ;;  %2465 = vmatpush.bf16.msra.mxu1 %v3900_v27  ;;  %v3793_v27 = vld [vmem:[%s4590_s3 + $0x28] sm:$0xf0]  ;;  %v2064_v25 = vld [vmem:[%s5508_s23] sm:$0x3] }
 0x5ad   : > { %2409 = vmatpush.bf16.msrb.mxu2 %v3824_v49  ;;  %v3796_v35 = vor.u32 %v4204_v26, %v3793_v27  ;;  %v3857_v49 = vld [vmem:[%s4590_s3 + $0xa8] sm:$0xf0] }
 0x5ae   : > { %v2104_v57 = vadd.f32 %v2097_v56, %v2096_v55  ;;  %v4209_v55 = vld [vmem:[%s4590_s3 + $0x44] sm:$0xf0]  ;;  %v3871_v56 = vld [vmem:[%s4590_s3 + $0xc0] sm:$0xf] }
 0x5af   : > { %v2070_v58 = vpop.xlane.xlu0 %2069 }
 0x5b0   : > { %v2085_v60 = vmul.f32 %v5062_v50, %v2070_v58  ;;  %2105 = vadd.xlane.f32.xlu2 %v2104_v57  ;;  %v3808_v57 = vor.u32 %v4209_v55, %v3807_v52  ;;  %v4225_v58 = vld [vmem:[%s4590_s3 + $0xc4] sm:$0xf0]  ;;  %v4200_v55 = vld [vmem:[%s4590_s3 + $0x4] sm:$0xf] }
 0x5b1   : > { %v4217_v52 = vld [vmem:[%s4590_s3 + $0x84] sm:$0xf0] }
 0x5b2   : > { %v5074_v61 = vsub.f32 %v2037_v29, %v2085_v60  ;;  %v5076_v59 = vsub.f32 %v2056_v30, %v2085_v60  ;;  %v4229_v29 = vld [vmem:[%s4590_s3 + $0xe4] sm:$0xf0]  ;;  %v4212_v30 = vld [vmem:[%s4590_s3 + $0x64] sm:$0xf] }
 0x5b3   : > { %v3888_v32 = vor.u32 %v4229_v29, %v3887_v44  ;;  %v3828_v33 = vor.u32 %v4212_v30, %v3825_v31  ;;  %v4208_v60 = vld [vmem:[%s4590_s3 + $0x44] sm:$0xf] }
 0x5b4   : > { %v2098_v63 = vmul.f32 %v5074_v61, %v5074_v61  ;;  %v2099_v0 = vmul.f32 %v5076_v59, %v5076_v59  ;;  %v4220_v44 = vld [vmem:[%s4590_s3 + $0xa4] sm:$0xf] }
 0x5b5   : > { %2428 = vmatpush.bf16.msrb.mxu3 %v3888_v32  ;;  %2447 = vmatpush.bf16.msra.mxu0 %v3828_v33  ;;  %v3860_v30 = vor.u32 %v4220_v44, %v3857_v49  ;;  %v3783_v32 = vld [vmem:[%s4590_s3 + $0x10] sm:$0xf]  ;;  %v4203_v33 = vld [vmem:[%s4590_s3 + $0x14] sm:$0xf0]  ;;  %v5188_v49 = vperm.slane %v2064_v25, 0 }
 0x5b6   : > { %v2107_v1 = vadd.f32 %v2099_v0, %v2098_v63  ;;  %v3809_v63 = vld [vmem:[%s4590_s3 + $0x48] sm:$0xf0]  ;;  %v3872_v0 = vor.u32 %v4225_v58, %v3871_v56 }
 0x5b7   : > { %v3777_v56 = vld [vmem:[%s4590_s3 + $0x8] sm:$0xf0] }
 0x5b8   : > { %2108 = vadd.xlane.f32.xlu2 %v2107_v1  ;;  %v2073_v2 = vpop.xlane.xlu2 %2072  ;;  %v3812_v1 = vor.u32 %v4208_v60, %v3809_v63  ;;  %v3780_v58 = vor.u32 %v4200_v55, %v3777_v56  ;;  %v4216_v60 = vld [vmem:[%s4590_s3 + $0x84] sm:$0xf]  ;;  %v3841_v63 = vld [vmem:[%s4590_s3 + $0x88] sm:$0xf0] }
 0x5b9   : > { %v2086_v62 = vmul.f32 %v5062_v50, %v2073_v2  ;;  %2448 = vmatpush.bf16.msra.mxu0 %v3820_v46  ;;  %v4224_v2 = vld [vmem:[%s4590_s3 + $0xc4] sm:$0xf]  ;;  %v3775_v46 = vld [vmem:[%s4590_s3] sm:$0xf] }
 0x5bb   : > { %v5083_v3 = vsub.f32 %v2040_v34, %v2086_v62  ;;  %v5085_v4 = vsub.f32 %v2059_v14, %v2086_v62  ;;  %v4228_v34 = vld [vmem:[%s4590_s3 + $0xe4] sm:$0xf]  ;;  %v3889_v14 = vld [vmem:[%s4590_s3 + $0xe8] sm:$0xf0] }
 0x5bc   : > { %v3892_v36 = vor.u32 %v4228_v34, %v3889_v14  ;;  %v3873_v62 = vld [vmem:[%s4590_s3 + $0xc8] sm:$0xf0]  ;;  %v3847_v34 = vld [vmem:[%s4590_s3 + $0x90] sm:$0xf]  ;;  %v3784_v14 = vor.u32 %v4203_v33, %v3783_v32  ;;  %v4262_v32 = vld [vmem:[%s4595_s28 + $0xf4] sm:$0xf] }
 0x5bd   : > { %v2100_v5 = vmul.f32 %v5083_v3, %v5083_v3  ;;  %v2101_v6 = vmul.f32 %v5085_v4, %v5085_v4  ;;  %2449 = vmatpush.bf16.msra.mxu0 %v3812_v1  ;;  %v3844_v1 = vor.u32 %v4216_v60, %v3841_v63  ;;  %v4007_v60 = vld [vmem:[%s4595_s28 + $0xd0] sm:$0xf] }
 0x5be   : > { %2466 = vmatpush.bf16.msra.mxu1 %v3892_v36  ;;  %v4219_v36 = vld [vmem:[%s4590_s3 + $0x94] sm:$0xf0] }
 0x5bf   : > { %v2110_v7 = vadd.f32 %v2101_v6, %v2100_v5  ;;  %v3876_v5 = vor.u32 %v4224_v2, %v3873_v62  ;;  %v3799_v6 = vld [vmem:[%s4590_s3 + $0x30] sm:$0xf] }
 0x5c0   : > { %v2076_v8 = vpop.xlane.xlu2 %2075 }
 0x5c1   : > { %v2087_v9 = vmul.f32 %v5062_v50, %v2076_v8  ;;  %2111 = vadd.xlane.f32.xlu1 %v2110_v7  ;;  %v4207_v7 = vld [vmem:[%s4590_s3 + $0x34] sm:$0xf0]  ;;  %v3863_v8 = vld [vmem:[%s4590_s3 + $0xb0] sm:$0xf] }
 0x5c2   : > { %2467 = vmatpush.bf16.msra.mxu1 %v3884_v51  ;;  %v3776_v51 = vor.u32 %v4201_v47, %v3775_v46 }
 0x5c3   : > { %v5092_v10 = vsub.f32 %v2042_v39, %v2087_v9  ;;  %v5094_v11 = vsub.f32 %v2061_v40, %v2087_v9  ;;  %v3879_v39 = vld [vmem:[%s4590_s3 + $0xd0] sm:$0xf]  ;;  %v3816_v40 = vor.u32 %v4211_v38, %v3815_v37  ;;  %v3800_v9 = vor.u32 %v4207_v7, %v3799_v6  ;;  %v4202_v37 = vld [vmem:[%s4590_s3 + $0x14] sm:$0xf]  ;;  %v3785_v38 = vld [vmem:[%s4590_s3 + $0x18] sm:$0xf0] }
 0x5c4   : > { %v3880_v45 = vor.u32 %v4227_v41, %v3879_v39  ;;  %v3788_v41 = vor.u32 %v4202_v37, %v3785_v38  ;;  %v4025_v37 = vld [vmem:[%s4595_s28 + $0xf8] sm:$0xf0]  ;;  %v4015_v38 = vld [vmem:[%s4595_s28 + $0xe0] sm:$0xf] }
 0x5c5   : > { %v2102_v12 = vmul.f32 %v5092_v10, %v5092_v10  ;;  %v2103_v13 = vmul.f32 %v5094_v11, %v5094_v11  ;;  %2410 = vmatpush.bf16.msrb.mxu2 %v3816_v40  ;;  %v3848_v40 = vor.u32 %v4219_v36, %v3847_v34 }
 0x5c6   : > { %2429 = vmatpush.bf16.msrb.mxu3 %v3880_v45  ;;  %2468 = vmatpush.bf16.msra.mxu1 %v3876_v5  ;;  %v3852_v45 = vor.u32 %v4218_v42, %v3849_v43  ;;  %v4261_v42 = vld [vmem:[%s4595_s28 + $0xe4] sm:$0xf0]  ;;  %v4260_v43 = vld [vmem:[%s4595_s28 + $0xe4] sm:$0xf] }
 0x5c7   : > { %v2113_v15 = vadd.f32 %v2103_v13, %v2102_v12  ;;  %v4223_v12 = vld [vmem:[%s4590_s3 + $0xb4] sm:$0xf0]  ;;  %v4206_v13 = vld [vmem:[%s4590_s3 + $0x34] sm:$0xf]  ;;  %v4016_v56 = vor.u32 %v4261_v42, %v4015_v38 }
 0x5c8   : > { %v3864_v16 = vor.u32 %v4223_v12, %v3863_v8 }
 0x5c9   : > { %2114 = vadd.xlane.f32.xlu0 %v2113_v15  ;;  %2411 = vmatpush.bf16.msrb.mxu2 %v3808_v57  ;;  %v3801_v15 = vld [vmem:[%s4590_s3 + $0x38] sm:$0xf0]  ;;  %v3840_v57 = vor.u32 %v4217_v52, %v3839_v48  ;;  %v4247_v52 = vld [vmem:[%s4595_s28 + $0x74] sm:$0xf0] }
 0x5ca   : > { %2430 = vmatpush.bf16.msrb.mxu3 %v3872_v0  ;;  %v3804_v17 = vor.u32 %v4206_v13, %v3801_v15  ;;  %2469 = vmatpush.bf16.msra.mxu1 %v3868_v21 }
 0x5cc   : > { %2450 = vmatpush.bf16.msra.mxu0 %v3804_v17 }
 0x5cd   : > { %2412 = vmatpush.bf16.msrb.mxu2 %v3800_v9 }
 0x5ce   : > { %2431 = vmatpush.bf16.msrb.mxu3 %v3864_v16  ;;  %2470 = vmatpush.bf16.msra.mxu1 %v3860_v30  ;;  %v2063_v16 = vld [vmem:[%s701_s4] sm:$0x3] }
 0x5cf   : > { %v5174_v22 = vperm.slane %v2063_v16, 0  ;;  %v5183_v26 = vperm.slane %v2063_v16, 1 }
 0x5d0   : > { %2451 = vmatpush.bf16.msra.mxu0 %v3796_v35 }
 0x5d1   : > { %2413 = vmatpush.bf16.msrb.mxu2 %v3792_v24 }
 0x5d2   : > { %2432 = vmatpush.bf16.msrb.mxu3 %v3856_v28  ;;  %2471 = vmatpush.bf16.msra.mxu1 %v3852_v45  ;;  %v4017_v45 = vld [vmem:[%s4595_s28 + $0xe8] sm:$0xf0] }
 0x5d4   : > { %2452 = vmatpush.bf16.msra.mxu0 %v3788_v41  ;;  %v4028_v41 = vor.u32 %v4262_v32, %v4025_v37 }
 0x5d5   : > { %2414 = vmatpush.bf16.msrb.mxu2 %v3784_v14 }
 0x5d6   : > { %2433 = vmatpush.bf16.msrb.mxu3 %v3848_v40  ;;  %2472 = vmatpush.bf16.msra.mxu1 %v3844_v1 }
 0x5d8   : > { %2453 = vmatpush.bf16.msra.mxu0 %v3780_v58  ;;  %v4246_v58 = vld [vmem:[%s4595_s28 + $0x74] sm:$0xf] }
 0x5d9   : > { %2415 = vmatpush.bf16.msrb.mxu2 %v3776_v51  ;;  %v3959_v51 = vld [vmem:[%s4595_s28 + $0x70] sm:$0xf] }
 0x5da   : > { %2434 = vmatpush.bf16.msrb.mxu3 %v3840_v57  ;;  %2751 = vmatpush.bf16.msrb.mxu1 %v4028_v41  ;;  %v4020_v57 = vor.u32 %v4260_v43, %v4017_v45 }
 0x5de   : > { %2752 = vmatpush.bf16.msrb.mxu1 %v4020_v57 }
 0x623   : > { %v2106_v29 = vpop.xlane.xlu2 %2105 }
 0x624   : > { %v2116_v31 = vmul.f32 %v2106_v29, %v5062_v50  ;;  %v5190_v29 = vperm.slane %v2064_v25, 1  ;;  %v4257_v25 = vld [vmem:[%s4595_s28 + $0xc4] sm:$0xf0] }
 0x626   : > { %v2120_v39 = vadd.f32 1e-05, %v2116_v31  ;;  %v4023_v31 = vld [vmem:[%s4595_s28 + $0xf0] sm:$0xf] }
 0x628   : > { %4398 = vrsqrt.f32 %v2120_v39  ;;  %vm2130_vm4 = vweird.f32 %v2120_v39 }
 0x62b   : > { %v2109_v0 = vpop.xlane.xlu2 %2108 }
 0x62c   : > { %v2117_v2 = vmul.f32 %v2109_v0, %v5062_v50 }
 0x62e   : > { %v4399_v62 = vpop.eup %4398  ;;  %v2121_v5 = vadd.f32 1e-05, %v2117_v2 }
 0x62f   : > { %v2125_v6 = vmul.f32 %v4399_v62, %v2120_v39  ;;  %vm2131_vm3 = vweird.f32 %v4399_v62 }
 0x630   : > { %4400 = vrsqrt.f32 %v2121_v5  ;;  %vm2132_vm5 = vmor %vm2130_vm4, %vm2131_vm3  ;;  %vm2140_vm7 = vweird.f32 %v2121_v5 }
 0x631   : > { %v2126_v7 = vmul.f32 %v4399_v62, %v2125_v6  ;;  %v4009_v6 = vld [vmem:[%s4595_s28 + $0xd8] sm:$0xf0] }
 0x633   : > { %v2127_v8 = vmul.f32 0.5, %v2126_v7 }
 0x634   : > { %v2112_v12 = vpop.xlane.xlu1 %2111 }
 0x635   : > { %v2128_v9 = vsub.f32 1.5, %v2127_v8  ;;  %v2118_v15 = vmul.f32 %v2112_v12, %v5062_v50  ;;  %v4245_v12 = vld [vmem:[%s4595_s28 + $0x64] sm:$0xf0] }
 0x636   : > { %v4401_v13 = vpop.eup %4400 }
 0x637   : > { %v2129_v17 = vmul.f32 %v4399_v62, %v2128_v9  ;;  %v2135_v18 = vmul.f32 %v4401_v13, %v2121_v5  ;;  %v5172_v19 = vadd.f32 1e-05, %v2118_v15  ;;  %vm2141_vm6 = vweird.f32 %v4401_v13  ;;  %v4258_v5 = vld [vmem:[%s4595_s28 + $0xd4] sm:$0xf]  ;;  %v3951_v9 = vld [vmem:[%s4595_s28 + $0x60] sm:$0xf] }
 0x638   : > { %vm2142_vm8 = vmor %vm2140_vm7, %vm2141_vm6  ;;  %v3952_v16 = vor.u32 %v4245_v12, %v3951_v9  ;;  %v3991_v9 = vld [vmem:[%s4595_s28 + $0xb0] sm:$0xf]  ;;  %v4255_v12 = vld [vmem:[%s4595_s28 + $0xb4] sm:$0xf0] }
 0x639   : > { %v2133_v21 = vsel %vm2132_vm5, %v4399_v62, %v2129_v17  ;;  %v2136_v20 = vmul.f32 %v4401_v13, %v2135_v18  ;;  %4402 = vrsqrt.f32 %v5172_v19  ;;  %v4259_v62 = vld [vmem:[%s4595_s28 + $0xd4] sm:$0xf0]  ;;  %v4244_v17 = vld [vmem:[%s4595_s28 + $0x64] sm:$0xf]  ;;  %v3953_v18 = vld [vmem:[%s4595_s28 + $0x68] sm:$0xf0]  ;;  %vm2150_vm10 = vweird.f32 %v5172_v19 }
 0x63a   : > { %v2164_v23 = vmul.f32 %v2133_v21, %v5065_v53  ;;  %v2165_v27 = vmul.f32 %v2133_v21, %v5067_v54  ;;  %v4263_v54 = vld [vmem:[%s4595_s28 + $0xf4] sm:$0xf0]  ;;  %v4008_v8 = vor.u32 %v4259_v62, %v4007_v60  ;;  %v4418_v60 = vld [vmem:[#allocation2 + $0x8] sm:$0xff] }
 0x63b   : > { %v2137_v24 = vmul.f32 0.5, %v2136_v20  ;;  %v4024_v36 = vor.u32 %v4263_v54, %v4023_v31  ;;  %v4012_v20 = vor.u32 %v4258_v5, %v4009_v6  ;;  %v4417_v54 = vld [vmem:[#allocation2 + $0x10] sm:$0xff]  ;;  %v4243_v62 = vld [vmem:[%s4595_s28 + $0x54] sm:$0xf0] }
 0x63c   : > { %v2115_v35 = vpop.xlane.xlu0 %2114  ;;  %v2177_v53 = vmul.f32 %v5174_v22, %v2164_v23  ;;  %v2178_v34 = vmul.f32 %v5183_v26, %v2165_v27  ;;  %v3956_v23 = vor.u32 %v4244_v17, %v3953_v18  ;;  %v4242_v5 = vld [vmem:[%s4595_s28 + $0x54] sm:$0xf]  ;;  %v3935_v18 = vld [vmem:[%s4595_s28 + $0x40] sm:$0xf] }
 0x63d   : > { %v2138_v28 = vsub.f32 1.5, %v2137_v24  ;;  %v2119_v44 = vmul.f32 %v2115_v35, %v5062_v50  ;;  %2713 = vmatpush.bf16.msra.mxu3 %v4024_v36  ;;  %v3999_v24 = vld [vmem:[%s4595_s28 + $0xc0] sm:$0xf]  ;;  %v4001_v36 = vld [vmem:[%s4595_s28 + $0xc8] sm:$0xf0]  ;;  %2753 = vmatpush.bf16.msrb.mxu1 %v4012_v20 }
 0x63e   : > { %v2190_v48 = vadd.f32 %v5188_v49, %v2177_v53  ;;  %v2191_v1 = vadd.f32 %v5190_v29, %v2178_v34  ;;  %v4415_v53 = vld [vmem:[#allocation2 + $0x18] sm:$0xff]  ;;  %v4256_v34 = vld [vmem:[%s4595_s28 + $0xc4] sm:$0xf]  ;;  %v4000_v41 = vor.u32 %v4257_v25, %v3999_v24  ;;  %v3937_v24 = vld [vmem:[%s4595_s28 + $0x48] sm:$0xf0] }
 0x63f   : > { %v2139_v30 = vmul.f32 %v4401_v13, %v2138_v28  ;;  %v5195_v33 = vpop.eup %4402  ;;  %v5198_v14 = vadd.f32 1e-05, %v2119_v44  ;;  %v4414_v28 = vld [vmem:[#allocation2 + $0x30] sm:$0xff]  ;;  %v4240_v20 = vld [vmem:[%s4595_s28 + $0x44] sm:$0xf] }
 0x640   : > { %v2145_v40 = vmul.f32 %v5195_v33, %v5172_v19  ;;  %vm2151_vm9 = vweird.f32 %v5195_v33  ;;  %v5232_v35 = vadd.f32 %v4414_v28, %v2190_v48  ;;  %v4004_v19 = vor.u32 %v4256_v34, %v4001_v36  ;;  %v4253_v28 = vld [vmem:[%s4595_s28 + $0xa4] sm:$0xf0]  ;;  %v3927_v36 = vld [vmem:[%s4595_s28 + $0x30] sm:$0xf] }
 0x641   : > { %v2143_v39 = vsel %vm2142_vm8, %v4401_v13, %v2139_v30  ;;  %4404 = vrsqrt.f32 %v5198_v14  ;;  %2714 = vmatpush.bf16.msra.mxu3 %v4016_v56  ;;  %v4416_v30 = vld [vmem:[#allocation2] sm:$0xff]  ;;  %vm2152_vm11 = vmor %vm2150_vm10, %vm2151_vm9  ;;  %vm2160_vm13 = vweird.f32 %v5198_v14  ;;  %v3940_v25 = vor.u32 %v4240_v20, %v3937_v24 }
 0x642   : > { %v2166_v46 = vmul.f32 %v2143_v39, %v5074_v61  ;;  %v2167_v47 = vmul.f32 %v2143_v39, %v5076_v59  ;;  %v2146_v55 = vmul.f32 %v5195_v33, %v2145_v40  ;;  %v3960_v61 = vor.u32 %v4247_v52, %v3959_v51  ;;  %v3961_v59 = vld [vmem:[%s4595_s28 + $0x78] sm:$0xf0]  ;;  %2754 = vmatpush.bf16.msrb.mxu1 %v4004_v19  ;;  %v4250_v19 = vld [vmem:[%s4595_s28 + $0x94] sm:$0xf] }
 0x643   : > { %v3964_v2 = vor.u32 %v4246_v58, %v3961_v59  ;;  %v5236_v31 = vadd.f32 %v4416_v30, %v2191_v1  ;;  %v4252_v30 = vld [vmem:[%s4595_s28 + $0xa4] sm:$0xf] }
 0x644   : > { %v2179_v63 = vmul.f32 %v5174_v22, %v2166_v46  ;;  %v2180_v0 = vmul.f32 %v5183_v26, %v2167_v47  ;;  %v2147_v7 = vmul.f32 0.5, %v2146_v55  ;;  %2694 = vmatpush.bf16.msra.mxu2 %v3960_v61 }
 0x645   : > { %2732 = vmatpush.bf16.msrb.mxu0 %v3964_v2  ;;  %2715 = vmatpush.bf16.msra.mxu3 %v4008_v8  ;;  %v3943_v2 = vld [vmem:[%s4595_s28 + $0x50] sm:$0xf] }
 0x646   : > { %v2192_v13 = vadd.f32 %v5188_v49, %v2179_v63  ;;  %v2193_v15 = vadd.f32 %v5190_v29, %v2180_v0  ;;  %v2148_v21 = vsub.f32 1.5, %v2147_v7  ;;  %v3944_v6 = vor.u32 %v4243_v62, %v3943_v2  ;;  %v3945_v7 = vld [vmem:[%s4595_s28 + $0x58] sm:$0xf0]  ;;  %v4233_v2 = vld [vmem:[%s4595_s28 + $0x4] sm:$0xf0] }
 0x647   : > { %v4405_v27 = vpop.eup %4404  ;;  %v3948_v8 = vor.u32 %v4242_v5, %v3945_v7  ;;  %v4232_v62 = vld [vmem:[%s4595_s28 + $0x4] sm:$0xf] }
 0x648   : > { %v5234_v44 = vadd.f32 %v4415_v53, %v2192_v13  ;;  %v5238_v32 = vadd.f32 %v4417_v54, %v2193_v15  ;;  %v2149_v37 = vmul.f32 %v5195_v33, %v2148_v21  ;;  %v2155_v38 = vmul.f32 %v4405_v27, %v5198_v14  ;;  %2695 = vmatpush.bf16.msra.mxu2 %v3952_v16  ;;  %v4254_v13 = vld [vmem:[%s4595_s28 + $0xb4] sm:$0xf]  ;;  %v3993_v16 = vld [vmem:[%s4595_s28 + $0xb8] sm:$0xf0]  ;;  %v4241_v21 = vld [vmem:[%s4595_s28 + $0x44] sm:$0xf0] }
 0x649   : > { %2733 = vmatpush.bf16.msrb.mxu0 %v3956_v23  ;;  %2716 = vmatpush.bf16.msra.mxu3 %v4000_v41  ;;  %vm2161_vm12 = vweird.f32 %v4405_v27  ;;  %v3992_v15 = vor.u32 %v4255_v12, %v3991_v9  ;;  %v3996_v17 = vor.u32 %v4254_v13, %v3993_v16  ;;  %v3936_v23 = vor.u32 %v4241_v21, %v3935_v18  ;;  %v3985_v54 = vld [vmem:[%s4595_s28 + $0xa8] sm:$0xf0] }
 0x64a   : > { %v2206_v39 = vpack.c.bf16 %v5234_v44, %v5232_v35  ;;  %v2207_v40 = vpack.c.bf16 %v5238_v32, %v5236_v31  ;;  %v2153_v42 = vsel %vm2152_vm11, %v5195_v33, %v2149_v37  ;;  %v2156_v43 = vmul.f32 %v4405_v27, %v2155_v38  ;;  %vm2162_vm14 = vmor %vm2160_vm13, %vm2161_vm12  ;;  %v4239_v37 = vld [vmem:[%s4595_s28 + $0x34] sm:$0xf0]  ;;  %v4238_v38 = vld [vmem:[%s4595_s28 + $0x34] sm:$0xf] }
 0x64b   : > { %v2168_v46 = vmul.f32 %v2153_v42, %v5083_v3  ;;  %v2169_v47 = vmul.f32 %v2153_v42, %v5085_v4  ;;  %2755 = vmatpush.bf16.msrb.mxu1 %v3996_v17  ;;  %v3988_v34 = vor.u32 %v4252_v30, %v3985_v54  ;;  %v3975_v42 = vld [vmem:[%s4595_s28 + $0x90] sm:$0xf] }
 0x64c   : > { %2416 = vmatmul.bf16.vlgmr.msrb.gmra.mxu2 %v2206_v39  ;;  %2435 = vmatmul.bf16.vlgmr.msrb.gmra.mxu3 %v2207_v40  ;;  %v2157_v45 = vmul.f32 0.5, %v2156_v43  ;;  %v4251_v43 = vld [vmem:[%s4595_s28 + $0x94] sm:$0xf0] }
 0x64d   : > { %2454 = vmatmul.bf16.vlgmr.msra.gmra.mxu0 %v2206_v39  ;;  %2473 = vmatmul.bf16.vlgmr.msra.gmra.mxu1 %v2207_v40  ;;  %v2181_v33 = vmul.f32 %v5174_v22, %v2168_v46  ;;  %v2182_v52 = vmul.f32 %v5183_v26, %v2169_v47  ;;  %v3928_v39 = vor.u32 %v4239_v37, %v3927_v36  ;;  %v3929_v40 = vld [vmem:[%s4595_s28 + $0x38] sm:$0xf0] }
 0x64e   : > { %v2158_v48 = vsub.f32 1.5, %v2157_v45  ;;  %2696 = vmatpush.bf16.msra.mxu2 %v3944_v6  ;;  %2734 = vmatpush.bf16.msrb.mxu0 %v3948_v8  ;;  %v3932_v41 = vor.u32 %v4238_v38, %v3929_v40  ;;  %v3976_v45 = vor.u32 %v4251_v43, %v3975_v42  ;;  %v3977_v46 = vld [vmem:[%s4595_s28 + $0x98] sm:$0xf0]  ;;  %v3905_v6 = vld [vmem:[%s4595_s28 + $0x8] sm:$0xf0] }
 0x64f   : > { %v2194_v4 = vadd.f32 %v5188_v49, %v2181_v33  ;;  %v2195_v58 = vadd.f32 %v5190_v29, %v2182_v52  ;;  %2717 = vmatpush.bf16.msra.mxu3 %v3992_v15  ;;  %2756 = vmatpush.bf16.msrb.mxu1 %v3988_v34  ;;  %v3980_v47 = vor.u32 %v4250_v19, %v3977_v46  ;;  %v4236_v33 = vld [vmem:[%s4595_s28 + $0x24] sm:$0xf]  ;;  %v2242_v8 = vld [vmem:[%s5509_s30] sm:$0x3] }
 0x650   : > { %v2159_v51 = vmul.f32 %v4405_v27, %v2158_v48  ;;  %v3919_v48 = vld [vmem:[%s4595_s28 + $0x20] sm:$0xf]  ;;  %v3908_v7 = vor.u32 %v4232_v62, %v3905_v6  ;;  %v2245_v13 = vperm.slane %v2242_v8, 1  ;;  %v2244_v18 = vperm.slane %v2242_v8, 0 }
 0x651   : > { %v5265_v63 = vadd.f32 %v4418_v60, %v2194_v4  ;;  %v4248_v4 = vld [vmem:[%s4595_s28 + $0x84] sm:$0xf]  ;;  %v4235_v60 = vld [vmem:[%s4595_s28 + $0x14] sm:$0xf0] }
 0x652   : > { %v2163_v55 = vsel %vm2162_vm14, %v4405_v27, %v2159_v51  ;;  %v3983_v27 = vld [vmem:[%s4595_s28 + $0xa0] sm:$0xf]  ;;  %2697 = vmatpush.bf16.msra.mxu2 %v3936_v23  ;;  %2735 = vmatpush.bf16.msrb.mxu0 %v3940_v25  ;;  %v4237_v51 = vld [vmem:[%s4595_s28 + $0x24] sm:$0xf0] }
 0x653   : > { %v2170_v56 = vmul.f32 %v2163_v55, %v5092_v10  ;;  %v2171_v57 = vmul.f32 %v2163_v55, %v5094_v11  ;;  %v4419_v10 = vld [vmem:[#allocation2 + $0x28] sm:$0xff]  ;;  %v3984_v53 = vor.u32 %v4253_v28, %v3983_v27  ;;  %v3920_v52 = vor.u32 %v4237_v51, %v3919_v48  ;;  %2757 = vmatpush.bf16.msrb.mxu1 %v3980_v47 }
 0x654   : > { %v3921_v55 = vld [vmem:[%s4595_s28 + $0x28] sm:$0xf0] }
 0x655   : > { %v2183_v3 = vmul.f32 %v5174_v22, %v2170_v56  ;;  %v2184_v61 = vmul.f32 %v5183_v26, %v2171_v57  ;;  %v4420_v22 = vld [vmem:[#allocation2 + $0x20] sm:$0xff]  ;;  %v4421_v26 = vld [vmem:[#allocation2 + $0x38] sm:$0xff]  ;;  %2718 = vmatpush.bf16.msra.mxu3 %v3984_v53  ;;  %v3924_v56 = vor.u32 %v4236_v33, %v3921_v55 }
 0x656   : > { %v5269_v0 = vadd.f32 %v4420_v22, %v2195_v58  ;;  %2698 = vmatpush.bf16.msra.mxu2 %v3928_v39  ;;  %2736 = vmatpush.bf16.msrb.mxu0 %v3932_v41  ;;  %v3967_v57 = vld [vmem:[%s4595_s28 + $0x80] sm:$0xf]  ;;  %v3969_v58 = vld [vmem:[%s4595_s28 + $0x88] sm:$0xf0] }
 0x657   : > { %v2196_v14 = vadd.f32 %v5188_v49, %v2183_v3  ;;  %v2197_v59 = vadd.f32 %v5190_v29, %v2184_v61  ;;  %v4249_v3 = vld [vmem:[%s4595_s28 + $0x84] sm:$0xf0] }
 0x658   : > { %v3968_v61 = vor.u32 %v4249_v3, %v3967_v57 }
 0x659   : > { %v5267_v11 = vadd.f32 %v4419_v10, %v2196_v14  ;;  %v5271_v49 = vadd.f32 %v4421_v26, %v2197_v59  ;;  %2719 = vmatpush.bf16.msra.mxu3 %v3976_v45  ;;  %v3972_v14 = vor.u32 %v4248_v4, %v3969_v58  ;;  %v3911_v59 = vld [vmem:[%s4595_s28 + $0x10] sm:$0xf]  ;;  %v4234_v10 = vld [vmem:[%s4595_s28 + $0x14] sm:$0xf]  ;;  %v3913_v26 = vld [vmem:[%s4595_s28 + $0x18] sm:$0xf0] }
 0x65a   : > { %2699 = vmatpush.bf16.msra.mxu2 %v3920_v52  ;;  %2737 = vmatpush.bf16.msrb.mxu0 %v3924_v56  ;;  %v3912_v22 = vor.u32 %v4235_v60, %v3911_v59 }
 0x65b   : > { %v2208_v29 = vpack.c.bf16 %v5267_v11, %v5265_v63  ;;  %v2209_v1 = vpack.c.bf16 %v5271_v49, %v5269_v0  ;;  %2758 = vmatpush.bf16.msrb.mxu1 %v3972_v14 }
 0x65d   : > { %2421 = vmatmul.bf16.gmra.mxu2 %v2208_v29  ;;  %2440 = vmatmul.bf16.gmra.mxu3 %v2209_v1 }
 0x65e   : > { %2459 = vmatmul.bf16.gmra.mxu0 %v2208_v29  ;;  %2478 = vmatmul.bf16.gmra.mxu1 %v2209_v1  ;;  %v3916_v29 = vor.u32 %v4234_v10, %v3913_v26  ;;  %v3903_v1 = vld [vmem:[%s4595_s28] sm:$0xf] }
 0x65f   : > { %2720 = vmatpush.bf16.msra.mxu3 %v3968_v61  ;;  %2700 = vmatpush.bf16.msra.mxu2 %v3912_v22  ;;  %v3904_v5 = vor.u32 %v4233_v2, %v3903_v1  ;;  %v2528_v26 = vld [vmem:[%s723_s22] sm:$0x3] }
 0x660   : > { %2738 = vmatpush.bf16.msrb.mxu0 %v3916_v29  ;;  %v2531_v29 = vperm.slane %v2528_v26, 1 }
 0x663   : > { %2701 = vmatpush.bf16.msra.mxu2 %v3904_v5  ;;  %v2530_v5 = vperm.slane %v2528_v26, 0 }
 0x664   : > { %2739 = vmatpush.bf16.msrb.mxu0 %v3908_v7 }
 0x6ca   : > { %v2455_v9 = vpop.f32.mrf.mxu0  ;;  %v2474_v12 = vpop.f32.mrf.mxu1 }
 0x6cb   : > { %v2456_v15 = vadd.f32 %v2455_v9, %v2245_v13 }
 0x6cd   : > { %v2475_v23 = vadd.f32 %v2474_v12, %v2456_v15 }
 0x6cf   : > { %v2417_v16 = vpop.f32.mrf.mxu2  ;;  %v2436_v17 = vpop.f32.mrf.mxu3  ;;  %v2485_v28 = vmax.f32 %v2475_v23, 0.0 }
 0x6d0   : > { %v2418_v25 = vadd.f32 %v2417_v16, %v2244_v18 }
 0x6d2   : > { %v2457_v21 = vpop.f32.mrf.mxu0  ;;  %v2476_v20 = vpop.f32.mrf.mxu1  ;;  %v2437_v34 = vadd.f32 %v2436_v17, %v2418_v25 }
 0x6d3   : > { %v2458_v24 = vadd.f32 %v2457_v21, %v2245_v13 }
 0x6d4   : > { %v2484_v39 = vmax.f32 %v2437_v34, 0.0 }
 0x6d5   : > { %v2477_v27 = vadd.f32 %v2476_v20, %v2458_v24 }
 0x6d7   : > { %v2487_v53 = vmax.f32 %v2477_v27, 0.0  ;;  %v2419_v30 = vpop.f32.mrf.mxu2  ;;  %v2438_v54 = vpop.f32.mrf.mxu3 }
 0x6d8   : > { %v2420_v36 = vadd.f32 %v2419_v30, %v2244_v18 }
 0x6d9   : > { %v2493_v37 = vpack.c.bf16 %v2487_v53, %v2485_v28 }
 0x6da   : > { %v2439_v38 = vadd.f32 %v2438_v54, %v2420_v36 }
 0x6db   : > { %2721 = vmatmul.bf16.vlgmr.msra.gmra.mxu3 %v2493_v37  ;;  %2759 = vmatmul.bf16.vlgmr.msrb.gmra.mxu1 %v2493_v37  ;;  %v2460_v41 = vpop.f32.mrf.mxu0  ;;  %v2479_v42 = vpop.f32.mrf.mxu1 }
 0x6dc   : > { %v2486_v40 = vmax.f32 %v2439_v38, 0.0  ;;  %v2461_v19 = vadd.f32 %v2460_v41, %v2245_v13 }
 0x6de   : > { %v2492_v43 = vpack.c.bf16 %v2486_v40, %v2484_v39  ;;  %v2480_v48 = vadd.f32 %v2479_v42, %v2461_v19 }
 0x6e0   : > { %2702 = vmatmul.bf16.vlgmr.msra.gmra.mxu2 %v2492_v43  ;;  %2740 = vmatmul.bf16.vlgmr.msrb.gmra.mxu0 %v2492_v43  ;;  %v2422_v45 = vpop.f32.mrf.mxu2  ;;  %v2441_v46 = vpop.f32.mrf.mxu3  ;;  %v2489_v56 = vmax.f32 %v2480_v48, 0.0 }
 0x6e1   : > { %v2423_v33 = vadd.f32 %v2422_v45, %v2244_v18 }
 0x6e3   : > { %v2462_v47 = vpop.f32.mrf.mxu0  ;;  %v2481_v52 = vpop.f32.mrf.mxu1  ;;  %v2442_v4 = vadd.f32 %v2441_v46, %v2423_v33 }
 0x6e4   : > { %v2463_v51 = vadd.f32 %v2462_v47, %v2245_v13 }
 0x6e5   : > { %v2488_v60 = vmax.f32 %v2442_v4, 0.0 }
 0x6e6   : > { %v2482_v55 = vadd.f32 %v2481_v52, %v2463_v51 }
 0x6e8   : > { %v2491_v57 = vmax.f32 %v2482_v55, 0.0  ;;  %v2424_v3 = vpop.f32.mrf.mxu2  ;;  %v2443_v58 = vpop.f32.mrf.mxu3 }
 0x6e9   : > { %v2425_v61 = vadd.f32 %v2424_v3, %v2244_v18 }
 0x6ea   : > { %v2495_v14 = vpack.c.bf16 %v2491_v57, %v2489_v56 }
 0x6eb   : > { %v2444_v59 = vadd.f32 %v2443_v58, %v2425_v61 }
 0x6ec   : > { %2726 = vmatmul.bf16.gmra.mxu3 %v2495_v14  ;;  %2764 = vmatmul.bf16.gmra.mxu1 %v2495_v14 }
 0x6ed   : > { %v2490_v10 = vmax.f32 %v2444_v59, 0.0 }
 0x6ef   : > { %v2494_v22 = vpack.c.bf16 %v2490_v10, %v2488_v60 }
 0x6f1   : > { %2707 = vmatmul.bf16.gmra.mxu2 %v2494_v22  ;;  %2745 = vmatmul.bf16.gmra.mxu0 %v2494_v22 }
 0x758   : > { %v2760_v2 = vpop.f32.mrf.mxu1 }
 0x75d   : > { %v2741_v1 = vpop.f32.mrf.mxu0 }
 0x75e   : > { %v2742_v62 = vadd.f32 %v2741_v1, %v2531_v29  ;;  %v2722_v6 = vpop.f32.mrf.mxu3 }
 0x760   : > { %v2761_v8 = vadd.f32 %v2760_v2, %v2742_v62  ;;  %v2762_v18 = vpop.f32.mrf.mxu1 }
 0x762   : > { %v2771_v15 = vmax.f32 %v2761_v8, 0.0 }
 0x763   : > { %v2703_v7 = vpop.f32.mrf.mxu2 }
 0x764   : > { %v2704_v9 = vadd.f32 %v2703_v7, %v2530_v5 }
 0x765   : > { %v2743_v12 = vpop.f32.mrf.mxu0 }
 0x766   : > { %v2723_v13 = vadd.f32 %v2722_v6, %v2704_v9  ;;  %v2744_v17 = vadd.f32 %v2743_v12, %v2531_v29  ;;  %v2724_v20 = vpop.f32.mrf.mxu3 }
 0x768   : > { %v2770_v16 = vmax.f32 %v2723_v13, 0.0  ;;  %v2763_v24 = vadd.f32 %v2762_v18, %v2744_v17 }
 0x769   : > { %v2765_v36 = vpop.f32.mrf.mxu1 }
 0x76a   : > { %v2780_v21 = vadd.f32 %v2771_v15, %v2770_v16  ;;  %v2773_v53 = vmax.f32 %v2763_v24, 0.0 }
 0x76b   : > { %v2705_v23 = vpop.f32.mrf.mxu2 }
 0x76c   : > { %v2706_v25 = vadd.f32 %v2705_v23, %v2530_v5  ;;  %2781 = vadd.xlane.f32.xlu2 %v2780_v21 }
 0x76e   : > { %v2725_v27 = vadd.f32 %v2724_v20, %v2706_v25  ;;  %v2746_v28 = vpop.f32.mrf.mxu0 }
 0x76f   : > { %v2747_v54 = vadd.f32 %v2746_v28, %v2531_v29  ;;  %v2727_v37 = vpop.f32.mrf.mxu3 }
 0x770   : > { %v2772_v30 = vmax.f32 %v2725_v27, 0.0 }
 0x771   : > { %v2766_v39 = vadd.f32 %v2765_v36, %v2747_v54  ;;  %v2767_v47 = vpop.f32.mrf.mxu1 }
 0x772   : > { %v2783_v34 = vadd.f32 %v2773_v53, %v2772_v30 }
 0x773   : > { %v2775_v43 = vmax.f32 %v2766_v39, 0.0  ;;  %v2778_v39 = vld [vmem:[%s727_s17] sm:$0x3]  ;;  %s5510_s17 = sld [smem:[#allocation10_spill]] (!%p4029_p6) }
 0x774   : > { %2784 = vadd.xlane.f32.xlu1 %v2783_v34  ;;  %v2708_v38 = vpop.f32.mrf.mxu2 }
 0x775   : > { %v2709_v40 = vadd.f32 %v2708_v38, %v2530_v5 }
 0x776   : > { %v2748_v41 = vpop.f32.mrf.mxu0 }
 0x777   : > { %v2728_v42 = vadd.f32 %v2727_v37, %v2709_v40  ;;  %v2749_v45 = vadd.f32 %v2748_v41, %v2531_v29  ;;  %v2729_v52 = vpop.f32.mrf.mxu3 }
 0x779   : > { %v2774_v19 = vmax.f32 %v2728_v42, 0.0  ;;  %v2768_v51 = vadd.f32 %v2767_v47, %v2749_v45  ;;  %v5368_v47 = vperm.slane %v2778_v39, 0 }
 0x77b   : > { %v2786_v46 = vadd.f32 %v2775_v43, %v2774_v19  ;;  %v2777_v56 = vmax.f32 %v2768_v51, 0.0 }
 0x77c   : > { %v2710_v48 = vpop.f32.mrf.mxu2 }
 0x77d   : > { %v2711_v33 = vadd.f32 %v2710_v48, %v2530_v5  ;;  %2787 = vadd.xlane.f32.xlu0 %v2786_v46  ;;  %v5370_v48 = vperm.slane %v2778_v39, 1 }
 0x77f   : > { %v2730_v55 = vadd.f32 %v2729_v52, %v2711_v33 }
 0x781   : > { %v2776_v57 = vmax.f32 %v2730_v55, 0.0 }
 0x783   : > { %v2789_v3 = vadd.f32 %v2777_v56, %v2776_v57 }
 0x785   : > { %2790 = vadd.xlane.f32.xlu2 %v2789_v3 }
 0x7df   : > { %v2782_v4 = vpop.xlane.xlu2 %2781 }
 0x7e0   : > { %v2792_v61 = vmul.f32 %v2782_v4, %v5062_v50 }
 0x7e2   : > { %v2796_v58 = vsub.f32 %v2770_v16, %v2792_v61  ;;  %v2797_v14 = vsub.f32 %v2771_v15, %v2792_v61 }
 0x7e4   : > { %v2804_v59 = vmul.f32 %v2796_v58, %v2796_v58  ;;  %v2805_v60 = vmul.f32 %v2797_v14, %v2797_v14 }
 0x7e6   : > { %v2812_v10 = vadd.f32 %v2805_v60, %v2804_v59 }
 0x7e7   : > { %v2785_v22 = vpop.xlane.xlu1 %2784 }
 0x7e8   : > { %v2793_v26 = vmul.f32 %v2785_v22, %v5062_v50  ;;  %2813 = vadd.xlane.f32.xlu1 %v2812_v10 }
 0x7ea   : > { %v5329_v29 = vsub.f32 %v2772_v30, %v2793_v26  ;;  %v5331_v1 = vsub.f32 %v2773_v53, %v2793_v26 }
 0x7ec   : > { %v2806_v2 = vmul.f32 %v5329_v29, %v5329_v29  ;;  %v2807_v62 = vmul.f32 %v5331_v1, %v5331_v1 }
 0x7ee   : > { %v2815_v5 = vadd.f32 %v2807_v62, %v2806_v2 }
 0x7f0   : > { %2816 = vadd.xlane.f32.xlu0 %v2815_v5  ;;  %v2788_v6 = vpop.xlane.xlu0 %2787 }
 0x7f1   : > { %v2794_v7 = vmul.f32 %v2788_v6, %v5062_v50 }
 0x7f3   : > { %v5338_v8 = vsub.f32 %v2774_v19, %v2794_v7  ;;  %v5340_v9 = vsub.f32 %v2775_v43, %v2794_v7  ;;  %v2779_v43 = vld [vmem:[%s731_s14] sm:$0x3] }
 0x7f4   : > { %v5372_v33 = vperm.slane %v2779_v43, 0 }
 0x7f5   : > { %v2808_v12 = vmul.f32 %v5338_v8, %v5338_v8  ;;  %v2809_v13 = vmul.f32 %v5340_v9, %v5340_v9 }
 0x7f7   : > { %v2818_v15 = vadd.f32 %v2809_v13, %v2808_v12 }
 0x7f8   : > { %v2791_v16 = vpop.xlane.xlu2 %2790 }
 0x7f9   : > { %v2795_v17 = vmul.f32 %v2791_v16, %v5062_v50  ;;  %2819 = vadd.xlane.f32.xlu2 %v2818_v15 }
 0x7fb   : > { %v5347_v18 = vsub.f32 %v2776_v57, %v2795_v17  ;;  %v5349_v21 = vsub.f32 %v2777_v56, %v2795_v17  ;;  %v5374_v56 = vperm.slane %v2779_v43, 1 }
 0x7fd   : > { %v2810_v20 = vmul.f32 %v5347_v18, %v5347_v18  ;;  %v2811_v23 = vmul.f32 %v5349_v21, %v5349_v21 }
 0x7ff   : > { %v2821_v24 = vadd.f32 %v2811_v23, %v2810_v20 }
 0x801   : > { %2822 = vadd.xlane.f32.xlu1 %v2821_v24 }
 0x85b   : > { %v2814_v25 = vpop.xlane.xlu1 %2813 }
 0x85c   : > { %v2824_v27 = vmul.f32 %v2814_v25, %v5062_v50 }
 0x85e   : > { %v2828_v28 = vadd.f32 1e-05, %v2824_v27 }
 0x860   : > { %4406 = vrsqrt.f32 %v2828_v28  ;;  %vm2838_vm0 = vweird.f32 %v2828_v28 }
 0x863   : > { %v2817_v53 = vpop.xlane.xlu0 %2816 }
 0x864   : > { %v2825_v30 = vmul.f32 %v2817_v53, %v5062_v50 }
 0x866   : > { %v4407_v54 = vpop.eup %4406  ;;  %v2829_v34 = vadd.f32 1e-05, %v2825_v30 }
 0x867   : > { %v2833_v36 = vmul.f32 %v4407_v54, %v2828_v28  ;;  %vm2839_vm15 = vweird.f32 %v4407_v54 }
 0x868   : > { %4408 = vrsqrt.f32 %v2829_v34  ;;  %vm2840_vm1 = vmor %vm2838_vm0, %vm2839_vm15  ;;  %vm2848_vm3 = vweird.f32 %v2829_v34 }
 0x869   : > { %v2834_v37 = vmul.f32 %v4407_v54, %v2833_v36 }
 0x86b   : > { %v2835_v38 = vmul.f32 0.5, %v2834_v37 }
 0x86c   : > { %v2820_v41 = vpop.xlane.xlu2 %2819 }
 0x86d   : > { %v2836_v40 = vsub.f32 1.5, %v2835_v38  ;;  %v2826_v19 = vmul.f32 %v2820_v41, %v5062_v50 }
 0x86e   : > { %v4409_v42 = vpop.eup %4408 }
 0x86f   : > { %v2837_v45 = vmul.f32 %v4407_v54, %v2836_v40  ;;  %v2843_v46 = vmul.f32 %v4409_v42, %v2829_v34  ;;  %v2830_v51 = vadd.f32 1e-05, %v2826_v19  ;;  %vm2849_vm2 = vweird.f32 %v4409_v42 }
 0x870   : > { %vm2850_vm4 = vmor %vm2848_vm3, %vm2849_vm2 }
 0x871   : > { %v2841_v52 = vsel %vm2840_vm1, %v4407_v54, %v2837_v45  ;;  %v2844_v55 = vmul.f32 %v4409_v42, %v2843_v46  ;;  %4410 = vrsqrt.f32 %v2830_v51  ;;  %vm2858_vm6 = vweird.f32 %v2830_v51 }
 0x872   : > { %v2872_v57 = vmul.f32 %v2841_v52, %v2796_v58  ;;  %v2873_v3 = vmul.f32 %v2841_v52, %v2797_v14 }
 0x873   : > { %v2845_v4 = vmul.f32 0.5, %v2844_v55 }
 0x874   : > { %v2885_v61 = vmul.f32 %v5368_v47, %v2872_v57  ;;  %v2886_v59 = vmul.f32 %v5370_v48, %v2873_v3  ;;  %v2823_v10 = vpop.xlane.xlu1 %2822 }
 0x875   : > { %v2846_v60 = vsub.f32 1.5, %v2845_v4  ;;  %v2827_v2 = vmul.f32 %v2823_v10, %v5062_v50 }
 0x876   : > { %v2898_v22 = vadd.f32 %v5372_v33, %v2885_v61  ;;  %v2899_v26 = vadd.f32 %v5374_v56, %v2886_v59 }
 0x877   : > { %v2847_v62 = vmul.f32 %v4409_v42, %v2846_v60  ;;  %v4411_v5 = vpop.eup %4410  ;;  %v2831_v6 = vadd.f32 1e-05, %v2827_v2 }
 0x878   : > { %v2906_v58 = vadd.f32 %v2898_v22, %v5232_v35  ;;  %v2907_v14 = vadd.f32 %v2899_v26, %v5236_v31  ;;  %v2853_v12 = vmul.f32 %v4411_v5, %v2830_v51  ;;  %vm2859_vm5 = vweird.f32 %v4411_v5 }
 0x879   : > { %v2851_v7 = vsel %vm2850_vm4, %v4409_v42, %v2847_v62  ;;  %4412 = vrsqrt.f32 %v2831_v6  ;;  %vm2860_vm7 = vmor %vm2858_vm6, %vm2859_vm5  ;;  %vm2868_vm9 = vweird.f32 %v2831_v6 }
 0x87a   : > { %2914 = vst [vmem:[#allocation2 + $0x30] sm:$0xff] %v2906_v58  ;;  %v2874_v13 = vmul.f32 %v2851_v7, %v5329_v29  ;;  %v2875_v15 = vmul.f32 %v2851_v7, %v5331_v1  ;;  %v2854_v16 = vmul.f32 %v4411_v5, %v2853_v12 }
 0x87b   : > { %2915 = vst [vmem:[#allocation2] sm:$0xff] %v2907_v14 }
 0x87c   : > { %v2887_v50 = vmul.f32 %v5368_v47, %v2874_v13  ;;  %v2888_v17 = vmul.f32 %v5370_v48, %v2875_v15  ;;  %v2855_v20 = vmul.f32 0.5, %v2854_v16 }
 0x87e   : > { %v2900_v35 = vadd.f32 %v5372_v33, %v2887_v50  ;;  %v2901_v31 = vadd.f32 %v5374_v56, %v2888_v17  ;;  %v2856_v23 = vsub.f32 1.5, %v2855_v20 }
 0x87f   : > { %v4413_v24 = vpop.eup %4412 }
 0x880   : > { %v2908_v25 = vadd.f32 %v2900_v35, %v5234_v44  ;;  %v2909_v29 = vadd.f32 %v2901_v31, %v5238_v32  ;;  %v2857_v1 = vmul.f32 %v4411_v5, %v2856_v23  ;;  %v2863_v27 = vmul.f32 %v4413_v24, %v2831_v6 }
 0x881   : > { %vm2869_vm8 = vweird.f32 %v4413_v24 }
 0x882   : > { %2916 = vst [vmem:[#allocation2 + $0x18] sm:$0xff] %v2908_v25  ;;  %v2861_v28 = vsel %vm2860_vm7, %v4411_v5, %v2857_v1  ;;  %v2864_v53 = vmul.f32 %v4413_v24, %v2863_v27  ;;  %vm2870_vm10 = vmor %vm2868_vm9, %vm2869_vm8 }
 0x883   : > { %2917 = vst [vmem:[#allocation2 + $0x10] sm:$0xff] %v2909_v29  ;;  %v2876_v30 = vmul.f32 %v2861_v28, %v5338_v8  ;;  %v2877_v54 = vmul.f32 %v2861_v28, %v5340_v9 }
 0x884   : > { %v2865_v34 = vmul.f32 0.5, %v2864_v53 }
 0x885   : > { %v2889_v36 = vmul.f32 %v5368_v47, %v2876_v30  ;;  %v2890_v37 = vmul.f32 %v5370_v48, %v2877_v54 }
 0x886   : > { %v2866_v44 = vsub.f32 1.5, %v2865_v34 }
 0x887   : > { %v2902_v32 = vadd.f32 %v5372_v33, %v2889_v36  ;;  %v2903_v38 = vadd.f32 %v5374_v56, %v2890_v37 }
 0x888   : > { %v2867_v39 = vmul.f32 %v4413_v24, %v2866_v44 }
 0x889   : > { %v2910_v40 = vadd.f32 %v2902_v32, %v5265_v63  ;;  %v2911_v41 = vadd.f32 %v2903_v38, %v5269_v0 }
 0x88a   : > { %v2871_v8 = vsel %vm2870_vm10, %v4413_v24, %v2867_v39 }
 0x88b   : > { %2918 = vst [vmem:[#allocation2 + $0x8] sm:$0xff] %v2910_v40  ;;  %v2878_v9 = vmul.f32 %v2871_v8, %v5347_v18  ;;  %v2879_v42 = vmul.f32 %v2871_v8, %v5349_v21 }
 0x88c   : > { %2919 = vst [vmem:[#allocation2 + $0x20] sm:$0xff] %v2911_v41 }
 0x88d   : > { %v2891_v43 = vmul.f32 %v5368_v47, %v2878_v9  ;;  %v2892_v19 = vmul.f32 %v5370_v48, %v2879_v42 }
 0x88f   : > { %v2904_v45 = vadd.f32 %v5372_v33, %v2891_v43  ;;  %v2905_v46 = vadd.f32 %v5374_v56, %v2892_v19 }
 0x890   : > { %2925 = sbr.rel (%p4029_p6) target bundleno = 2364 (0x93c), region = 92 }
 0x891   : > { %v2912_v63 = vadd.f32 %v2904_v45, %v5267_v11  ;;  %v2913_v0 = vadd.f32 %v2905_v46, %v5271_v49 }
 0x893   : > { %2920 = vst [vmem:[#allocation2 + $0x28] sm:$0xff] %v2912_v63 }
 0x894   : > { %2921 = vst [vmem:[#allocation2 + $0x38] sm:$0xff] %v2913_v0 }
 0x895   : > { %v4271_v18 = vld [vmem:[%s5510_s17 + $0x38] sm:$0xff]  ;;  %v4451_v47 = vmov 16.0   ;;  %v4270_v11 = vld [vmem:[%s5510_s17 + $0x30] sm:$0xff]  ;;  %v4269_v48 = vld [vmem:[%s5510_s17 + $0x28] sm:$0xff]  ;;  %vm3021_vm12 = vcmask 1041409  }
 0x896   : > { %v4279_v21 = vld [vmem:[%s5510_s17 + $0x78] sm:$0xff]  ;;  %4423 = vrcp.f32 %v4451_v47  ;;  %3124 = vmatpush.bf16.msra.mxu0 %v4271_v18  ;;  %v4278_v49 = vld [vmem:[%s5510_s17 + $0x70] sm:$0xff]  ;;  %v4277_v51 = vld [vmem:[%s5510_s17 + $0x68] sm:$0xff] }
 0x897   : > { %3137 = vmatpush.bf16.msra.mxu1 %v4279_v21  ;;  %v2926_v33 = vld [vmem:[#allocation2 + $0x30] sm:$0xff]  ;;  %v2928_v52 = vld [vmem:[#allocation2 + $0x18] sm:$0xff]  ;;  %v2930_v55 = vld [vmem:[#allocation2 + $0x8] sm:$0xff] }
 0x898   : > { %v2934_v57 = vadd.f32 %v2928_v52, %v2926_v33  ;;  %v2927_v3 = vld [vmem:[#allocation2] sm:$0xff]  ;;  %v2929_v59 = vld [vmem:[#allocation2 + $0x10] sm:$0xff]  ;;  %v4267_v31 = vld [vmem:[%s5510_s17 + $0x18] sm:$0xff] }
 0x899   : > { %v2931_v60 = vld [vmem:[#allocation2 + $0x20] sm:$0xff]  ;;  %v2941_v2 = vadd.f32 %v2929_v59, %v2927_v3  ;;  %v4275_v23 = vld [vmem:[%s5510_s17 + $0x58] sm:$0xff]  ;;  %v4266_v36 = vld [vmem:[%s5510_s17 + $0x10] sm:$0xff] }
 0x89a   : > { %3125 = vmatpush.bf16.msra.mxu0 %v4270_v11  ;;  %v2932_v56 = vld [vmem:[#allocation2 + $0x28] sm:$0xff]  ;;  %v2935_v22 = vrot.slane %v2934_v57, 4  ;;  %v4268_v58 = vld [vmem:[%s5510_s17 + $0x20] sm:$0xff]  ;;  %v4274_v37 = vld [vmem:[%s5510_s17 + $0x50] sm:$0xff] }
 0x89b   : > { %3138 = vmatpush.bf16.msra.mxu1 %v4278_v49  ;;  %v2948_v61 = vadd.f32 %v2932_v56, %v2930_v55  ;;  %v2933_v10 = vld [vmem:[#allocation2 + $0x38] sm:$0xff]  ;;  %v4276_v14 = vld [vmem:[%s5510_s17 + $0x60] sm:$0xff]  ;;  %v2942_v12 = vrot.slane %v2941_v2, 4  ;;  %v4265_v42 = vld [vmem:[%s5510_s17 + $0x8] sm:$0xff] }
 0x89c   : > { %v4424_v4 = vpop.eup %4423  ;;  %v2955_v5 = vadd.f32 %v2933_v10, %v2931_v60  ;;  %v2936_v6 = vadd.f32 %v2935_v22, %v2934_v57  ;;  %v4273_v43 = vld [vmem:[%s5510_s17 + $0x48] sm:$0xff]  ;;  %v4264_v11 = vld [vmem:[%s5510_s17] sm:$0xff] }
 0x89d   : > { %v2963_v26 = vmul.f32 16.0, %v4424_v4  ;;  %v2949_v62 = vrot.slane %v2948_v61, 4  ;;  %v2943_v17 = vadd.f32 %v2942_v12, %v2941_v2  ;;  %vm2967_vm11 = vweird.f32 %v4424_v4  ;;  %v4272_v49 = vld [vmem:[%s5510_s17 + $0x40] sm:$0xff] }
 0x89e   : > { %3126 = vmatpush.bf16.msra.mxu0 %v4269_v48  ;;  %v2956_v15 = vrot.slane %v2955_v5, 4  ;;  %v2937_v16 = vrot.slane %v2936_v6, 2  ;;  %v4422_v57 = vld [vmem:[%s5511_s18] ss:$0 sm:$0xff] }
 0x89f   : > { %3139 = vmatpush.bf16.msra.mxu1 %v4277_v51  ;;  %v2964_v7 = vsub.f32 1.0, %v2963_v26  ;;  %v2950_v13 = vadd.f32 %v2949_v62, %v2948_v61  ;;  %v2944_v29 = vrot.slane %v2943_v17, 2 }
 0x8a0   : > { %v2957_v35 = vadd.f32 %v2956_v15, %v2955_v5  ;;  %v2938_v24 = vadd.f32 %v2937_v16, %v2936_v6 }
 0x8a1   : > { %v2965_v50 = vmul.f32 %v4424_v4, %v2964_v7  ;;  %v2951_v20 = vrot.slane %v2950_v13, 2  ;;  %v2945_v53 = vadd.f32 %v2944_v29, %v2943_v17 }
 0x8a2   : > { %3127 = vmatpush.bf16.msra.mxu0 %v4268_v58  ;;  %v2958_v27 = vrot.slane %v2957_v35, 2  ;;  %v2939_v28 = vrot.slane %v2938_v24, 1 }
 0x8a3   : > { %3140 = vmatpush.bf16.msra.mxu1 %v4276_v14  ;;  %v2966_v25 = vadd.f32 %v4424_v4, %v2965_v50  ;;  %v2952_v1 = vadd.f32 %v2951_v20, %v2950_v13  ;;  %v2946_v32 = vrot.slane %v2945_v53, 1 }
 0x8a4   : > { %v2959_v34 = vadd.f32 %v2958_v27, %v2957_v35  ;;  %v2940_v44 = vadd.f32 %v2939_v28, %v2938_v24 }
 0x8a5   : > { %v2953_v30 = vrot.slane %v2952_v1, 1  ;;  %v2968_v54 = vsel %vm2967_vm11, %v4424_v4, %v2966_v25  ;;  %v2947_v41 = vadd.f32 %v2946_v32, %v2945_v53 }
 0x8a6   : > { %3128 = vmatpush.bf16.msra.mxu0 %v4267_v31  ;;  %v2960_v39 = vrot.slane %v2959_v34, 1  ;;  %v2969_v40 = vmul.f32 %v2968_v54, %v2940_v44 }
 0x8a7   : > { %3141 = vmatpush.bf16.msra.mxu1 %v4275_v23  ;;  %v2954_v38 = vadd.f32 %v2953_v30, %v2952_v1  ;;  %v2970_v45 = vmul.f32 %v2968_v54, %v2947_v41 }
 0x8a8   : > { %v2961_v9 = vadd.f32 %v2960_v39, %v2959_v34  ;;  %v2973_v19 = vpack.c.bf16 %v2969_v40, %v2969_v40 }
 0x8a9   : > { %v2971_v8 = vmul.f32 %v2968_v54, %v2954_v38  ;;  %v2974_v18 = vpack.c.bf16 %v2970_v45, %v2970_v45 }
 0x8aa   : > { %3129 = vmatpush.bf16.msra.mxu0 %v4266_v36  ;;  %v2972_v63 = vmul.f32 %v2968_v54, %v2961_v9  ;;  %v3017_v0 = vunpack.c.l.b16 %v2973_v19 }
 0x8ab   : > { %3142 = vmatpush.bf16.msra.mxu1 %v4274_v37  ;;  %v2975_v46 = vpack.c.bf16 %v2971_v8, %v2971_v8  ;;  %v3018_v48 = vunpack.c.l.b16 %v2974_v18 }
 0x8ac   : > { %v2976_v47 = vpack.c.bf16 %v2972_v63, %v2972_v63 }
 0x8ad   : > { %v3019_v21 = vunpack.c.l.b16 %v2975_v46 }
 0x8ae   : > { %3130 = vmatpush.bf16.msra.mxu0 %v4265_v42  ;;  %v3020_v33 = vunpack.c.l.b16 %v2976_v47 }
 0x8af   : > { %3143 = vmatpush.bf16.msra.mxu1 %v4273_v43  ;;  %v3022_v51 = vsel %vm3021_vm12, %v3019_v21, %v3017_v0 }
 0x8b0   : > { %v3024_v52 = vpack.c.b16 %v3022_v51, %v3022_v51  ;;  %v3023_v55 = vsel %vm3021_vm12, %v3020_v33, %v3018_v48 }
 0x8b1   : > { %v3025_v56 = vpack.c.b16 %v3023_v55, %v3023_v55 }
 0x8b2   : > { %3131 = vmatpush.bf16.msra.mxu0 %v4264_v11 }
 0x8b3   : > { %3144 = vmatpush.bf16.msra.mxu1 %v4272_v49 }
 0x8b5   : > { %3132 = vmatmul.bf16.vlgmr.msra.gmra.mxu0 %v3024_v52 }
 0x8b6   : > { %3145 = vmatmul.bf16.vlgmr.msra.gmra.mxu1 %v3025_v56 }
 0x932   : > { %v3133_v3 = vpop.f32.mrf.mxu0 }
 0x933   : > { %v3146_v4 = vpop.f32.mrf.mxu1  ;;  %v3134_v61 = vadd.f32 %v4422_v57, %v3133_v3 }
 0x935   : > { %v3147_v59 = vadd.f32 %v3146_v4, %v3134_v61 }
 0x937   : > { %3150 = vst [vmem:[%s5512_s0] sm:$0x3] %v3147_v59 }
 0x93a   : > { %v3135_v60 = vpop.f32.mrf.mxu0 }
 0x93b   : > { %v3148_v10 = vpop.f32.mrf.mxu1 }
 0x93c PF: > { %s5513_s20 = sld [smem:[#allocation4_spill]] }
 0x93d   : > { %s5514_s21 = sld [smem:[#allocation3_spill]] }
 0x93e   : > { %s5515_s22 = sld [smem:[#allocation5_spill]] }
 0x942   : > { %s26_s23 = sadd.s32 1, %s5513_s20  }
 0x943   : > { %p23_p7 = scmp.ge.s32.totalorder %s26_s23, 4  }
 0x945   :  { %25 = sbr.rel (!%p23_p7) target bundleno = 7 (0x7), region = 155 }

</bundles_post_ra>
